<compile_context>
chip_gen: v7x
topology: tpu7x:2x2x1
jax: 0.10.0
libtpu: 0.0.40
codegen_flags: <defaults>
</compile_context>

<pallas_src>
import functools

import jax
import jax.numpy as jnp
from jax.experimental import pallas as pl
from jax.experimental.pallas import tpu as pltpu

RMS_EPS = 1e-6
C_BETA = 1e-4
IGNORE_INDEX = -100
NEG_BIG = -1e30                      # bias for padded vocab columns
RES_DTYPE = jnp.bfloat16             # residual-stream / weight storage dtype


def _round_up(x, m):
    return ((x + m - 1) // m) * m


@functools.lru_cache(maxsize=None)
def _chip_config():
    """Per-generation tiles + VMEM budget (trace-time query, safe fallback)."""
    # Conservative defaults that fit every generation (incl. v7x's 64 MiB VMEM).
    cfg = {"tm": 256, "th": 1024, "tv": 1024, "vmem_limit": 48 * 1024 * 1024}
    try:
        info = pltpu.get_tpu_info()
        cap = int(info.vmem_capacity_bytes)
        if cap > 64 * 1024 * 1024:            # v5e / v6e: 128 MiB physical VMEM
            cfg.update(th=2048, tv=2048, vmem_limit=100 * 1024 * 1024)
        ver = str(getattr(info, "chip_version", "")).lower()
        if "5" in ver:                        # v5e: 4x128 MXU, 1 vst slot, lower HBM BW
            cfg.update(tm=128, tv=1024)
    except Exception:
        pass
    return cfg


# ----------------------------- Pallas kernels ------------------------------


def _rmsnorm(x, g):
    var = jnp.mean(x * x, axis=-1, keepdims=True)
    return x * jax.lax.rsqrt(var + RMS_EPS) * g


def residual_mlp_resident_kernel(x_ref, g_ref, w1_ref, b1_ref, w2_ref, b2_ref,
                                 o_ref):
    """x = x + MLP(RMSNorm(x)); grid = (row tiles,), weights resident in VMEM."""
    x = x_ref[...].astype(jnp.float32)
    xn = _rmsnorm(x, g_ref[...])
    h = jnp.dot(xn.astype(w1_ref.dtype), w1_ref[...],
                preferred_element_type=jnp.float32) + b1_ref[...]
    h = jax.nn.gelu(h, approximate=True)
    y = jnp.dot(h.astype(w2_ref.dtype), w2_ref[...],
                preferred_element_type=jnp.float32) + b2_ref[...]
    o_ref[...] = (x + y).astype(o_ref.dtype)


def residual_mlp_tiled_kernel(x_ref, g_ref, w1_ref, b1_ref, w2_ref, b2_ref,
                              o_ref, xn_sc, acc_sc):
    """x = x + MLP(RMSNorm(x)); grid = (row tiles, hidden tiles)."""
    h_idx = pl.program_id(1)
    nh = pl.num_programs(1)

    @pl.when(h_idx == 0)
    def _():
        xn_sc[...] = _rmsnorm(x_ref[...].astype(jnp.float32),
                              g_ref[...]).astype(xn_sc.dtype)

    h = jnp.dot(xn_sc[...], w1_ref[...],
                preferred_element_type=jnp.float32) + b1_ref[...]
    h = jax.nn.gelu(h, approximate=True)
    part = jnp.dot(h.astype(w2_ref.dtype), w2_ref[...],
                   preferred_element_type=jnp.float32)

    @pl.when(h_idx == 0)       # first partial product written directly, no zero-fill
    def _():
        acc_sc[...] = part

    @pl.when(h_idx > 0)
    def _():
        acc_sc[...] = acc_sc[...] + part

    @pl.when(h_idx == nh - 1)
    def _():
        o_ref[...] = (x_ref[...].astype(jnp.float32) + acc_sc[...]
                      + b2_ref[...]).astype(o_ref.dtype)


def unembed_lse_nll_kernel(x_ref, g_ref, wu_ref, bu_ref, tgt_ref,
                           lse_ref, nll_ref, m_sc, l_sc, t_sc):
    """Streaming log-sum-exp + fused masked-NLL target gather.

    grid = (vocab tiles [outer], row tiles [inner]) so wu is streamed from HBM
    exactly once.  Running per-row stats are held in VMEM scratch indexed by
    row tile and persist across the outer vocab sweep.
    """
    v = pl.program_id(0)
    i = pl.program_id(1)
    tv = wu_ref.shape[1]

    xn = _rmsnorm(x_ref[...].astype(jnp.float32), g_ref[...])
    logits = jnp.dot(xn.astype(wu_ref.dtype), wu_ref[...],
                     preferred_element_type=jnp.float32) + bu_ref[...]

    # Gather logit[target]: the target column lands in exactly one vocab tile.
    # IGNORE_INDEX (-100) - v*tv is always negative so it never matches a
    # column -> a single int compare per element, no extra validity mask here.
    tgt = tgt_ref[...]                                           # (tm, 1) i32
    col = jax.lax.broadcasted_iota(jnp.int32, logits.shape, 1)
    hit = col == (tgt - v * tv)
    t_hit = jnp.sum(jnp.where(hit, logits, 0.0), axis=-1, keepdims=True)

    m_tile = jnp.max(logits, axis=-1, keepdims=True)

    @pl.when(v == 0)           # first vocab tile: write stats directly
    def _():
        m_sc[i] = m_tile
        l_sc[i] = jnp.sum(jnp.exp(logits - m_tile), axis=-1, keepdims=True)
        t_sc[i] = t_hit

    @pl.when(v > 0)            # online log-sum-exp update
    def _():
        m_prev = m_sc[i]
        m_new = jnp.maximum(m_prev, m_tile)
        l_sc[i] = (l_sc[i] * jnp.exp(m_prev - m_new)
                   + jnp.sum(jnp.exp(logits - m_new), axis=-1, keepdims=True))
        m_sc[i] = m_new
        t_sc[i] = t_sc[i] + t_hit

    # Each (v, i) output block is visited exactly once; write the running
    # prefix values (the last vocab slab holds the full reduction).
    lse_run = m_sc[i] + jnp.log(l_sc[i])
    valid = (tgt != IGNORE_INDEX).astype(jnp.float32)
    lse_ref[0] = lse_run
    nll_ref[0] = (lse_run - t_sc[i]) * valid


def unembed_logprob_kernel(x_ref, g_ref, wu_ref, bu_ref, lse_ref, lp_ref):
    """log_probs = Linear(RMSNorm(x)) - lse, written directly (no f32 logits)."""
    xn = _rmsnorm(x_ref[...].astype(jnp.float32), g_ref[...])
    logits = jnp.dot(xn.astype(wu_ref.dtype), wu_ref[...],
                     preferred_element_type=jnp.float32) + bu_ref[...]
    lp_ref[...] = logits - lse_ref[...]


# ------------------------------- wrappers -----------------------------------


def residual_mlp_block(x, g, w1, b1, w2, b2, *, tm, th, vmem_limit,
                       force_tiled=False):
    N, D = x.shape
    Hp = w1.shape[1]
    assert N % tm == 0 and Hp % th == 0

    # Weight-resident fast path: keep w1/w2 in VMEM across all row tiles.
    w_bytes = 2 * 2 * D * Hp * w1.dtype.itemsize        # w1 + w2, double-buffered
    act_bytes = 4 * (3 * tm * D + tm * Hp)               # x/xn/out + hidden (f32)
    resident = (not force_tiled) and (w_bytes + act_bytes < int(0.7 * vmem_limit))

    if resident:
        return pl.pallas_call(
            residual_mlp_resident_kernel,
            out_shape=jax.ShapeDtypeStruct((N, D), x.dtype),
            grid=(N // tm,),
            in_specs=[
                pl.BlockSpec((tm, D), lambda i: (i, 0)),
                pl.BlockSpec((1, D), lambda i: (0, 0)),
                pl.BlockSpec((D, Hp), lambda i: (0, 0)),   # constant -> stays resident
                pl.BlockSpec((1, Hp), lambda i: (0, 0)),
                pl.BlockSpec((Hp, D), lambda i: (0, 0)),
                pl.BlockSpec((1, D), lambda i: (0, 0)),
            ],
            out_specs=pl.BlockSpec((tm, D), lambda i: (i, 0)),
            compiler_params=pltpu.CompilerParams(
                dimension_semantics=("parallel",),
                vmem_limit_bytes=vmem_limit),
        )(x, g, w1, b1, w2, b2)

    return pl.pallas_call(
        residual_mlp_tiled_kernel,
        out_shape=jax.ShapeDtypeStruct((N, D), x.dtype),
        grid=(N // tm, Hp // th),
        in_specs=[
            pl.BlockSpec((tm, D), lambda i, h: (i, 0)),
            pl.BlockSpec((1, D), lambda i, h: (0, 0)),
            pl.BlockSpec((D, th), lambda i, h: (0, h)),
            pl.BlockSpec((1, th), lambda i, h: (0, h)),
            pl.BlockSpec((th, D), lambda i, h: (h, 0)),
            pl.BlockSpec((1, D), lambda i, h: (0, 0)),
        ],
        out_specs=pl.BlockSpec((tm, D), lambda i, h: (i, 0)),
        scratch_shapes=[pltpu.VMEM((tm, D), w1.dtype),       # xn (compute dtype)
                        pltpu.VMEM((tm, D), jnp.float32)],    # f32 accumulator
        compiler_params=pltpu.CompilerParams(
            dimension_semantics=("parallel", "arbitrary"),
            vmem_limit_bytes=vmem_limit),
    )(x, g, w1, b1, w2, b2)


def unembed_lse_nll(x, g, wu, bu, targets, *, tm, tv, vmem_limit):
    """Vocab-outer sweep: wu streamed once; returns (lse, nll), each (N, 1)."""
    N, D = x.shape
    Vp = wu.shape[1]
    assert N % tm == 0 and Vp % tv == 0
    ni, nv = N // tm, Vp // tv
    # NOTE: the (ni, tm, 1) f32 stats scratches pad to 128 lanes (~1.5 KiB/row
    # total); for very large N pack the stats lane-major instead.
    lse, nll = pl.pallas_call(
        unembed_lse_nll_kernel,
        out_shape=(jax.ShapeDtypeStruct((nv, N, 1), jnp.float32),
                   jax.ShapeDtypeStruct((nv, N, 1), jnp.float32)),
        grid=(nv, ni),                       # vocab OUTER, rows INNER
        in_specs=[
            pl.BlockSpec((tm, D), lambda v, i: (i, 0)),
            pl.BlockSpec((1, D), lambda v, i: (0, 0)),
            pl.BlockSpec((D, tv), lambda v, i: (0, v)),   # constant over inner loop
            pl.BlockSpec((1, tv), lambda v, i: (0, v)),
            pl.BlockSpec((tm, 1), lambda v, i: (i, 0)),
        ],
        out_specs=(pl.BlockSpec((1, tm, 1), lambda v, i: (v, i, 0)),
                   pl.BlockSpec((1, tm, 1), lambda v, i: (v, i, 0))),
        scratch_shapes=[
            pltpu.VMEM((ni, tm, 1), jnp.float32),   # running max m
            pltpu.VMEM((ni, tm, 1), jnp.float32),   # running sum-exp l
            pltpu.VMEM((ni, tm, 1), jnp.float32),   # gathered target logit t
        ],
        compiler_params=pltpu.CompilerParams(
            dimension_semantics=("arbitrary", "parallel"),
            vmem_limit_bytes=vmem_limit),
    )(x, g, wu, bu, targets)
    # Only the last vocab slab holds the full reduction.
    return lse[nv - 1], nll[nv - 1]


def unembed_logprobs(x, g, wu, bu, lse, *, tm, tv, vmem_limit):
    """Second vocab-outer sweep: recompute logits, write log_probs directly."""
    N, D = x.shape
    Vp = wu.shape[1]
    assert N % tm == 0 and Vp % tv == 0
    return pl.pallas_call(
        unembed_logprob_kernel,
        out_shape=jax.ShapeDtypeStruct((N, Vp), jnp.float32),
        grid=(Vp // tv, N // tm),
        in_specs=[
            pl.BlockSpec((tm, D), lambda v, i: (i, 0)),
            pl.BlockSpec((1, D), lambda v, i: (0, 0)),
            pl.BlockSpec((D, tv), lambda v, i: (0, v)),
            pl.BlockSpec((1, tv), lambda v, i: (0, v)),
            pl.BlockSpec((tm, 1), lambda v, i: (i, 0)),
        ],
        out_specs=pl.BlockSpec((tm, tv), lambda v, i: (i, v)),
        compiler_params=pltpu.CompilerParams(
            dimension_semantics=("parallel", "parallel"),
            vmem_limit_bytes=vmem_limit),
    )(x, g, wu, bu, lse)


# ------------------------------ parameter prep ------------------------------


def prepare_params(raw, *, param_dtype=RES_DTYPE):
    """One-time prep (outside jit): pad H/V to tile multiples, cast to bf16.

    Padding is semantics-preserving: zero hidden columns contribute exactly 0,
    padded vocab columns get bias -1e30 so exp() underflows to 0 and targets
    (< vocab_size) never hit them.
    """
    cfg = _chip_config()
    V = raw["wu"].shape[1]
    tv = min(cfg["tv"], _round_up(V, 128))
    Vp = _round_up(V, tv)

    layers = []
    for layer in raw["layers"]:
        H = layer["w1"].shape[1]
        th = min(cfg["th"], _round_up(H, 128))
        Hp = _round_up(H, th)
        layers.append({
            "norm_g": layer["norm_g"].astype(jnp.float32),
            "w1": jnp.pad(layer["w1"], ((0, 0), (0, Hp - H))).astype(param_dtype),
            "b1": jnp.pad(layer["b1"], ((0, 0), (0, Hp - H))).astype(jnp.float32),
            "w2": jnp.pad(layer["w2"], ((0, Hp - H), (0, 0))).astype(param_dtype),
            "b2": layer["b2"].astype(jnp.float32),
        })

    return {
        "token_embeds": raw["token_embeds"].astype(param_dtype),
        "layers": layers,
        "unembed_norm_g": raw["unembed_norm_g"].astype(jnp.float32),
        "wu": jnp.pad(raw["wu"], ((0, 0), (0, Vp - V))).astype(param_dtype),
        "bu": jnp.pad(raw["bu"], ((0, 0), (0, Vp - V)),
                      constant_values=NEG_BIG).astype(jnp.float32),
    }


# --------------------------------- forward ----------------------------------


@functools.partial(jax.jit,
                   static_argnames=("vocab_size", "tm", "th", "tv",
                                    "force_mlp_tiling"))
def vq_transformer_forward(params, input_ids, loss_mask, targets, *, vocab_size,
                           tm=None, th=None, tv=None, force_mlp_tiling=False):
    cfg = _chip_config()
    B, T = input_ids.shape
    N = B * T

    tm = tm if tm is not None else min(cfg["tm"], _round_up(N, 8))
    Np = _round_up(N, tm)
    pad = Np - N

    # Embedding gather with the row pad folded in (no (N, D) jnp.pad pass).
    # position_embeds=None and dropout p=0 (eval), matching the default path.
    ids = jnp.pad(input_ids.reshape(-1), (0, pad))
    x = params["token_embeds"][ids].astype(RES_DTYPE)            # (Np, D) bf16
    tgt = jnp.pad(targets.reshape(-1).astype(jnp.int32), (0, pad),
                  constant_values=IGNORE_INDEX).reshape(Np, 1)

    for layer in params["layers"]:
        Hp = layer["w1"].shape[1]
        th_l = th if th is not None else min(cfg["th"], Hp)
        x = residual_mlp_block(x, layer["norm_g"], layer["w1"], layer["b1"],
                               layer["w2"], layer["b2"], tm=tm, th=th_l,
                               vmem_limit=cfg["vmem_limit"],
                               force_tiled=force_mlp_tiling)

    Vp = params["wu"].shape[1]
    tv_u = tv if tv is not None else min(cfg["tv"], Vp)
    lse, nll = unembed_lse_nll(x, params["unembed_norm_g"], params["wu"],
                               params["bu"], tgt, tm=tm, tv=tv_u,
                               vmem_limit=cfg["vmem_limit"])
    log_probs = unembed_logprobs(x, params["unembed_norm_g"], params["wu"],
                                 params["bu"], lse, tm=tm, tv=tv_u,
                                 vmem_limit=cfg["vmem_limit"])
    log_probs = log_probs[:N, :vocab_size].reshape(B, T, vocab_size)

    # Tiny scalar reduction over (Np, 1) values — plain-JAX glue.
    l_lm_unscaled = jnp.sum(nll) / (jnp.sum(loss_mask) + 1e-6)

    zero = jnp.float32(0.0)
    return {
        "logprobs": log_probs,
        "l_commit": zero,
        "l_codebook": zero,
        "l_lm_unscaled": l_lm_unscaled,
        "loss": l_lm_unscaled + C_BETA * zero + zero,
        "metrics": {},
    }


# ------------------------------ pure-JAX ref ---------------------------------


def ref_forward(params, input_ids, loss_mask, targets, vocab_size):
    B, T = input_ids.shape
    x = params["token_embeds"][input_ids.reshape(-1)].astype(RES_DTYPE)

    def rms(z, g):
        return z * jax.lax.rsqrt(jnp.mean(z * z, axis=-1, keepdims=True) + RMS_EPS) * g

    for layer in params["layers"]:
        xf = x.astype(jnp.float32)
        xn = rms(xf, layer["norm_g"]).astype(layer["w1"].dtype)
        h = jax.nn.gelu(jnp.dot(xn, layer["w1"],
                                preferred_element_type=jnp.float32) + layer["b1"],
                        approximate=True)
        y = jnp.dot(h.astype(layer["w2"].dtype), layer["w2"],
                    preferred_element_type=jnp.float32) + layer["b2"]
        x = (xf + y).astype(RES_DTYPE)

    xf = x.astype(jnp.float32)
    xn = rms(xf, params["unembed_norm_g"]).astype(params["wu"].dtype)
    logits = jnp.dot(xn, params["wu"],
                     preferred_element_type=jnp.float32) + params["bu"]
    log_probs = jax.nn.log_softmax(logits, axis=-1)[:, :vocab_size]

    tgt = targets.reshape(-1)
    gi = jnp.where(tgt == IGNORE_INDEX, 0, tgt)
    lp_at = jnp.take_along_axis(log_probs, gi[:, None], axis=-1)[:, 0]
    premask = -lp_at * (tgt != IGNORE_INDEX).astype(jnp.float32)
    l_lm = premask.sum() / (loss_mask.sum() + 1e-6)
    return log_probs.reshape(B, T, vocab_size), l_lm


# --------------------------------- main --------------------------------------


def init_params(key, vocab_size, dim, hidden, n_layers):
    ks = jax.random.split(key, 2 + 2 * n_layers)
    params = {
        "token_embeds": 0.02 * jax.random.normal(ks[0], (vocab_size, dim), jnp.float32),
        "layers": [],
        "unembed_norm_g": jnp.ones((1, dim), jnp.float32),
        "wu": 0.02 * jax.random.normal(ks[1], (dim, vocab_size), jnp.float32),
        "bu": jnp.zeros((1, vocab_size), jnp.float32),   # _init_weights: zero bias
    }
    for i in range(n_layers):
        k1, k2 = ks[2 + 2 * i], ks[3 + 2 * i]
        params["layers"].append({
            "norm_g": jnp.ones((1, dim), jnp.float32),
            "w1": 0.02 * jax.random.normal(k1, (dim, hidden), jnp.float32),
            "b1": jnp.zeros((1, hidden), jnp.float32),
            "w2": 0.02 * jax.random.normal(k2, (hidden, dim), jnp.float32),
            "b2": jnp.zeros((1, dim), jnp.float32),
        })
    return params


if __name__ == "__main__":
    # Small demo dims consistent with the module: B=2, T=64, dim=128,
    # hidden=512, vocab=256, 2 residual MLP layers.  N = B*T = 128 rows.
    B, T, D, H, V, N_LAYERS = 2, 64, 128, 512, 256, 2

    key = jax.random.PRNGKey(0)
    kp, ki, kt = jax.random.split(key, 3)
    raw = init_params(kp, V, D, H, N_LAYERS)
    params = prepare_params(raw)            # pad + bf16 cast, one-time, outside jit

    input_ids = jax.random.randint(ki, (B, T), 0, V, dtype=jnp.int32)
    targets = jax.random.randint(kt, (B, T), 0, V, dtype=jnp.int32)
    targets = targets.at[0, 0].set(-100).at[1, 3].set(-100)   # exercise ignore_index
    loss_mask = jnp.ones((B, T), jnp.float32).at[0, 0].set(0.0).at[1, 3].set(0.0)

    ref_lp, ref_loss = ref_forward(params, input_ids, loss_mask, targets, V)

    # 1) default fast paths (weight-resident MLP, single vocab tile at V=256).
    out = vq_transformer_forward(params, input_ids, loss_mask, targets,
                                 vocab_size=V)
    jax.block_until_ready(out)
    assert jnp.allclose(out["logprobs"], ref_lp, rtol=2e-2, atol=2e-2), "logprobs"
    assert jnp.allclose(out["l_lm_unscaled"], ref_loss, rtol=2e-2, atol=2e-2), "loss"
    assert jnp.allclose(out["loss"], ref_loss, rtol=2e-2, atol=2e-2), "total loss"

    # 2) generic paths: hidden-tiled MLP + multi-tile streaming-LSE unembed
    #    with multiple row tiles (exercises the online-update branch and the
    #    persistent row-tile-indexed stats scratch).
    out2 = vq_transformer_forward(params, input_ids, loss_mask, targets,
                                  vocab_size=V, tm=64, th=128, tv=128,
                                  force_mlp_tiling=True)
    jax.block_until_ready(out2)
    assert jnp.allclose(out2["logprobs"], ref_lp, rtol=2e-2, atol=2e-2), "logprobs (tiled)"
    assert jnp.allclose(out2["l_lm_unscaled"], ref_loss, rtol=2e-2, atol=2e-2), "loss (tiled)"

    print("KERNEL_OK")
</pallas_src>

<mosaic_0001>
module attributes {stable_mosaic.version = 11 : i64} {
  func.func @residual_mlp_resident_kernel(%arg0: i32, %arg1: memref<128x128xbf16, #tpu.memory_space<vmem>>, %arg2: memref<1x128xf32, #tpu.memory_space<vmem>>, %arg3: memref<128x512xbf16, #tpu.memory_space<vmem>>, %arg4: memref<1x512xf32, #tpu.memory_space<vmem>>, %arg5: memref<512x128xbf16, #tpu.memory_space<vmem>>, %arg6: memref<1x128xf32, #tpu.memory_space<vmem>>, %arg7: memref<128x128xbf16, #tpu.memory_space<vmem>>) attributes {dimension_semantics = [#tpu.dimension_semantics<parallel>], iteration_bounds = array<i64: 1>, scalar_prefetch = 0 : i64, scratch_operands = 0 : i64, tpu.core_type = #tpu.core_type<tc>, window_params = [{transform_indices = @transform_0, window_bounds = array<i64: 128, 128>}, {pipeline_mode = #tpu.pipeline_mode<synchronous>, transform_indices = @transform_1, window_bounds = array<i64: 1, 128>}, {pipeline_mode = #tpu.pipeline_mode<synchronous>, transform_indices = @transform_2, window_bounds = array<i64: 128, 512>}, {pipeline_mode = #tpu.pipeline_mode<synchronous>, transform_indices = @transform_3, window_bounds = array<i64: 1, 512>}, {pipeline_mode = #tpu.pipeline_mode<synchronous>, transform_indices = @transform_4, window_bounds = array<i64: 512, 128>}, {pipeline_mode = #tpu.pipeline_mode<synchronous>, transform_indices = @transform_5, window_bounds = array<i64: 1, 128>}, {transform_indices = @transform_6, window_bounds = array<i64: 128, 128>}]} {
    %c0 = arith.constant 0 : index
    %c0_0 = arith.constant 0 : index
    %0 = vector.load %arg1[%c0, %c0_0] : memref<128x128xbf16, #tpu.memory_space<vmem>>, vector<128x128xbf16>
    %1 = arith.extf %0 : vector<128x128xbf16> to vector<128x128xf32>
    %c0_1 = arith.constant 0 : index
    %c0_2 = arith.constant 0 : index
    %2 = vector.load %arg2[%c0_1, %c0_2] : memref<1x128xf32, #tpu.memory_space<vmem>>, vector<1x128xf32>
    %3 = arith.mulf %1, %1 : vector<128x128xf32>
    %cst = arith.constant dense<0.000000e+00> : vector<128xf32>
    %4 = vector.multi_reduction <add>, %3, %cst [1] : vector<128x128xf32> to vector<128xf32>
    %5 = vector.shape_cast %4 : vector<128xf32> to vector<128x1xf32>
    %cst_3 = arith.constant 1.280000e+02 : f32
    %6 = vector.broadcast %cst_3 : f32 to vector<128x1xf32>
    %7 = arith.divf %5, %6 : vector<128x1xf32>
    %cst_4 = arith.constant 9.99999997E-7 : f32
    %8 = vector.broadcast %cst_4 : f32 to vector<128x1xf32>
    %9 = arith.addf %7, %8 : vector<128x1xf32>
    %10 = math.rsqrt %9 : vector<128x1xf32>
    %11 = vector.broadcast %10 : vector<128x1xf32> to vector<128x128xf32>
    %12 = arith.mulf %1, %11 : vector<128x128xf32>
    %13 = vector.broadcast %2 : vector<1x128xf32> to vector<128x128xf32>
    %14 = arith.mulf %12, %13 : vector<128x128xf32>
    %15 = arith.truncf %14 : vector<128x128xf32> to vector<128x128xbf16>
    %c0_5 = arith.constant 0 : index
    %c0_6 = arith.constant 0 : index
    %16 = vector.load %arg3[%c0_5, %c0_6] : memref<128x512xbf16, #tpu.memory_space<vmem>>, vector<128x512xbf16>
    %cst_7 = arith.constant dense<0.000000e+00> : vector<128x512xf32>
    %17 = tpu.matmul %15, %16, %cst_7 {dimension_numbers = #tpu.dot_dimension_numbers<[1], [0], [0], [1], [0, 0, 1, 1], [], []>} : vector<128x128xbf16>, vector<128x512xbf16>, vector<128x512xf32> -> vector<128x512xf32>
    %c0_8 = arith.constant 0 : index
    %c0_9 = arith.constant 0 : index
    %18 = vector.load %arg4[%c0_8, %c0_9] : memref<1x512xf32, #tpu.memory_space<vmem>>, vector<1x512xf32>
    %19 = vector.broadcast %18 : vector<1x512xf32> to vector<128x512xf32>
    %20 = arith.addf %17, %19 : vector<128x512xf32>
    %21 = arith.mulf %20, %20 : vector<128x512xf32>
    %22 = arith.mulf %20, %21 : vector<128x512xf32>
    %cst_10 = arith.constant 4.471500e-02 : f32
    %23 = vector.broadcast %cst_10 : f32 to vector<128x512xf32>
    %24 = arith.mulf %23, %22 : vector<128x512xf32>
    %25 = arith.addf %20, %24 : vector<128x512xf32>
    %cst_11 = arith.constant 0.797884583 : f32
    %26 = vector.broadcast %cst_11 : f32 to vector<128x512xf32>
    %27 = arith.mulf %26, %25 : vector<128x512xf32>
    %28 = math.tanh %27 : vector<128x512xf32>
    %cst_12 = arith.constant 1.000000e+00 : f32
    %29 = vector.broadcast %cst_12 : f32 to vector<128x512xf32>
    %30 = arith.addf %29, %28 : vector<128x512xf32>
    %cst_13 = arith.constant 5.000000e-01 : f32
    %31 = vector.broadcast %cst_13 : f32 to vector<128x512xf32>
    %32 = arith.mulf %31, %30 : vector<128x512xf32>
    %33 = arith.mulf %20, %32 : vector<128x512xf32>
    %34 = arith.truncf %33 : vector<128x512xf32> to vector<128x512xbf16>
    %c0_14 = arith.constant 0 : index
    %c0_15 = arith.constant 0 : index
    %35 = vector.load %arg5[%c0_14, %c0_15] : memref<512x128xbf16, #tpu.memory_space<vmem>>, vector<512x128xbf16>
    %cst_16 = arith.constant dense<0.000000e+00> : vector<128x128xf32>
    %36 = tpu.matmul %34, %35, %cst_16 {dimension_numbers = #tpu.dot_dimension_numbers<[1], [0], [0], [1], [0, 0, 1, 1], [], []>} : vector<128x512xbf16>, vector<512x128xbf16>, vector<128x128xf32> -> vector<128x128xf32>
    %c0_17 = arith.constant 0 : index
    %c0_18 = arith.constant 0 : index
    %37 = vector.load %arg6[%c0_17, %c0_18] : memref<1x128xf32, #tpu.memory_space<vmem>>, vector<1x128xf32>
    %38 = vector.broadcast %37 : vector<1x128xf32> to vector<128x128xf32>
    %39 = arith.addf %36, %38 : vector<128x128xf32>
    %40 = arith.addf %1, %39 : vector<128x128xf32>
    %41 = arith.truncf %40 : vector<128x128xf32> to vector<128x128xbf16>
    %c0_19 = arith.constant 0 : index
    %c0_20 = arith.constant 0 : index
    %42 = vector.load %arg7[%c0_19, %c0_20] : memref<128x128xbf16, #tpu.memory_space<vmem>>, vector<128x128xbf16>
    tpu.vector_store %arg7[%c0_19, %c0_20], %41 {strides = array<i32>} : memref<128x128xbf16, #tpu.memory_space<vmem>>, vector<128x128xbf16>,
    return
  }
  func.func @transform_0(%arg0: i32) -> (i32, i32) {
    %c0_i32 = arith.constant 0 : i32
    %c0_i32_0 = arith.constant 0 : i32
    return %arg0, %c0_i32 : i32, i32
  }
  func.func @transform_1(%arg0: i32) -> (i32, i32) {
    %c0_i32 = arith.constant 0 : i32
    %c0_i32_0 = arith.constant 0 : i32
    %c0_i32_1 = arith.constant 0 : i32
    return %c0_i32, %c0_i32_0 : i32, i32
  }
  func.func @transform_2(%arg0: i32) -> (i32, i32) {
    %c0_i32 = arith.constant 0 : i32
    %c0_i32_0 = arith.constant 0 : i32
    %c0_i32_1 = arith.constant 0 : i32
    return %c0_i32, %c0_i32_0 : i32, i32
  }
  func.func @transform_3(%arg0: i32) -> (i32, i32) {
    %c0_i32 = arith.constant 0 : i32
    %c0_i32_0 = arith.constant 0 : i32
    %c0_i32_1 = arith.constant 0 : i32
    return %c0_i32, %c0_i32_0 : i32, i32
  }
  func.func @transform_4(%arg0: i32) -> (i32, i32) {
    %c0_i32 = arith.constant 0 : i32
    %c0_i32_0 = arith.constant 0 : i32
    %c0_i32_1 = arith.constant 0 : i32
    return %c0_i32, %c0_i32_0 : i32, i32
  }
  func.func @transform_5(%arg0: i32) -> (i32, i32) {
    %c0_i32 = arith.constant 0 : i32
    %c0_i32_0 = arith.constant 0 : i32
    %c0_i32_1 = arith.constant 0 : i32
    return %c0_i32, %c0_i32_0 : i32, i32
  }
  func.func @transform_6(%arg0: i32) -> (i32, i32) {
    %c0_i32 = arith.constant 0 : i32
    %c0_i32_0 = arith.constant 0 : i32
    return %arg0, %c0_i32 : i32, i32
  }
}

module attributes {stable_mosaic.version = 11 : i64} {
  func.func @unembed_lse_nll_kernel(%arg0: i32, %arg1: i32, %arg2: memref<128x128xbf16, #tpu.memory_space<vmem>>, %arg3: memref<1x128xf32, #tpu.memory_space<vmem>>, %arg4: memref<128x256xbf16, #tpu.memory_space<vmem>>, %arg5: memref<1x256xf32, #tpu.memory_space<vmem>>, %arg6: memref<128x1xi32, #tpu.memory_space<vmem>>, %arg7: memref<1x128x1xf32, #tpu.memory_space<vmem>>, %arg8: memref<1x128x1xf32, #tpu.memory_space<vmem>>, %arg9: memref<1x128x1xf32, #tpu.memory_space<vmem>>, %arg10: memref<1x128x1xf32, #tpu.memory_space<vmem>>, %arg11: memref<1x128x1xf32, #tpu.memory_space<vmem>>) attributes {dimension_semantics = [#tpu.dimension_semantics<arbitrary>, #tpu.dimension_semantics<parallel>], iteration_bounds = array<i64: 1, 1>, scalar_prefetch = 0 : i64, scratch_operands = 3 : i64, tpu.core_type = #tpu.core_type<tc>, window_params = [{transform_indices = @transform_0, window_bounds = array<i64: 128, 128>}, {pipeline_mode = #tpu.pipeline_mode<synchronous>, transform_indices = @transform_1, window_bounds = array<i64: 1, 128>}, {transform_indices = @transform_2, window_bounds = array<i64: 128, 256>}, {transform_indices = @transform_3, window_bounds = array<i64: 1, 256>}, {transform_indices = @transform_4, window_bounds = array<i64: 128, 1>}, {transform_indices = @transform_5, window_bounds = array<i64: 1, 128, 1>}, {transform_indices = @transform_6, window_bounds = array<i64: 1, 128, 1>}]} {
    %c0 = arith.constant 0 : index
    %c0_0 = arith.constant 0 : index
    %0 = vector.load %arg2[%c0, %c0_0] : memref<128x128xbf16, #tpu.memory_space<vmem>>, vector<128x128xbf16>
    %1 = arith.extf %0 : vector<128x128xbf16> to vector<128x128xf32>
    %c0_1 = arith.constant 0 : index
    %c0_2 = arith.constant 0 : index
    %2 = vector.load %arg3[%c0_1, %c0_2] : memref<1x128xf32, #tpu.memory_space<vmem>>, vector<1x128xf32>
    %3 = arith.mulf %1, %1 : vector<128x128xf32>
    %cst = arith.constant dense<0.000000e+00> : vector<128xf32>
    %4 = vector.multi_reduction <add>, %3, %cst [1] : vector<128x128xf32> to vector<128xf32>
    %5 = vector.shape_cast %4 : vector<128xf32> to vector<128x1xf32>
    %cst_3 = arith.constant 1.280000e+02 : f32
    %6 = vector.broadcast %cst_3 : f32 to vector<128x1xf32>
    %7 = arith.divf %5, %6 : vector<128x1xf32>
    %cst_4 = arith.constant 9.99999997E-7 : f32
    %8 = vector.broadcast %cst_4 : f32 to vector<128x1xf32>
    %9 = arith.addf %7, %8 : vector<128x1xf32>
    %10 = math.rsqrt %9 : vector<128x1xf32>
    %11 = vector.broadcast %10 : vector<128x1xf32> to vector<128x128xf32>
    %12 = arith.mulf %1, %11 : vector<128x128xf32>
    %13 = vector.broadcast %2 : vector<1x128xf32> to vector<128x128xf32>
    %14 = arith.mulf %12, %13 : vector<128x128xf32>
    %15 = arith.truncf %14 : vector<128x128xf32> to vector<128x128xbf16>
    %c0_5 = arith.constant 0 : index
    %c0_6 = arith.constant 0 : index
    %16 = vector.load %arg4[%c0_5, %c0_6] : memref<128x256xbf16, #tpu.memory_space<vmem>>, vector<128x256xbf16>
    %cst_7 = arith.constant dense<0.000000e+00> : vector<128x256xf32>
    %17 = tpu.matmul %15, %16, %cst_7 {dimension_numbers = #tpu.dot_dimension_numbers<[1], [0], [0], [1], [0, 0, 1, 1], [], []>} : vector<128x128xbf16>, vector<128x256xbf16>, vector<128x256xf32> -> vector<128x256xf32>
    %c0_8 = arith.constant 0 : index
    %c0_9 = arith.constant 0 : index
    %18 = vector.load %arg5[%c0_8, %c0_9] : memref<1x256xf32, #tpu.memory_space<vmem>>, vector<1x256xf32>
    %19 = vector.broadcast %18 : vector<1x256xf32> to vector<128x256xf32>
    %20 = arith.addf %17, %19 : vector<128x256xf32>
    %c0_10 = arith.constant 0 : index
    %c0_11 = arith.constant 0 : index
    %21 = vector.load %arg6[%c0_10, %c0_11] : memref<128x1xi32, #tpu.memory_space<vmem>>, vector<128x1xi32>
    %22 = tpu.iota {dimensions = array<i32: 1>} : vector<128x256xi32>
    %c256_i32 = arith.constant 256 : i32
    %23 = arith.muli %arg0, %c256_i32 : i32
    %24 = vector.broadcast %23 : i32 to vector<128x1xi32>
    %25 = arith.subi %21, %24 : vector<128x1xi32>
    %26 = vector.broadcast %25 : vector<128x1xi32> to vector<128x256xi32>
    %27 = arith.cmpi eq, %22, %26 : vector<128x256xi32>
    %cst_12 = arith.constant 0.000000e+00 : f32
    %28 = vector.broadcast %cst_12 : f32 to vector<128x256xf32>
    %29 = arith.select %27, %20, %28 : vector<128x256xi1>, vector<128x256xf32>
    %cst_13 = arith.constant dense<0.000000e+00> : vector<128xf32>
    %30 = vector.multi_reduction <add>, %29, %cst_13 [1] : vector<128x256xf32> to vector<128xf32>
    %31 = vector.shape_cast %30 : vector<128xf32> to vector<128x1xf32>
    %cst_14 = arith.constant dense<0xFF800000> : vector<128xf32>
    %32 = vector.multi_reduction <maximumf>, %20, %cst_14 [1] : vector<128x256xf32> to vector<128xf32>
    %33 = vector.shape_cast %32 : vector<128xf32> to vector<128x1xf32>
    %c0_i32 = arith.constant 0 : i32
    %34 = arith.cmpi eq, %arg0, %c0_i32 : i32
    %35 = arith.extui %34 : i1 to i32
    %c0_i32_15 = arith.constant 0 : i32
    %36 = arith.cmpi ne, %35, %c0_i32_15 : i32
    scf.if %36 {
      %63 = arith.index_cast %arg1 : i32 to index
      %c0_30 = arith.constant 0 : index
      %c0_31 = arith.constant 0 : index
      %64 = vector.load %arg9[%63, %c0_30, %c0_31] : memref<1x128x1xf32, #tpu.memory_space<vmem>>, vector<1x128x1xf32>
      %65 = vector.shape_cast %64 : vector<1x128x1xf32> to vector<128x1xf32>
      %66 = vector.shape_cast %33 : vector<128x1xf32> to vector<1x128x1xf32>
      tpu.vector_store %arg9[%63, %c0_30, %c0_31], %66 {strides = array<i32>} : memref<1x128x1xf32, #tpu.memory_space<vmem>>, vector<1x128x1xf32>,
      %67 = vector.broadcast %33 : vector<128x1xf32> to vector<128x256xf32>
      %68 = arith.subf %20, %67 : vector<128x256xf32>
      %69 = math.exp %68 : vector<128x256xf32>
      %cst_32 = arith.constant dense<0.000000e+00> : vector<128xf32>
      %70 = vector.multi_reduction <add>, %69, %cst_32 [1] : vector<128x256xf32> to vector<128xf32>
      %71 = vector.shape_cast %70 : vector<128xf32> to vector<128x1xf32>
      %72 = arith.index_cast %arg1 : i32 to index
      %c0_33 = arith.constant 0 : index
      %c0_34 = arith.constant 0 : index
      %73 = vector.load %arg10[%72, %c0_33, %c0_34] : memref<1x128x1xf32, #tpu.memory_space<vmem>>, vector<1x128x1xf32>
      %74 = vector.shape_cast %73 : vector<1x128x1xf32> to vector<128x1xf32>
      %75 = vector.shape_cast %71 : vector<128x1xf32> to vector<1x128x1xf32>
      tpu.vector_store %arg10[%72, %c0_33, %c0_34], %75 {strides = array<i32>} : memref<1x128x1xf32, #tpu.memory_space<vmem>>, vector<1x128x1xf32>,
      %76 = arith.index_cast %arg1 : i32 to index
      %c0_35 = arith.constant 0 : index
      %c0_36 = arith.constant 0 : index
      %77 = vector.load %arg11[%76, %c0_35, %c0_36] : memref<1x128x1xf32, #tpu.memory_space<vmem>>, vector<1x128x1xf32>
      %78 = vector.shape_cast %77 : vector<1x128x1xf32> to vector<128x1xf32>
      %79 = vector.shape_cast %31 : vector<128x1xf32> to vector<1x128x1xf32>
      tpu.vector_store %arg11[%76, %c0_35, %c0_36], %79 {strides = array<i32>} : memref<1x128x1xf32, #tpu.memory_space<vmem>>, vector<1x128x1xf32>,
    } else {
    }
    %c0_i32_16 = arith.constant 0 : i32
    %37 = arith.cmpi sgt, %arg0, %c0_i32_16 : i32
    %38 = arith.extui %37 : i1 to i32
    %c0_i32_17 = arith.constant 0 : i32
    %39 = arith.cmpi ne, %38, %c0_i32_17 : i32
    scf.if %39 {
      %63 = arith.index_cast %arg1 : i32 to index
      %c0_30 = arith.constant 0 : index
      %c0_31 = arith.constant 0 : index
      %64 = vector.load %arg9[%63, %c0_30, %c0_31] : memref<1x128x1xf32, #tpu.memory_space<vmem>>, vector<1x128x1xf32>
      %65 = vector.shape_cast %64 : vector<1x128x1xf32> to vector<128x1xf32>
      %66 = arith.maximumf %65, %33 : vector<128x1xf32>
      %67 = arith.index_cast %arg1 : i32 to index
      %c0_32 = arith.constant 0 : index
      %c0_33 = arith.constant 0 : index
      %68 = vector.load %arg10[%67, %c0_32, %c0_33] : memref<1x128x1xf32, #tpu.memory_space<vmem>>, vector<1x128x1xf32>
      %69 = vector.shape_cast %68 : vector<1x128x1xf32> to vector<128x1xf32>
      %70 = arith.subf %65, %66 : vector<128x1xf32>
      %71 = math.exp %70 : vector<128x1xf32>
      %72 = arith.mulf %69, %71 : vector<128x1xf32>
      %73 = vector.broadcast %66 : vector<128x1xf32> to vector<128x256xf32>
      %74 = arith.subf %20, %73 : vector<128x256xf32>
      %75 = math.exp %74 : vector<128x256xf32>
      %cst_34 = arith.constant dense<0.000000e+00> : vector<128xf32>
      %76 = vector.multi_reduction <add>, %75, %cst_34 [1] : vector<128x256xf32> to vector<128xf32>
      %77 = vector.shape_cast %76 : vector<128xf32> to vector<128x1xf32>
      %78 = arith.addf %72, %77 : vector<128x1xf32>
      %79 = arith.index_cast %arg1 : i32 to index
      %c0_35 = arith.constant 0 : index
      %c0_36 = arith.constant 0 : index
      %80 = vector.load %arg10[%79, %c0_35, %c0_36] : memref<1x128x1xf32, #tpu.memory_space<vmem>>, vector<1x128x1xf32>
      %81 = vector.shape_cast %80 : vector<1x128x1xf32> to vector<128x1xf32>
      %82 = vector.shape_cast %78 : vector<128x1xf32> to vector<1x128x1xf32>
      tpu.vector_store %arg10[%79, %c0_35, %c0_36], %82 {strides = array<i32>} : memref<1x128x1xf32, #tpu.memory_space<vmem>>, vector<1x128x1xf32>,
      %83 = arith.index_cast %arg1 : i32 to index
      %c0_37 = arith.constant 0 : index
      %c0_38 = arith.constant 0 : index
      %84 = vector.load %arg9[%83, %c0_37, %c0_38] : memref<1x128x1xf32, #tpu.memory_space<vmem>>, vector<1x128x1xf32>
      %85 = vector.shape_cast %84 : vector<1x128x1xf32> to vector<128x1xf32>
      %86 = vector.shape_cast %66 : vector<128x1xf32> to vector<1x128x1xf32>
      tpu.vector_store %arg9[%83, %c0_37, %c0_38], %86 {strides = array<i32>} : memref<1x128x1xf32, #tpu.memory_space<vmem>>, vector<1x128x1xf32>,
      %87 = arith.index_cast %arg1 : i32 to index
      %c0_39 = arith.constant 0 : index
      %c0_40 = arith.constant 0 : index
      %88 = vector.load %arg11[%87, %c0_39, %c0_40] : memref<1x128x1xf32, #tpu.memory_space<vmem>>, vector<1x128x1xf32>
      %89 = vector.shape_cast %88 : vector<1x128x1xf32> to vector<128x1xf32>
      %90 = arith.addf %89, %31 : vector<128x1xf32>
      %91 = arith.index_cast %arg1 : i32 to index
      %c0_41 = arith.constant 0 : index
      %c0_42 = arith.constant 0 : index
      %92 = vector.load %arg11[%91, %c0_41, %c0_42] : memref<1x128x1xf32, #tpu.memory_space<vmem>>, vector<1x128x1xf32>
      %93 = vector.shape_cast %92 : vector<1x128x1xf32> to vector<128x1xf32>
      %94 = vector.shape_cast %90 : vector<128x1xf32> to vector<1x128x1xf32>
      tpu.vector_store %arg11[%91, %c0_41, %c0_42], %94 {strides = array<i32>} : memref<1x128x1xf32, #tpu.memory_space<vmem>>, vector<1x128x1xf32>,
    } else {
    }
    %40 = arith.index_cast %arg1 : i32 to index
    %c0_18 = arith.constant 0 : index
    %c0_19 = arith.constant 0 : index
    %41 = vector.load %arg9[%40, %c0_18, %c0_19] : memref<1x128x1xf32, #tpu.memory_space<vmem>>, vector<1x128x1xf32>
    %42 = vector.shape_cast %41 : vector<1x128x1xf32> to vector<128x1xf32>
    %43 = arith.index_cast %arg1 : i32 to index
    %c0_20 = arith.constant 0 : index
    %c0_21 = arith.constant 0 : index
    %44 = vector.load %arg10[%43, %c0_20, %c0_21] : memref<1x128x1xf32, #tpu.memory_space<vmem>>, vector<1x128x1xf32>
    %45 = vector.shape_cast %44 : vector<1x128x1xf32> to vector<128x1xf32>
    %46 = math.log %45 : vector<128x1xf32>
    %47 = arith.addf %42, %46 : vector<128x1xf32>
    %c-100_i32 = arith.constant -100 : i32
    %48 = vector.broadcast %c-100_i32 : i32 to vector<128x1xi32>
    %49 = arith.cmpi ne, %21, %48 : vector<128x1xi32>
    %50 = arith.extui %49 : vector<128x1xi1> to vector<128x1xi32>
    %51 = arith.sitofp %50 : vector<128x1xi32> to vector<128x1xf32>
    %c0_22 = arith.constant 0 : index
    %c0_23 = arith.constant 0 : index
    %c0_24 = arith.constant 0 : index
    %52 = vector.load %arg7[%c0_22, %c0_23, %c0_24] : memref<1x128x1xf32, #tpu.memory_space<vmem>>, vector<1x128x1xf32>
    %53 = vector.shape_cast %52 : vector<1x128x1xf32> to vector<128x1xf32>
    %54 = vector.shape_cast %47 : vector<128x1xf32> to vector<1x128x1xf32>
    tpu.vector_store %arg7[%c0_22, %c0_23, %c0_24], %54 {strides = array<i32>} : memref<1x128x1xf32, #tpu.memory_space<vmem>>, vector<1x128x1xf32>,
    %55 = arith.index_cast %arg1 : i32 to index
    %c0_25 = arith.constant 0 : index
    %c0_26 = arith.constant 0 : index
    %56 = vector.load %arg11[%55, %c0_25, %c0_26] : memref<1x128x1xf32, #tpu.memory_space<vmem>>, vector<1x128x1xf32>
    %57 = vector.shape_cast %56 : vector<1x128x1xf32> to vector<128x1xf32>
    %58 = arith.subf %47, %57 : vector<128x1xf32>
    %59 = arith.mulf %58, %51 : vector<128x1xf32>
    %c0_27 = arith.constant 0 : index
    %c0_28 = arith.constant 0 : index
    %c0_29 = arith.constant 0 : index
    %60 = vector.load %arg8[%c0_27, %c0_28, %c0_29] : memref<1x128x1xf32, #tpu.memory_space<vmem>>, vector<1x128x1xf32>
    %61 = vector.shape_cast %60 : vector<1x128x1xf32> to vector<128x1xf32>
    %62 = vector.shape_cast %59 : vector<128x1xf32> to vector<1x128x1xf32>
    tpu.vector_store %arg8[%c0_27, %c0_28, %c0_29], %62 {strides = array<i32>} : memref<1x128x1xf32, #tpu.memory_space<vmem>>, vector<1x128x1xf32>,
    return
  }
  func.func @transform_0(%arg0: i32, %arg1: i32) -> (i32, i32) {
    %c0_i32 = arith.constant 0 : i32
    %c0_i32_0 = arith.constant 0 : i32
    return %arg1, %c0_i32 : i32, i32
  }
  func.func @transform_1(%arg0: i32, %arg1: i32) -> (i32, i32) {
    %c0_i32 = arith.constant 0 : i32
    %c0_i32_0 = arith.constant 0 : i32
    %c0_i32_1 = arith.constant 0 : i32
    return %c0_i32, %c0_i32_0 : i32, i32
  }
  func.func @transform_2(%arg0: i32, %arg1: i32) -> (i32, i32) {
    %c0_i32 = arith.constant 0 : i32
    %c0_i32_0 = arith.constant 0 : i32
    return %c0_i32, %arg0 : i32, i32
  }
  func.func @transform_3(%arg0: i32, %arg1: i32) -> (i32, i32) {
    %c0_i32 = arith.constant 0 : i32
    %c0_i32_0 = arith.constant 0 : i32
    return %c0_i32, %arg0 : i32, i32
  }
  func.func @transform_4(%arg0: i32, %arg1: i32) -> (i32, i32) {
    %c0_i32 = arith.constant 0 : i32
    %c0_i32_0 = arith.constant 0 : i32
    return %arg1, %c0_i32 : i32, i32
  }
  func.func @transform_5(%arg0: i32, %arg1: i32) -> (i32, i32, i32) {
    %c0_i32 = arith.constant 0 : i32
    %c0_i32_0 = arith.constant 0 : i32
    return %arg0, %arg1, %c0_i32 : i32, i32, i32
  }
  func.func @transform_6(%arg0: i32, %arg1: i32) -> (i32, i32, i32) {
    %c0_i32 = arith.constant 0 : i32
    %c0_i32_0 = arith.constant 0 : i32
    return %arg0, %arg1, %c0_i32 : i32, i32, i32
  }
}

module attributes {stable_mosaic.version = 11 : i64} {
  func.func @unembed_logprob_kernel(%arg0: i32, %arg1: i32, %arg2: memref<128x128xbf16, #tpu.memory_space<vmem>>, %arg3: memref<1x128xf32, #tpu.memory_space<vmem>>, %arg4: memref<128x256xbf16, #tpu.memory_space<vmem>>, %arg5: memref<1x256xf32, #tpu.memory_space<vmem>>, %arg6: memref<128x1xf32, #tpu.memory_space<vmem>>, %arg7: memref<128x256xf32, #tpu.memory_space<vmem>>) attributes {dimension_semantics = [#tpu.dimension_semantics<parallel>, #tpu.dimension_semantics<parallel>], iteration_bounds = array<i64: 1, 1>, scalar_prefetch = 0 : i64, scratch_operands = 0 : i64, tpu.core_type = #tpu.core_type<tc>, window_params = [{transform_indices = @transform_0, window_bounds = array<i64: 128, 128>}, {pipeline_mode = #tpu.pipeline_mode<synchronous>, transform_indices = @transform_1, window_bounds = array<i64: 1, 128>}, {transform_indices = @transform_2, window_bounds = array<i64: 128, 256>}, {transform_indices = @transform_3, window_bounds = array<i64: 1, 256>}, {transform_indices = @transform_4, window_bounds = array<i64: 128, 1>}, {transform_indices = @transform_5, window_bounds = array<i64: 128, 256>}]} {
    %c0 = arith.constant 0 : index
    %c0_0 = arith.constant 0 : index
    %0 = vector.load %arg2[%c0, %c0_0] : memref<128x128xbf16, #tpu.memory_space<vmem>>, vector<128x128xbf16>
    %1 = arith.extf %0 : vector<128x128xbf16> to vector<128x128xf32>
    %c0_1 = arith.constant 0 : index
    %c0_2 = arith.constant 0 : index
    %2 = vector.load %arg3[%c0_1, %c0_2] : memref<1x128xf32, #tpu.memory_space<vmem>>, vector<1x128xf32>
    %3 = arith.mulf %1, %1 : vector<128x128xf32>
    %cst = arith.constant dense<0.000000e+00> : vector<128xf32>
    %4 = vector.multi_reduction <add>, %3, %cst [1] : vector<128x128xf32> to vector<128xf32>
    %5 = vector.shape_cast %4 : vector<128xf32> to vector<128x1xf32>
    %cst_3 = arith.constant 1.280000e+02 : f32
    %6 = vector.broadcast %cst_3 : f32 to vector<128x1xf32>
    %7 = arith.divf %5, %6 : vector<128x1xf32>
    %cst_4 = arith.constant 9.99999997E-7 : f32
    %8 = vector.broadcast %cst_4 : f32 to vector<128x1xf32>
    %9 = arith.addf %7, %8 : vector<128x1xf32>
    %10 = math.rsqrt %9 : vector<128x1xf32>
    %11 = vector.broadcast %10 : vector<128x1xf32> to vector<128x128xf32>
    %12 = arith.mulf %1, %11 : vector<128x128xf32>
    %13 = vector.broadcast %2 : vector<1x128xf32> to vector<128x128xf32>
    %14 = arith.mulf %12, %13 : vector<128x128xf32>
    %15 = arith.truncf %14 : vector<128x128xf32> to vector<128x128xbf16>
    %c0_5 = arith.constant 0 : index
    %c0_6 = arith.constant 0 : index
    %16 = vector.load %arg4[%c0_5, %c0_6] : memref<128x256xbf16, #tpu.memory_space<vmem>>, vector<128x256xbf16>
    %cst_7 = arith.constant dense<0.000000e+00> : vector<128x256xf32>
    %17 = tpu.matmul %15, %16, %cst_7 {dimension_numbers = #tpu.dot_dimension_numbers<[1], [0], [0], [1], [0, 0, 1, 1], [], []>} : vector<128x128xbf16>, vector<128x256xbf16>, vector<128x256xf32> -> vector<128x256xf32>
    %c0_8 = arith.constant 0 : index
    %c0_9 = arith.constant 0 : index
    %18 = vector.load %arg5[%c0_8, %c0_9] : memref<1x256xf32, #tpu.memory_space<vmem>>, vector<1x256xf32>
    %19 = vector.broadcast %18 : vector<1x256xf32> to vector<128x256xf32>
    %20 = arith.addf %17, %19 : vector<128x256xf32>
    %c0_10 = arith.constant 0 : index
    %c0_11 = arith.constant 0 : index
    %21 = vector.load %arg6[%c0_10, %c0_11] : memref<128x1xf32, #tpu.memory_space<vmem>>, vector<128x1xf32>
    %22 = vector.broadcast %21 : vector<128x1xf32> to vector<128x256xf32>
    %23 = arith.subf %20, %22 : vector<128x256xf32>
    %c0_12 = arith.constant 0 : index
    %c0_13 = arith.constant 0 : index
    %24 = vector.load %arg7[%c0_12, %c0_13] : memref<128x256xf32, #tpu.memory_space<vmem>>, vector<128x256xf32>
    tpu.vector_store %arg7[%c0_12, %c0_13], %23 {strides = array<i32>} : memref<128x256xf32, #tpu.memory_space<vmem>>, vector<128x256xf32>,
    return
  }
  func.func @transform_0(%arg0: i32, %arg1: i32) -> (i32, i32) {
    %c0_i32 = arith.constant 0 : i32
    %c0_i32_0 = arith.constant 0 : i32
    return %arg1, %c0_i32 : i32, i32
  }
  func.func @transform_1(%arg0: i32, %arg1: i32) -> (i32, i32) {
    %c0_i32 = arith.constant 0 : i32
    %c0_i32_0 = arith.constant 0 : i32
    %c0_i32_1 = arith.constant 0 : i32
    return %c0_i32, %c0_i32_0 : i32, i32
  }
  func.func @transform_2(%arg0: i32, %arg1: i32) -> (i32, i32) {
    %c0_i32 = arith.constant 0 : i32
    %c0_i32_0 = arith.constant 0 : i32
    return %c0_i32, %arg0 : i32, i32
  }
  func.func @transform_3(%arg0: i32, %arg1: i32) -> (i32, i32) {
    %c0_i32 = arith.constant 0 : i32
    %c0_i32_0 = arith.constant 0 : i32
    return %c0_i32, %arg0 : i32, i32
  }
  func.func @transform_4(%arg0: i32, %arg1: i32) -> (i32, i32) {
    %c0_i32 = arith.constant 0 : i32
    %c0_i32_0 = arith.constant 0 : i32
    return %arg1, %c0_i32 : i32, i32
  }
  func.func @transform_5(%arg0: i32, %arg1: i32) -> (i32, i32) {
    %c0_i32 = arith.constant 0 : i32
    return %arg1, %arg0 : i32, i32
  }
}

</mosaic_0001>

<bundles_post_ra>
// kernel: vq_transformer_forward.7
= control target key start
LH: loop header
LB: loop body
LE: loop exit
PB: predicated region body
PF: predicated region fallthrough
CT: control target
= control target key end

     0   :  { %s1093_s0 = inlined_call_operand.vmem [shape: bf16[128,128], index: 0, kind: input, shape index: {}]   ;;  %s1094_s1 = inlined_call_operand.vmem [shape: f32[1,128], index: 1, kind: input, shape index: {}]   ;;  %s1095_s2 = inlined_call_operand.vmem [shape: bf16[128,256], index: 2, kind: input, shape index: {}]   ;;  %s1096_s3 = inlined_call_operand.vmem [shape: f32[1,256], index: 3, kind: input, shape index: {}]   ;;  %s1097_s4 = inlined_call_operand.vmem [shape: f32[128,1], index: 4, kind: input, shape index: {}]   ;;  %s1098_s5 = inlined_call_operand.hbm [shape: f32[128,256], index: 5, kind: output, shape index: {}]  }
   0x1   :  { %v647_v0 = vld [vmem:[%s1093_s0 + $0x20] sm:$0xff]   ;;  %v644_v6 = vld [vmem:[%s1093_s0 + $0x8] sm:$0xff]   ;;  %v676_v12 = vld [vmem:[%s1095_s2 + $0x14] ss:$8 sps:$4 sm:$0xff]  }
   0x2   :  { %v613_v1 = vld [vmem:[%s1093_s0] sm:$0xff]   ;;  %v793_v2 = vunpack.c.l.bf16 %v647_v0  ;;  %v797_v4 = vunpack.c.h.bf16 %v647_v0  ;;  %v648_v11 = vld [vmem:[%s1093_s0 + $0x28] sm:$0xff]   ;;  %v824_v15 = vunpack.c.h.bf16 %v644_v6  ;;  %v826_v16 = vunpack.c.l.bf16 %v644_v6  ;;  %v678_v17 = vld [vmem:[%s1095_s2 + $0x10] ss:$8 sps:$4 sm:$0xff]  }
   0x3   :  { %v795_v3 = vunpack.c.l.bf16 %v613_v1  ;;  %v799_v5 = vunpack.c.h.bf16 %v613_v1  ;;  %v673_v9 = vld [vmem:[%s1095_s2 + $0x4] ss:$8 sps:$4 sm:$0xff]   ;;  %v675_v10 = vld [vmem:[%s1095_s2] ss:$8 sps:$4 sm:$0xff]   ;;  %v835_v20 = vunpack.c.h.bf16 %v648_v11  ;;  %v837_v21 = vunpack.c.l.bf16 %v648_v11 }
   0x4   :  { %v63_v7 = vmul.f32 %v793_v2, %v793_v2  ;;  %v64_v13 = vmul.f32 %v797_v4, %v797_v4  ;;  %306 = vmatprep.subr.bf16.mxu0 %v673_v9  ;;  %651 = vmatprep.subr.bf16.mxu1 %v673_v9  ;;  %v58_v18 = vmul.f32 %v824_v15, %v824_v15 }
   0x5   :  { %v55_v8 = vmul.f32 %v795_v3, %v795_v3  ;;  %v56_v14 = vmul.f32 %v799_v5, %v799_v5  ;;  %307 = vmatpush1.bf16.msra.mxu0 %v675_v10  ;;  %659 = vmatpush1.bf16.msra.mxu1 %v675_v10  ;;  %v57_v19 = vmul.f32 %v826_v16, %v826_v16 }
   0x6   :  { %87 = vadd.xlane.f32.xlu1 %v63_v7 }
   0x7   :  { %71 = vadd.xlane.f32.xlu0 %v55_v8 }
   0xa   :  { %89 = vadd.xlane.f32.xlu1 %v64_v13 }
   0xb   :  { %73 = vadd.xlane.f32.xlu0 %v56_v14 }
   0xc   :  { %10 = vsyncpa [#allocation3], 0  ;;  %v645_v22 = vld [vmem:[%s1093_s0 + $0x10] sm:$0xff]   ;;  %308 = vmatprep.subr.bf16.mxu0 %v676_v12  ;;  %652 = vmatprep.subr.bf16.mxu1 %v676_v12  ;;  %v66_v23 = vmul.f32 %v835_v20, %v835_v20  ;;  %v65_v24 = vmul.f32 %v837_v21, %v837_v21  ;;  %v646_v32 = vld [vmem:[%s1093_s0 + $0x18] sm:$0xff]   ;;  %v753_v56 = vmov 0  }
   0xd   :  { %309 = vmatpush1.bf16.msra.mxu0 %v678_v17  ;;  %660 = vmatpush1.bf16.msra.mxu1 %v678_v17  ;;  %v846_v25 = vunpack.c.h.bf16 %v645_v22  ;;  %v848_v26 = vunpack.c.l.bf16 %v645_v22  ;;  %v649_v27 = vld [vmem:[%s1093_s0 + $0x30] sm:$0xff]   ;;  %v679_v33 = vld [vmem:[%s1095_s2 + $0x24] ss:$8 sps:$4 sm:$0xff]   ;;  %v681_v34 = vld [vmem:[%s1095_s2 + $0x20] ss:$8 sps:$4 sm:$0xff]   ;;  %v874_v37 = vunpack.c.h.bf16 %v646_v32  ;;  %v876_v38 = vunpack.c.l.bf16 %v646_v32 }
   0xe   :  { %77 = vadd.xlane.f32.xlu1 %v58_v18  ;;  %v857_v30 = vunpack.c.h.bf16 %v649_v27  ;;  %v859_v31 = vunpack.c.l.bf16 %v649_v27  ;;  %v650_v39 = vld [vmem:[%s1093_s0 + $0x38] sm:$0xff]   ;;  %310 = vmatprep.subr.bf16.mxu0 %v679_v33  ;;  %v685_v46 = vld [vmem:[%s1095_s2 + $0x44] ss:$8 sps:$4 sm:$0xff]   ;;  %v687_v47 = vld [vmem:[%s1095_s2 + $0x40] ss:$8 sps:$4 sm:$0xff]  }
   0xf   :  { %75 = vadd.xlane.f32.xlu0 %v57_v19  ;;  %v60_v28 = vmul.f32 %v846_v25, %v846_v25  ;;  %v59_v29 = vmul.f32 %v848_v26, %v848_v26  ;;  %653 = vmatprep.subr.bf16.mxu1 %v679_v33  ;;  %v682_v40 = vld [vmem:[%s1095_s2 + $0x34] ss:$8 sps:$4 sm:$0xff]   ;;  %v684_v41 = vld [vmem:[%s1095_s2 + $0x30] ss:$8 sps:$4 sm:$0xff]   ;;  %v62_v42 = vmul.f32 %v874_v37, %v874_v37  ;;  %v891_v44 = vunpack.c.h.bf16 %v650_v39  ;;  %v691_v52 = vld [vmem:[%s1095_s2 + $0x64] ss:$8 sps:$4 sm:$0xff]  }
  0x10   :  { %v68_v35 = vmul.f32 %v857_v30, %v857_v30  ;;  %v67_v36 = vmul.f32 %v859_v31, %v859_v31  ;;  %v61_v43 = vmul.f32 %v876_v38, %v876_v38  ;;  %v893_v45 = vunpack.c.l.bf16 %v650_v39  ;;  %v688_v50 = vld [vmem:[%s1095_s2 + $0x54] ss:$8 sps:$4 sm:$0xff]   ;;  %v690_v51 = vld [vmem:[%s1095_s2 + $0x50] ss:$8 sps:$4 sm:$0xff]   ;;  %v693_v53 = vld [vmem:[%s1095_s2 + $0x60] ss:$8 sps:$4 sm:$0xff]   ;;  %338 = vmatprep.mubr.bf16.mxu0 %v753_v56  ;;  %378 = vmatprep.mubr.bf16.mxu1 %v753_v56 }
  0x11   :  { %311 = vmatpush1.bf16.msra.mxu0 %v681_v34  ;;  %661 = vmatpush1.bf16.msra.mxu1 %v681_v34  ;;  %v70_v48 = vmul.f32 %v891_v44, %v891_v44  ;;  %v694_v54 = vld [vmem:[%s1095_s2 + $0x74] ss:$8 sps:$4 sm:$0xff]   ;;  %v696_v55 = vld [vmem:[%s1095_s2 + $0x70] ss:$8 sps:$4 sm:$0xff]   ;;  %v420_v57 = vld [vmem:[%s1097_s4 + $0x8] sm:$0xff] }
  0x12   :  { %93 = vadd.xlane.f32.xlu1 %v66_v23  ;;  %312 = vmatprep.subr.bf16.mxu0 %v682_v40  ;;  %v69_v49 = vmul.f32 %v893_v45, %v893_v45  ;;  %v421_v58 = vld [vmem:[%s1097_s4 + $0x10] sm:$0xff]  ;;  %v419_v59 = vld [vmem:[%s1097_s4] sm:$0xff]  ;;  %v428_v60 = vld [vmem:[%s1097_s4 + $0x48] sm:$0xff] }
  0x13   :  { %91 = vadd.xlane.f32.xlu0 %v65_v24  ;;  %654 = vmatprep.subr.bf16.mxu1 %v682_v40  ;;  %v422_v61 = vld [vmem:[%s1097_s4 + $0x18] sm:$0xff]  ;;  %v423_v63 = vld [vmem:[%s1097_s4 + $0x20] sm:$0xff]  ;;  %v432_v0 = vld [vmem:[%s1097_s4 + $0x68] sm:$0xff] }
  0x14   :  { %672 = vset.pattern.permute.xlu1 %v753_v56  ;;  %671 = vset.pattern.permute.xlu0 %v753_v56  ;;  %v430_v62 = vld [vmem:[%s1097_s4 + $0x58] sm:$0xff]  ;;  %v424_v1 = vld [vmem:[%s1097_s4 + $0x28] sm:$0xff]  ;;  %v425_v7 = vld [vmem:[%s1097_s4 + $0x30] sm:$0xff] }
  0x15   :  { %313 = vmatpush1.bf16.msra.mxu0 %v684_v41  ;;  %662 = vmatpush1.bf16.msra.mxu1 %v684_v41  ;;  %v434_v6 = vld [vmem:[%s1097_s4 + $0x78] sm:$0xff]  ;;  %v427_v9 = vld [vmem:[%s1097_s4 + $0x40] sm:$0xff]  ;;  %v429_v10 = vld [vmem:[%s1097_s4 + $0x50] sm:$0xff] }
  0x16   :  { %81 = vadd.xlane.f32.xlu1 %v60_v28  ;;  %314 = vmatprep.subr.bf16.mxu0 %v685_v46  ;;  %v426_v8 = vld [vmem:[%s1097_s4 + $0x38] sm:$0xff]  ;;  %v431_v11 = vld [vmem:[%s1097_s4 + $0x60] sm:$0xff]  ;;  %v433_v12 = vld [vmem:[%s1097_s4 + $0x70] sm:$0xff] }
  0x17   :  { %79 = vadd.xlane.f32.xlu0 %v59_v29  ;;  %655 = vmatprep.subr.bf16.mxu1 %v685_v46 }
  0x19   :  { %315 = vmatpush1.bf16.msra.mxu0 %v687_v47  ;;  %663 = vmatpush1.bf16.msra.mxu1 %v687_v47 }
  0x1a   :  { %97 = vadd.xlane.f32.xlu1 %v68_v35  ;;  %316 = vmatprep.subr.bf16.mxu0 %v688_v50 }
  0x1b   :  { %95 = vadd.xlane.f32.xlu0 %v67_v36  ;;  %656 = vmatprep.subr.bf16.mxu1 %v688_v50 }
  0x1d   :  { %317 = vmatpush1.bf16.msra.mxu0 %v690_v51  ;;  %664 = vmatpush1.bf16.msra.mxu1 %v690_v51 }
  0x1e   :  { %85 = vadd.xlane.f32.xlu1 %v62_v42  ;;  %318 = vmatprep.subr.bf16.mxu0 %v691_v52 }
  0x1f   :  { %83 = vadd.xlane.f32.xlu0 %v61_v43  ;;  %657 = vmatprep.subr.bf16.mxu1 %v691_v52 }
  0x21   :  { %319 = vmatpush1.bf16.msra.mxu0 %v693_v53  ;;  %665 = vmatpush1.bf16.msra.mxu1 %v693_v53 }
  0x22   :  { %101 = vadd.xlane.f32.xlu1 %v70_v48  ;;  %320 = vmatprep.subr.bf16.mxu0 %v694_v54 }
  0x23   :  { %99 = vadd.xlane.f32.xlu0 %v69_v49  ;;  %658 = vmatprep.subr.bf16.mxu1 %v694_v54 }
  0x25   :  { %321 = vmatpush1.bf16.msra.mxu0 %v696_v55  ;;  %666 = vmatpush1.bf16.msra.mxu1 %v696_v55 }
  0x33   :  { %442 = vperm.xlu1 %672, %v420_v57  }
  0x37   :  { %447 = vperm.xlu1 %672, %v421_v58  }
  0x39   :  { %437 = vperm.xlu0 %671, %v419_v59  }
  0x3b   :  { %452 = vperm.xlu1 %672, %v422_v61  }
  0x3d   :  { %482 = vperm.xlu0 %671, %v428_v60   ;;  %v979_v60 = vld [vmem:[%s1094_s1] ss:$0 sm:$0xff] }
  0x3f   :  { %457 = vperm.xlu1 %672, %v423_v63  }
  0x41   :  { %492 = vperm.xlu0 %671, %v430_v62  }
  0x43   :  { %462 = vperm.xlu1 %672, %v424_v1  }
  0x45   :  { %502 = vperm.xlu0 %671, %v432_v0  }
  0x47   :  { %467 = vperm.xlu1 %672, %v425_v7  }
  0x49   :  { %512 = vperm.xlu0 %671, %v434_v6  }
  0x4b   :  { %472 = vperm.xlu1 %672, %v426_v8  }
  0x4f   :  { %477 = vperm.xlu1 %672, %v427_v9  }
  0x53   :  { %487 = vperm.xlu1 %672, %v429_v10  }
  0x57   :  { %497 = vperm.xlu1 %672, %v431_v11  }
  0x5b   :  { %507 = vperm.xlu1 %672, %v433_v12  }
  0x93   :  { %v88_v13 = vpop.xlane.xlu1 %87 }
  0x94   :  { %v72_v14 = vpop.xlane.xlu0 %71  ;;  %v112_v17 = vmul.f32 0.0078125, %v88_v13 }
  0x95   :  { %v104_v18 = vmul.f32 0.0078125, %v72_v14 }
  0x96   :  { %v128_v19 = vadd.f32 1e-06, %v112_v17 }
  0x97   :  { %v120_v22 = vadd.f32 1e-06, %v104_v18  ;;  %v90_v23 = vpop.xlane.xlu1 %89 }
  0x98   :  { %v74_v24 = vpop.xlane.xlu0 %73  ;;  %697 = vrsqrt.f32 %v128_v19  ;;  %v113_v27 = vmul.f32 0.0078125, %v90_v23 }
  0x99   :  { %v105_v28 = vmul.f32 0.0078125, %v74_v24  ;;  %699 = vrsqrt.f32 %v120_v22 }
  0x9a   :  { %v129_v29 = vadd.f32 1e-06, %v113_v27 }
  0x9b   :  { %v121_v32 = vadd.f32 1e-06, %v105_v28  ;;  %v78_v33 = vpop.xlane.xlu1 %77 }
  0x9c   :  { %v76_v34 = vpop.xlane.xlu0 %75  ;;  %701 = vrsqrt.f32 %v129_v29  ;;  %v107_v35 = vmul.f32 0.0078125, %v78_v33 }
  0x9d   :  { %v106_v36 = vmul.f32 0.0078125, %v76_v34  ;;  %703 = vrsqrt.f32 %v121_v32 }
  0x9e   :  { %v123_v39 = vadd.f32 1e-06, %v107_v35 }
  0x9f   :  { %v122_v40 = vadd.f32 1e-06, %v106_v36  ;;  %v94_v41 = vpop.xlane.xlu1 %93 }
  0xa0   :  { %v92_v42 = vpop.xlane.xlu0 %91  ;;  %705 = vrsqrt.f32 %v123_v39  ;;  %v115_v43 = vmul.f32 0.0078125, %v94_v41 }
  0xa1   :  { %v114_v46 = vmul.f32 0.0078125, %v92_v42  ;;  %707 = vrsqrt.f32 %v122_v40 }
  0xa2   :  { %v698_v47 = vpop.eup %697  ;;  %v131_v48 = vadd.f32 1e-06, %v115_v43 }
  0xa3   :  { %v130_v49 = vadd.f32 1e-06, %v114_v46  ;;  %v700_v50 = vpop.eup %699  ;;  %v82_v51 = vpop.xlane.xlu1 %81  ;;  %v160_v55 = vmul.f32 %v698_v47, %v793_v2 }
  0xa4   :  { %v80_v52 = vpop.xlane.xlu0 %79  ;;  %709 = vrsqrt.f32 %v131_v48  ;;  %v109_v53 = vmul.f32 0.0078125, %v82_v51  ;;  %v152_v61 = vmul.f32 %v700_v50, %v795_v3 }
  0xa5   :  { %v108_v54 = vmul.f32 0.0078125, %v80_v52  ;;  %711 = vrsqrt.f32 %v130_v49  ;;  %v182_v8 = vmul.f32 %v979_v60, %v160_v55 }
  0xa6   :  { %v702_v57 = vpop.eup %701  ;;  %v125_v58 = vadd.f32 1e-06, %v109_v53  ;;  %v174_v3 = vmul.f32 %v979_v60, %v152_v61 }
  0xa7   :  { %v124_v59 = vadd.f32 1e-06, %v108_v54  ;;  %v704_v62 = vpop.eup %703  ;;  %v98_v63 = vpop.xlane.xlu1 %97  ;;  %v161_v1 = vmul.f32 %v702_v57, %v797_v4 }
  0xa8   :  { %v96_v0 = vpop.xlane.xlu0 %95  ;;  %713 = vrsqrt.f32 %v125_v58  ;;  %v117_v6 = vmul.f32 0.0078125, %v98_v63  ;;  %v153_v2 = vmul.f32 %v704_v62, %v799_v5 }
  0xa9   :  { %v116_v7 = vmul.f32 0.0078125, %v96_v0  ;;  %715 = vrsqrt.f32 %v124_v59  ;;  %v183_v9 = vmul.f32 %v979_v60, %v161_v1 }
  0xaa   :  { %v706_v10 = vpop.eup %705  ;;  %v133_v11 = vadd.f32 1e-06, %v117_v6  ;;  %v175_v13 = vmul.f32 %v979_v60, %v153_v2 }
  0xab   :  { %v132_v12 = vadd.f32 1e-06, %v116_v7  ;;  %v708_v14 = vpop.eup %707  ;;  %v86_v17 = vpop.xlane.xlu1 %85  ;;  %v194_v18 = vpack.c.bf16 %v183_v9, %v182_v8  ;;  %v155_v19 = vmul.f32 %v706_v10, %v824_v15 }
  0xac   :  { %v84_v4 = vpop.xlane.xlu0 %83  ;;  %717 = vrsqrt.f32 %v133_v11  ;;  %v111_v5 = vmul.f32 0.0078125, %v86_v17  ;;  %v190_v23 = vpack.c.bf16 %v175_v13, %v174_v3  ;;  %v154_v24 = vmul.f32 %v708_v14, %v826_v16 }
  0xad   :  { %v110_v22 = vmul.f32 0.0078125, %v84_v4  ;;  %719 = vrsqrt.f32 %v132_v12  ;;  %379 = vmatmul.mubr.bf16.vlgmr.msra.gmra.mrb[0].mxu1 %v194_v18  ;;  %v177_v35 = vmul.f32 %v979_v60, %v155_v19  ;;  %v216_v3 = vlaneseq }
  0xae   :  { %v710_v27 = vpop.eup %709  ;;  %v127_v28 = vadd.f32 1e-06, %v111_v5  ;;  %339 = vmatmul.mubr.bf16.vlgmr.msra.gmra.mrb[0].mxu0 %v190_v23  ;;  %388 = vmatprep.mubr.bf16.mxu1 %v753_v56  ;;  %v176_v15 = vmul.f32 %v979_v60, %v154_v24 }
  0xaf   :  { %v126_v29 = vadd.f32 1e-06, %v110_v22  ;;  %v712_v32 = vpop.eup %711  ;;  %v102_v33 = vpop.xlane.xlu1 %101  ;;  %348 = vmatprep.mubr.bf16.mxu0 %v753_v56  ;;  %v163_v36 = vmul.f32 %v710_v27, %v835_v20 }
  0xb0   :  { %v100_v34 = vpop.xlane.xlu0 %99  ;;  %721 = vrsqrt.f32 %v127_v28  ;;  %v119_v39 = vmul.f32 0.0078125, %v102_v33  ;;  %v162_v40 = vmul.f32 %v712_v32, %v837_v21  ;;  %v191_v49 = vpack.c.bf16 %v177_v35, %v176_v15 }
  0xb1   :  { %v118_v16 = vmul.f32 0.0078125, %v100_v34  ;;  %723 = vrsqrt.f32 %v126_v29  ;;  %v185_v41 = vmul.f32 %v979_v60, %v163_v36 }
  0xb2   :  { %v714_v42 = vpop.eup %713  ;;  %v135_v43 = vadd.f32 1e-06, %v119_v39  ;;  %v184_v47 = vmul.f32 %v979_v60, %v162_v40 }
  0xb3   :  { %v134_v46 = vadd.f32 1e-06, %v118_v16  ;;  %v716_v48 = vpop.eup %715  ;;  %v157_v20 = vmul.f32 %v714_v42, %v846_v25  ;;  %v443_v10 = vpop.permute.xlu1 %442 }
  0xb4   :  { %725 = vrsqrt.f32 %v135_v43  ;;  %v195_v50 = vpack.c.bf16 %v185_v41, %v184_v47  ;;  %v156_v51 = vmul.f32 %v716_v48, %v848_v26 }
  0xb5   :  { %727 = vrsqrt.f32 %v134_v46  ;;  %v179_v55 = vmul.f32 %v979_v60, %v157_v20 }
  0xb6   :  { %v718_v52 = vpop.eup %717  ;;  %349 = vmatmul.mubr.bf16.gmra.mrb[4].mxu0 %v191_v49  ;;  %389 = vmatmul.mubr.bf16.gmra.mrb[4].mxu1 %v195_v50  ;;  %v178_v54 = vmul.f32 %v979_v60, %v156_v51 }
  0xb7   :  { %v720_v21 = vpop.eup %719  ;;  %358 = vmatprep.mubr.bf16.mxu0 %v753_v56  ;;  %398 = vmatprep.mubr.bf16.mxu1 %v753_v56  ;;  %v165_v53 = vmul.f32 %v718_v52, %v857_v30  ;;  %v1018_v11 = vpop.permute.xlu1 %447 }
  0xb8   :  { %v164_v57 = vmul.f32 %v720_v21, %v859_v31  ;;  %v192_v61 = vpack.c.bf16 %v179_v55, %v178_v54  ;;  %v438_v19 = vpop.permute.xlu0 %437 }
  0xb9   :  { %v187_v26 = vmul.f32 %v979_v60, %v165_v53 }
  0xba   :  { %v722_v25 = vpop.eup %721  ;;  %v186_v58 = vmul.f32 %v979_v60, %v164_v57 }
  0xbb   :  { %v724_v59 = vpop.eup %723  ;;  %v159_v0 = vmul.f32 %v722_v25, %v874_v37 }
  0xbc   :  { %v196_v62 = vpack.c.bf16 %v187_v26, %v186_v58  ;;  %v158_v63 = vmul.f32 %v724_v59, %v876_v38  ;;  %v483_v42 = vpop.permute.xlu0 %482 }
  0xbd   :  { %v181_v7 = vmul.f32 %v979_v60, %v159_v0 }
  0xbe   :  { %v726_v1 = vpop.eup %725  ;;  %359 = vmatmul.mubr.bf16.gmra.mrb[8].mxu0 %v192_v61  ;;  %399 = vmatmul.mubr.bf16.gmra.mrb[8].mxu1 %v196_v62  ;;  %v180_v6 = vmul.f32 %v979_v60, %v158_v63 }
  0xbf   :  { %v728_v30 = vpop.eup %727  ;;  %368 = vmatprep.mubr.bf16.mxu0 %v753_v56  ;;  %408 = vmatprep.mubr.bf16.mxu1 %v753_v56  ;;  %v167_v31 = vmul.f32 %v726_v1, %v891_v44  ;;  %v1020_v56 = vpop.permute.xlu1 %452 }
  0xc0   :  { %v166_v2 = vmul.f32 %v728_v30, %v893_v45  ;;  %v193_v8 = vpack.c.bf16 %v181_v7, %v180_v6  ;;  %v217_v45 = vshrl.u32 %v216_v3, 7  ;;  %v493_v7 = vpop.permute.xlu0 %492 }
  0xc1   :  { %v189_v38 = vmul.f32 %v979_v60, %v167_v31 }
  0xc2   :  { %v188_v37 = vmul.f32 %v979_v60, %v166_v2  ;;  %v218_v14 = vsub.s32 0, %v217_v45  ;;  %v214_v60 = vld [vmem:[%s1096_s3] sm:$0x3]  ;;  %v222_v4 = vsub.s32 1, %v217_v45  ;;  %s754_s3 = smov [#allocation2]  }
  0xc3   :  { %v1022_v44 = vpop.permute.xlu1 %457  ;;  %s584_s21 = sshll.u32 %s754_s3, 4  ;;  %s585_s21 = int_to_ptr.vmem [resolvable:$true] %s584_s21 }
  0xc4   :  { %v197_v9 = vpack.c.bf16 %v189_v38, %v188_v37  ;;  %v1033_v18 = vrot.slane %v214_v60, %v218_v14  ;;  %v1035_v5 = vrot.slane %v214_v60, %v222_v4  ;;  %s729_s22 = scalar_lea.vmem %s585_s21, 4096  ;;  %p734_p1 = scmp.lt.s32.totalorder %s585_s21, %s585_s21 }
  0xc5   :  { %p730_p0 = scmp.ne.s32.totalorder %s585_s21, %s729_s22  ;;  %p735_p2 = scmp.lt.s32.totalorder %s729_s22, %s729_s22 }
  0xc6   :  { %369 = vmatmul.mubr.bf16.gmra.mrb[12].mxu0 %v193_v8  ;;  %409 = vmatmul.mubr.bf16.gmra.mrb[12].mxu1 %v197_v9 }
  0xc7   :  { %v1024_v12 = vpop.permute.xlu1 %462  ;;  %p736_p3 = por %p735_p2, %p734_p1 }
  0xc9   :  { %p737_p4 = pnand %p736_p3, %p730_p0 }
  0xcb   :  { %v1026_v13 = vpop.permute.xlu1 %467 }
  0xcf   :  { %v1028_v17 = vpop.permute.xlu1 %472 }
  0xd3   :  { %v478_v22 = vpop.permute.xlu1 %477 }
  0xd7   :  { %v488_v21 = vpop.permute.xlu1 %487 }
  0xdb   :  { %v498_v14 = vpop.permute.xlu1 %497 }
 0x180   :  { %v380_v23 = vpop.f32.mrb[0].mxu1 }
 0x181   :  { %v340_v24 = vpop.f32.mrb[0].mxu0  ;;  %v381_v27 = vadd.f32 %v380_v23, %v1033_v18  ;;  %v382_v28 = vpop.f32.mrb[1].mxu1 }
 0x182   :  { %v341_v29 = vadd.f32 %v340_v24, %v1033_v18  ;;  %v342_v32 = vpop.f32.mrb[1].mxu0  ;;  %v383_v33 = vadd.f32 %v382_v28, %v1035_v5  ;;  %v384_v34 = vpop.f32.mrb[2].mxu1 }
 0x183   :  { %v531_v15 = vsub.f32 %v381_v27, %v478_v22  ;;  %v343_v35 = vadd.f32 %v342_v32, %v1035_v5  ;;  %v344_v36 = vpop.f32.mrb[2].mxu0  ;;  %v385_v39 = vadd.f32 %v384_v34, %v1033_v18  ;;  %v386_v16 = vpop.f32.mrb[3].mxu1 }
 0x184   :  { %v515_v40 = vsub.f32 %v341_v29, %v438_v19  ;;  %v532_v41 = vsub.f32 %v383_v33, %v478_v22  ;;  %v345_v43 = vadd.f32 %v344_v36, %v1033_v18  ;;  %v346_v46 = vpop.f32.mrb[3].mxu0  ;;  %v387_v47 = vadd.f32 %v386_v16, %v1035_v5  ;;  %v503_v36 = vpop.permute.xlu0 %502 }
 0x185   :  { %563 = vst [vmem:[#allocation2 + $0x80] sm:$0xff] %v531_v15  ;;  %v516_v48 = vsub.f32 %v343_v35, %v438_v19  ;;  %v533_v49 = vsub.f32 %v385_v39, %v483_v42  ;;  %v347_v50 = vadd.f32 %v346_v46, %v1035_v5 }
 0x186   :  { %547 = vst [vmem:[#allocation2] sm:$0xff] %v515_v40  ;;  %564 = vst [vmem:[#allocation2 + $0x88] sm:$0xff] %v532_v41  ;;  %v517_v51 = vsub.f32 %v345_v43, %v443_v10  ;;  %v534_v20 = vsub.f32 %v387_v47, %v483_v42 }
 0x187   :  { %548 = vst [vmem:[#allocation2 + $0x8] sm:$0xff] %v516_v48  ;;  %565 = vst [vmem:[#allocation2 + $0x90] sm:$0xff] %v533_v49  ;;  %v518_v52 = vsub.f32 %v347_v50, %v443_v10  ;;  %v508_v48 = vpop.permute.xlu1 %507 }
 0x188   :  { %549 = vst [vmem:[#allocation2 + $0x10] sm:$0xff] %v517_v51  ;;  %566 = vst [vmem:[#allocation2 + $0x98] sm:$0xff] %v534_v20 }
 0x189   :  { %550 = vst [vmem:[#allocation2 + $0x18] sm:$0xff] %v518_v52  ;;  %v350_v53 = vpop.f32.mrb[4].mxu0  ;;  %v390_v54 = vpop.f32.mrb[4].mxu1 }
 0x18a   :  { %v351_v55 = vadd.f32 %v350_v53, %v1033_v18  ;;  %v391_v57 = vadd.f32 %v390_v54, %v1033_v18  ;;  %v352_v26 = vpop.f32.mrb[5].mxu0  ;;  %v392_v25 = vpop.f32.mrb[5].mxu1 }
 0x18b   :  { %v353_v58 = vadd.f32 %v352_v26, %v1035_v5  ;;  %v393_v59 = vadd.f32 %v392_v25, %v1035_v5  ;;  %v354_v61 = vpop.f32.mrb[6].mxu0  ;;  %v394_v62 = vpop.f32.mrb[6].mxu1 }
 0x18c   :  { %v519_v63 = vsub.f32 %v351_v55, %v1018_v11  ;;  %v535_v0 = vsub.f32 %v391_v57, %v488_v21  ;;  %v355_v1 = vadd.f32 %v354_v61, %v1033_v18  ;;  %v395_v30 = vadd.f32 %v394_v62, %v1033_v18  ;;  %v356_v31 = vpop.f32.mrb[7].mxu0  ;;  %v396_v6 = vpop.f32.mrb[7].mxu1 }
 0x18d   :  { %v520_v2 = vsub.f32 %v353_v58, %v1018_v11  ;;  %v536_v38 = vsub.f32 %v393_v59, %v488_v21  ;;  %v357_v37 = vadd.f32 %v356_v31, %v1035_v5  ;;  %v397_v8 = vadd.f32 %v396_v6, %v1035_v5  ;;  %v513_v61 = vpop.permute.xlu0 %512 }
 0x18e   :  { %551 = vst [vmem:[#allocation2 + $0x20] sm:$0xff] %v519_v63  ;;  %567 = vst [vmem:[#allocation2 + $0xa0] sm:$0xff] %v535_v0  ;;  %v521_v9 = vsub.f32 %v355_v1, %v1020_v56  ;;  %v537_v10 = vsub.f32 %v395_v30, %v493_v7 }
 0x18f   :  { %552 = vst [vmem:[#allocation2 + $0x28] sm:$0xff] %v520_v2  ;;  %568 = vst [vmem:[#allocation2 + $0xa8] sm:$0xff] %v536_v38  ;;  %v522_v3 = vsub.f32 %v357_v37, %v1020_v56  ;;  %v538_v45 = vsub.f32 %v397_v8, %v493_v7 }
 0x190   :  { %553 = vst [vmem:[#allocation2 + $0x30] sm:$0xff] %v521_v9  ;;  %569 = vst [vmem:[#allocation2 + $0xb0] sm:$0xff] %v537_v10 }
 0x191   :  { %554 = vst [vmem:[#allocation2 + $0x38] sm:$0xff] %v522_v3  ;;  %570 = vst [vmem:[#allocation2 + $0xb8] sm:$0xff] %v538_v45  ;;  %v360_v11 = vpop.f32.mrb[8].mxu0  ;;  %v400_v60 = vpop.f32.mrb[8].mxu1 }
 0x192   :  { %v361_v4 = vadd.f32 %v360_v11, %v1033_v18  ;;  %v401_v19 = vadd.f32 %v400_v60, %v1033_v18  ;;  %v362_v22 = vpop.f32.mrb[9].mxu0  ;;  %v402_v23 = vpop.f32.mrb[9].mxu1 }
 0x193   :  { %v363_v24 = vadd.f32 %v362_v22, %v1035_v5  ;;  %v403_v27 = vadd.f32 %v402_v23, %v1035_v5  ;;  %v364_v28 = vpop.f32.mrb[10].mxu0  ;;  %v404_v56 = vpop.f32.mrb[10].mxu1 }
 0x194   :  { %v523_v29 = vsub.f32 %v361_v4, %v1022_v44  ;;  %v539_v32 = vsub.f32 %v401_v19, %v498_v14  ;;  %v365_v33 = vadd.f32 %v364_v28, %v1033_v18  ;;  %v405_v34 = vadd.f32 %v404_v56, %v1033_v18  ;;  %v366_v15 = vpop.f32.mrb[11].mxu0  ;;  %v406_v35 = vpop.f32.mrb[11].mxu1 }
 0x195   :  { %v524_v39 = vsub.f32 %v363_v24, %v1022_v44  ;;  %v540_v16 = vsub.f32 %v403_v27, %v498_v14  ;;  %v367_v40 = vadd.f32 %v366_v15, %v1035_v5  ;;  %v407_v41 = vadd.f32 %v406_v35, %v1035_v5 }
 0x196   :  { %555 = vst [vmem:[#allocation2 + $0x40] sm:$0xff] %v523_v29  ;;  %571 = vst [vmem:[#allocation2 + $0xc0] sm:$0xff] %v539_v32  ;;  %v525_v42 = vsub.f32 %v365_v33, %v1024_v12  ;;  %v541_v43 = vsub.f32 %v405_v34, %v503_v36 }
 0x197   :  { %556 = vst [vmem:[#allocation2 + $0x48] sm:$0xff] %v524_v39  ;;  %572 = vst [vmem:[#allocation2 + $0xc8] sm:$0xff] %v540_v16  ;;  %v526_v46 = vsub.f32 %v367_v40, %v1024_v12  ;;  %v542_v47 = vsub.f32 %v407_v41, %v503_v36 }
 0x198   :  { %557 = vst [vmem:[#allocation2 + $0x50] sm:$0xff] %v525_v42  ;;  %573 = vst [vmem:[#allocation2 + $0xd0] sm:$0xff] %v541_v43 }
 0x199   :  { %558 = vst [vmem:[#allocation2 + $0x58] sm:$0xff] %v526_v46  ;;  %574 = vst [vmem:[#allocation2 + $0xd8] sm:$0xff] %v542_v47  ;;  %v370_v44 = vpop.f32.mrb[12].mxu0  ;;  %v410_v49 = vpop.f32.mrb[12].mxu1 }
 0x19a   :  { %v371_v50 = vadd.f32 %v370_v44, %v1033_v18  ;;  %v411_v51 = vadd.f32 %v410_v49, %v1033_v18  ;;  %v372_v20 = vpop.f32.mrb[13].mxu0  ;;  %v412_v52 = vpop.f32.mrb[13].mxu1 }
 0x19b   :  { %v373_v21 = vadd.f32 %v372_v20, %v1035_v5  ;;  %v413_v53 = vadd.f32 %v412_v52, %v1035_v5  ;;  %v374_v54 = vpop.f32.mrb[14].mxu0  ;;  %v414_v12 = vpop.f32.mrb[14].mxu1 }
 0x19c   :  { %v527_v55 = vsub.f32 %v371_v50, %v1026_v13  ;;  %v543_v57 = vsub.f32 %v411_v51, %v508_v48  ;;  %v375_v26 = vadd.f32 %v374_v54, %v1033_v18  ;;  %v415_v25 = vadd.f32 %v414_v12, %v1033_v18  ;;  %v376_v58 = vpop.f32.mrb[15].mxu0  ;;  %v416_v59 = vpop.f32.mrb[15].mxu1 }
 0x19d   :  { %v528_v62 = vsub.f32 %v373_v21, %v1026_v13  ;;  %v544_v63 = vsub.f32 %v413_v53, %v508_v48  ;;  %v377_v0 = vadd.f32 %v376_v58, %v1035_v5  ;;  %v417_v1 = vadd.f32 %v416_v59, %v1035_v5 }
 0x19e   :  { %559 = vst [vmem:[#allocation2 + $0x60] sm:$0xff] %v527_v55  ;;  %575 = vst [vmem:[#allocation2 + $0xe0] sm:$0xff] %v543_v57  ;;  %v529_v30 = vsub.f32 %v375_v26, %v1028_v17  ;;  %v545_v31 = vsub.f32 %v415_v25, %v513_v61 }
 0x19f   :  { %560 = vst [vmem:[#allocation2 + $0x68] sm:$0xff] %v528_v62  ;;  %576 = vst [vmem:[#allocation2 + $0xe8] sm:$0xff] %v544_v63  ;;  %v530_v18 = vsub.f32 %v377_v0, %v1028_v17  ;;  %v546_v6 = vsub.f32 %v417_v1, %v513_v61 }
 0x1a0   :  { %561 = vst [vmem:[#allocation2 + $0x70] sm:$0xff] %v529_v30  ;;  %577 = vst [vmem:[#allocation2 + $0xf0] sm:$0xff] %v545_v31 }
 0x1a1   :  { %562 = vst [vmem:[#allocation2 + $0x78] sm:$0xff] %v530_v18  ;;  %578 = vst [vmem:[#allocation2 + $0xf8] sm:$0xff] %v546_v6 }
 0x1a2   :  { %740 = shalt.err (!%p737_p4)
}
 0x1a3   :  { %s741_s0 = scalar_lea.hbm %s1098_s5, 4096 }
 0x1a4   :  { %p742_p5 = scmp.ne.s32.totalorder %s1098_s5, %s741_s0  ;;  %p745_p6 = scmp.lt.u32.totalorder %s741_s0, %s1098_s5 }
 0x1a6   :  { %p747_p7 = pnand %p745_p6, %p742_p5 }
 0x1a8   :  { %750 = shalt.err (!%p747_p7)
}
 0x1a9   :  { %s755_s29 = smov 256   ;;  %s756_s30 = smov 16  }
 0x1aa   :  { %590 = dma.vmem_to_hbm [thread:$0]  %s585_s21, 4096, %s1098_s5, [#allocation3], %s755_s29, %s755_s29, %s756_s30  }
 0x1ab   :  { %751 = dma.done.wait [#allocation3], 4096  }
 0x1ac   :  { %752 = vsyncadd [#allocation3], 4294963200 }
 0x1ad   :  { %594 = vsyncpa [#allocation3], 1 }

// kernel: vq_transformer_forward.6
= control target key start
LH: loop header
LB: loop body
LE: loop exit
PB: predicated region body
PF: predicated region fallthrough
CT: control target
= control target key end

     0   :  { %v1788_v55 = vmov 0   ;;  %s2590_s0 = inlined_call_operand.vmem [shape: bf16[128,128], index: 0, kind: input, shape index: {}]   ;;  %s2591_s2 = inlined_call_operand.vmem [shape: bf16[128,256], index: 2, kind: input, shape index: {}]   ;;  %s2592_s4 = inlined_call_operand.vmem [shape: s32[128,1], index: 4, kind: input, shape index: {}]   ;;  %s2593_s1 = inlined_call_operand.vmem [shape: f32[1,128], index: 1, kind: input, shape index: {}]   ;;  %s2594_s3 = inlined_call_operand.vmem [shape: f32[1,256], index: 3, kind: input, shape index: {}]   ;;  %s2595_s5 = inlined_call_operand.vmem [shape: f32[1,128,1], index: 5, kind: output, shape index: {0}]   ;;  %s2596_s6 = inlined_call_operand.vmem [shape: f32[1,128,1], index: 6, kind: output, shape index: {1}]  }
   0x1   :  { %v1596_v0 = vld [vmem:[%s2590_s0 + $0x20] sm:$0xff]   ;;  %v1593_v6 = vld [vmem:[%s2590_s0 + $0x8] sm:$0xff]   ;;  %v1623_v12 = vld [vmem:[%s2591_s2 + $0x14] ss:$8 sps:$4 sm:$0xff]   ;;  %339 = vmatprep.mubr.bf16.mxu0 %v1788_v55  ;;  %379 = vmatprep.mubr.bf16.mxu1 %v1788_v55 }
   0x2   :  { %v1562_v1 = vld [vmem:[%s2590_s0] sm:$0xff]   ;;  %v1831_v2 = vunpack.c.l.bf16 %v1596_v0  ;;  %v1835_v4 = vunpack.c.h.bf16 %v1596_v0  ;;  %v1597_v11 = vld [vmem:[%s2590_s0 + $0x28] sm:$0xff]   ;;  %v1862_v15 = vunpack.c.h.bf16 %v1593_v6  ;;  %v1864_v16 = vunpack.c.l.bf16 %v1593_v6  ;;  %v1625_v17 = vld [vmem:[%s2591_s2 + $0x10] ss:$8 sps:$4 sm:$0xff]   ;;  %1619 = vset.pattern.permute.xlu1 %v1788_v55  ;;  %1618 = vset.pattern.permute.xlu0 %v1788_v55 }
   0x3   :  { %v1833_v3 = vunpack.c.l.bf16 %v1562_v1  ;;  %v1837_v5 = vunpack.c.h.bf16 %v1562_v1  ;;  %v1620_v9 = vld [vmem:[%s2591_s2 + $0x4] ss:$8 sps:$4 sm:$0xff]   ;;  %v1622_v10 = vld [vmem:[%s2591_s2] ss:$8 sps:$4 sm:$0xff]   ;;  %v1873_v20 = vunpack.c.h.bf16 %v1597_v11  ;;  %v1875_v21 = vunpack.c.l.bf16 %v1597_v11  ;;  %v1594_v22 = vld [vmem:[%s2590_s0 + $0x10] sm:$0xff]  }
   0x4   :  { %v64_v7 = vmul.f32 %v1831_v2, %v1831_v2  ;;  %v65_v13 = vmul.f32 %v1835_v4, %v1835_v4  ;;  %307 = vmatprep.subr.bf16.mxu0 %v1620_v9  ;;  %1600 = vmatprep.subr.bf16.mxu1 %v1620_v9  ;;  %v59_v18 = vmul.f32 %v1862_v15, %v1862_v15  ;;  %v1884_v25 = vunpack.c.h.bf16 %v1594_v22  ;;  %v1598_v27 = vld [vmem:[%s2590_s0 + $0x30] sm:$0xff]   ;;  %v1595_v32 = vld [vmem:[%s2590_s0 + $0x18] sm:$0xff]   ;;  %v1626_v33 = vld [vmem:[%s2591_s2 + $0x24] ss:$8 sps:$4 sm:$0xff]  }
   0x5   :  { %v56_v8 = vmul.f32 %v1833_v3, %v1833_v3  ;;  %v57_v14 = vmul.f32 %v1837_v5, %v1837_v5  ;;  %308 = vmatpush1.bf16.msra.mxu0 %v1622_v10  ;;  %1608 = vmatpush1.bf16.msra.mxu1 %v1622_v10  ;;  %v58_v19 = vmul.f32 %v1864_v16, %v1864_v16  ;;  %v1886_v26 = vunpack.c.l.bf16 %v1594_v22  ;;  %v1628_v34 = vld [vmem:[%s2591_s2 + $0x20] ss:$8 sps:$4 sm:$0xff]   ;;  %v1599_v39 = vld [vmem:[%s2590_s0 + $0x38] sm:$0xff]   ;;  %v1632_v46 = vld [vmem:[%s2591_s2 + $0x44] ss:$8 sps:$4 sm:$0xff]  }
   0x6   :  { %88 = vadd.xlane.f32.xlu1 %v64_v7  ;;  %309 = vmatprep.subr.bf16.mxu0 %v1623_v12  ;;  %v67_v23 = vmul.f32 %v1873_v20, %v1873_v20  ;;  %v66_v24 = vmul.f32 %v1875_v21, %v1875_v21  ;;  %v61_v28 = vmul.f32 %v1884_v25, %v1884_v25  ;;  %v1895_v30 = vunpack.c.h.bf16 %v1598_v27  ;;  %v1629_v40 = vld [vmem:[%s2591_s2 + $0x34] ss:$8 sps:$4 sm:$0xff]   ;;  %v1631_v41 = vld [vmem:[%s2591_s2 + $0x30] ss:$8 sps:$4 sm:$0xff]   ;;  %v1634_v47 = vld [vmem:[%s2591_s2 + $0x40] ss:$8 sps:$4 sm:$0xff]  }
   0x7   :  { %72 = vadd.xlane.f32.xlu0 %v56_v8  ;;  %1601 = vmatprep.subr.bf16.mxu1 %v1623_v12  ;;  %v60_v29 = vmul.f32 %v1886_v26, %v1886_v26  ;;  %v1897_v31 = vunpack.c.l.bf16 %v1598_v27  ;;  %v1912_v37 = vunpack.c.h.bf16 %v1595_v32  ;;  %v1914_v38 = vunpack.c.l.bf16 %v1595_v32  ;;  %v1635_v50 = vld [vmem:[%s2591_s2 + $0x54] ss:$8 sps:$4 sm:$0xff]   ;;  %v1637_v51 = vld [vmem:[%s2591_s2 + $0x50] ss:$8 sps:$4 sm:$0xff]   ;;  %v1638_v52 = vld [vmem:[%s2591_s2 + $0x64] ss:$8 sps:$4 sm:$0xff]  }
   0x8   :  { %v69_v35 = vmul.f32 %v1895_v30, %v1895_v30  ;;  %v1929_v44 = vunpack.c.h.bf16 %v1599_v39  ;;  %v1931_v45 = vunpack.c.l.bf16 %v1599_v39  ;;  %v1640_v53 = vld [vmem:[%s2591_s2 + $0x60] ss:$8 sps:$4 sm:$0xff]   ;;  %v1641_v54 = vld [vmem:[%s2591_s2 + $0x74] ss:$8 sps:$4 sm:$0xff]   ;;  %v1643_v56 = vld [vmem:[%s2591_s2 + $0x70] ss:$8 sps:$4 sm:$0xff]  }
   0x9   :  { %310 = vmatpush1.bf16.msra.mxu0 %v1625_v17  ;;  %1609 = vmatpush1.bf16.msra.mxu1 %v1625_v17  ;;  %v68_v36 = vmul.f32 %v1897_v31, %v1897_v31  ;;  %v63_v42 = vmul.f32 %v1912_v37, %v1912_v37  ;;  %v62_v43 = vmul.f32 %v1914_v38, %v1914_v38  ;;  %v421_v57 = vld [vmem:[%s2592_s4 + $0x8] sm:$0xff]  ;;  %v420_v58 = vld [vmem:[%s2592_s4] sm:$0xff]  ;;  %v423_v59 = vld [vmem:[%s2592_s4 + $0x18] sm:$0xff] }
   0xa   :  { %90 = vadd.xlane.f32.xlu1 %v65_v13  ;;  %311 = vmatprep.subr.bf16.mxu0 %v1626_v33  ;;  %v71_v48 = vmul.f32 %v1929_v44, %v1929_v44  ;;  %v70_v49 = vmul.f32 %v1931_v45, %v1931_v45  ;;  %v422_v60 = vld [vmem:[%s2592_s4 + $0x10] sm:$0xff]  ;;  %v424_v61 = vld [vmem:[%s2592_s4 + $0x20] sm:$0xff]  ;;  %v425_v63 = vld [vmem:[%s2592_s4 + $0x28] sm:$0xff] }
   0xb   :  { %74 = vadd.xlane.f32.xlu0 %v57_v14  ;;  %1602 = vmatprep.subr.bf16.mxu1 %v1626_v33  ;;  %v428_v62 = vld [vmem:[%s2592_s4 + $0x40] sm:$0xff]  ;;  %v430_v0 = vld [vmem:[%s2592_s4 + $0x50] sm:$0xff]  ;;  %v427_v7 = vld [vmem:[%s2592_s4 + $0x38] sm:$0xff] }
   0xc   :  { %v426_v1 = vld [vmem:[%s2592_s4 + $0x30] sm:$0xff]  ;;  %v432_v6 = vld [vmem:[%s2592_s4 + $0x60] sm:$0xff]  ;;  %v429_v8 = vld [vmem:[%s2592_s4 + $0x48] sm:$0xff] }
   0xd   :  { %312 = vmatpush1.bf16.msra.mxu0 %v1628_v34  ;;  %1610 = vmatpush1.bf16.msra.mxu1 %v1628_v34  ;;  %v431_v9 = vld [vmem:[%s2592_s4 + $0x58] sm:$0xff]  ;;  %v433_v10 = vld [vmem:[%s2592_s4 + $0x68] sm:$0xff] }
   0xe   :  { %78 = vadd.xlane.f32.xlu1 %v59_v18  ;;  %313 = vmatprep.subr.bf16.mxu0 %v1629_v40 }
   0xf   :  { %76 = vadd.xlane.f32.xlu0 %v58_v19  ;;  %1603 = vmatprep.subr.bf16.mxu1 %v1629_v40 }
  0x11   :  { %314 = vmatpush1.bf16.msra.mxu0 %v1631_v41  ;;  %1611 = vmatpush1.bf16.msra.mxu1 %v1631_v41 }
  0x12   :  { %94 = vadd.xlane.f32.xlu1 %v67_v23  ;;  %315 = vmatprep.subr.bf16.mxu0 %v1632_v46 }
  0x13   :  { %92 = vadd.xlane.f32.xlu0 %v66_v24  ;;  %1604 = vmatprep.subr.bf16.mxu1 %v1632_v46 }
  0x15   :  { %316 = vmatpush1.bf16.msra.mxu0 %v1634_v47  ;;  %1612 = vmatpush1.bf16.msra.mxu1 %v1634_v47 }
  0x16   :  { %82 = vadd.xlane.f32.xlu1 %v61_v28  ;;  %317 = vmatprep.subr.bf16.mxu0 %v1635_v50 }
  0x17   :  { %80 = vadd.xlane.f32.xlu0 %v60_v29  ;;  %1605 = vmatprep.subr.bf16.mxu1 %v1635_v50 }
  0x19   :  { %318 = vmatpush1.bf16.msra.mxu0 %v1637_v51  ;;  %1613 = vmatpush1.bf16.msra.mxu1 %v1637_v51 }
  0x1a   :  { %98 = vadd.xlane.f32.xlu1 %v69_v35  ;;  %319 = vmatprep.subr.bf16.mxu0 %v1638_v52 }
  0x1b   :  { %96 = vadd.xlane.f32.xlu0 %v68_v36  ;;  %1606 = vmatprep.subr.bf16.mxu1 %v1638_v52 }
  0x1d   :  { %320 = vmatpush1.bf16.msra.mxu0 %v1640_v53  ;;  %1614 = vmatpush1.bf16.msra.mxu1 %v1640_v53 }
  0x1e   :  { %86 = vadd.xlane.f32.xlu1 %v63_v42  ;;  %321 = vmatprep.subr.bf16.mxu0 %v1641_v54 }
  0x1f   :  { %84 = vadd.xlane.f32.xlu0 %v62_v43  ;;  %1607 = vmatprep.subr.bf16.mxu1 %v1641_v54 }
  0x21   :  { %322 = vmatpush1.bf16.msra.mxu0 %v1643_v56  ;;  %1615 = vmatpush1.bf16.msra.mxu1 %v1643_v56  ;;  %v2011_v56 = vld [vmem:[%s2593_s1] ss:$0 sm:$0xff] }
  0x22   :  { %102 = vadd.xlane.f32.xlu1 %v71_v48 }
  0x23   :  { %100 = vadd.xlane.f32.xlu0 %v70_v49 }
  0x33   :  { %461 = vperm.xlu1 %1619, %v421_v57  }
  0x37   :  { %467 = vperm.xlu1 %1619, %v423_v59  }
  0x39   :  { %458 = vperm.xlu0 %1618, %v420_v58  }
  0x3b   :  { %470 = vperm.xlu1 %1619, %v424_v61  }
  0x3d   :  { %464 = vperm.xlu0 %1618, %v422_v60  }
  0x3f   :  { %473 = vperm.xlu1 %1619, %v425_v63  }
  0x41   :  { %482 = vperm.xlu0 %1618, %v428_v62  }
  0x43   :  { %476 = vperm.xlu1 %1619, %v426_v1  }
  0x45   :  { %488 = vperm.xlu0 %1618, %v430_v0  }
  0x47   :  { %479 = vperm.xlu1 %1619, %v427_v7  }
  0x49   :  { %494 = vperm.xlu0 %1618, %v432_v6  }
  0x4b   :  { %485 = vperm.xlu1 %1619, %v429_v8  }
  0x4f   :  { %491 = vperm.xlu1 %1619, %v431_v9  }
  0x53   :  { %497 = vperm.xlu1 %1619, %v433_v10  }
  0x93   :  { %v89_v11 = vpop.xlane.xlu1 %88 }
  0x94   :  { %v73_v12 = vpop.xlane.xlu0 %72  ;;  %v113_v13 = vmul.f32 0.0078125, %v89_v11 }
  0x95   :  { %v105_v14 = vmul.f32 0.0078125, %v73_v12 }
  0x96   :  { %v129_v17 = vadd.f32 1e-06, %v113_v13 }
  0x97   :  { %v121_v18 = vadd.f32 1e-06, %v105_v14  ;;  %v91_v19 = vpop.xlane.xlu1 %90 }
  0x98   :  { %v75_v22 = vpop.xlane.xlu0 %74  ;;  %1644 = vrsqrt.f32 %v129_v17  ;;  %v114_v23 = vmul.f32 0.0078125, %v91_v19 }
  0x99   :  { %v106_v24 = vmul.f32 0.0078125, %v75_v22  ;;  %1646 = vrsqrt.f32 %v121_v18 }
  0x9a   :  { %v130_v27 = vadd.f32 1e-06, %v114_v23 }
  0x9b   :  { %v122_v28 = vadd.f32 1e-06, %v106_v24  ;;  %v79_v29 = vpop.xlane.xlu1 %78 }
  0x9c   :  { %v77_v32 = vpop.xlane.xlu0 %76  ;;  %1648 = vrsqrt.f32 %v130_v27  ;;  %v108_v33 = vmul.f32 0.0078125, %v79_v29 }
  0x9d   :  { %v107_v34 = vmul.f32 0.0078125, %v77_v32  ;;  %1650 = vrsqrt.f32 %v122_v28 }
  0x9e   :  { %v124_v35 = vadd.f32 1e-06, %v108_v33 }
  0x9f   :  { %v123_v36 = vadd.f32 1e-06, %v107_v34  ;;  %v95_v39 = vpop.xlane.xlu1 %94 }
  0xa0   :  { %v93_v40 = vpop.xlane.xlu0 %92  ;;  %1652 = vrsqrt.f32 %v124_v35  ;;  %v116_v41 = vmul.f32 0.0078125, %v95_v39 }
  0xa1   :  { %v115_v42 = vmul.f32 0.0078125, %v93_v40  ;;  %1654 = vrsqrt.f32 %v123_v36 }
  0xa2   :  { %v1645_v43 = vpop.eup %1644  ;;  %v132_v46 = vadd.f32 1e-06, %v116_v41 }
  0xa3   :  { %v131_v47 = vadd.f32 1e-06, %v115_v42  ;;  %v1647_v48 = vpop.eup %1646  ;;  %v161_v49 = vmul.f32 %v1645_v43, %v1831_v2  ;;  %v83_v50 = vpop.xlane.xlu1 %82 }
  0xa4   :  { %v81_v51 = vpop.xlane.xlu0 %80  ;;  %1656 = vrsqrt.f32 %v132_v46  ;;  %v110_v52 = vmul.f32 0.0078125, %v83_v50  ;;  %v153_v57 = vmul.f32 %v1647_v48, %v1833_v3 }
  0xa5   :  { %v109_v53 = vmul.f32 0.0078125, %v81_v51  ;;  %1658 = vrsqrt.f32 %v131_v47  ;;  %v183_v2 = vmul.f32 %v2011_v56, %v161_v49 }
  0xa6   :  { %v1649_v54 = vpop.eup %1648  ;;  %v126_v58 = vadd.f32 1e-06, %v110_v52  ;;  %v175_v3 = vmul.f32 %v2011_v56, %v153_v57 }
  0xa7   :  { %v125_v59 = vadd.f32 1e-06, %v109_v53  ;;  %v1651_v60 = vpop.eup %1650  ;;  %v162_v61 = vmul.f32 %v1649_v54, %v1835_v4  ;;  %v99_v62 = vpop.xlane.xlu1 %98 }
  0xa8   :  { %v97_v63 = vpop.xlane.xlu0 %96  ;;  %v154_v0 = vmul.f32 %v1651_v60, %v1837_v5  ;;  %1660 = vrsqrt.f32 %v126_v58  ;;  %v118_v1 = vmul.f32 0.0078125, %v99_v62 }
  0xa9   :  { %v117_v6 = vmul.f32 0.0078125, %v97_v63  ;;  %v184_v7 = vmul.f32 %v2011_v56, %v162_v61  ;;  %1662 = vrsqrt.f32 %v125_v59 }
  0xaa   :  { %v1653_v8 = vpop.eup %1652  ;;  %v176_v9 = vmul.f32 %v2011_v56, %v154_v0  ;;  %v134_v10 = vadd.f32 1e-06, %v118_v1 }
  0xab   :  { %v133_v11 = vadd.f32 1e-06, %v117_v6  ;;  %v1655_v4 = vpop.eup %1654  ;;  %v195_v12 = vpack.c.bf16 %v184_v7, %v183_v2  ;;  %v156_v13 = vmul.f32 %v1653_v8, %v1862_v15  ;;  %v87_v14 = vpop.xlane.xlu1 %86  ;;  %v217_v8 = vlaneseq }
  0xac   :  { %v85_v17 = vpop.xlane.xlu0 %84  ;;  %v191_v5 = vpack.c.bf16 %v176_v9, %v175_v3  ;;  %1664 = vrsqrt.f32 %v134_v10  ;;  %v155_v18 = vmul.f32 %v1655_v4, %v1864_v16  ;;  %v112_v19 = vmul.f32 0.0078125, %v87_v14 }
  0xad   :  { %380 = vmatmul.mubr.bf16.vlgmr.msra.gmra.mrb[0].mxu1 %v195_v12  ;;  %1666 = vrsqrt.f32 %v133_v11  ;;  %v111_v22 = vmul.f32 0.0078125, %v85_v17  ;;  %v178_v27 = vmul.f32 %v2011_v56, %v156_v13  ;;  %v218_v3 = vshrl.u32 %v217_v8, 7 }
  0xae   :  { %v1657_v23 = vpop.eup %1656  ;;  %340 = vmatmul.mubr.bf16.vlgmr.msra.gmra.mrb[0].mxu0 %v191_v5  ;;  %389 = vmatprep.mubr.bf16.mxu1 %v1788_v55  ;;  %v177_v24 = vmul.f32 %v2011_v56, %v155_v18  ;;  %v128_v28 = vadd.f32 1e-06, %v112_v19 }
  0xaf   :  { %v1659_v15 = vpop.eup %1658  ;;  %v164_v29 = vmul.f32 %v1657_v23, %v1873_v20  ;;  %349 = vmatprep.mubr.bf16.mxu0 %v1788_v55  ;;  %v127_v32 = vadd.f32 1e-06, %v111_v22  ;;  %v103_v16 = vpop.xlane.xlu1 %102  ;;  %v219_v9 = vsub.s32 0, %v218_v3  ;;  %v223_v10 = vsub.s32 1, %v218_v3 }
  0xb0   :  { %v101_v33 = vpop.xlane.xlu0 %100  ;;  %v163_v34 = vmul.f32 %v1659_v15, %v1875_v21  ;;  %1668 = vrsqrt.f32 %v128_v28  ;;  %v120_v35 = vmul.f32 0.0078125, %v103_v16  ;;  %v192_v42 = vpack.c.bf16 %v178_v27, %v177_v24 }
  0xb1   :  { %v186_v36 = vmul.f32 %v2011_v56, %v164_v29  ;;  %1670 = vrsqrt.f32 %v127_v32  ;;  %v119_v39 = vmul.f32 0.0078125, %v101_v33 }
  0xb2   :  { %v1661_v40 = vpop.eup %1660  ;;  %v185_v41 = vmul.f32 %v2011_v56, %v163_v34  ;;  %v136_v43 = vadd.f32 1e-06, %v120_v35 }
  0xb3   :  { %v1663_v46 = vpop.eup %1662  ;;  %v135_v20 = vadd.f32 1e-06, %v119_v39  ;;  %v158_v47 = vmul.f32 %v1661_v40, %v1884_v25 }
  0xb4   :  { %v196_v48 = vpack.c.bf16 %v186_v36, %v185_v41  ;;  %1672 = vrsqrt.f32 %v136_v43  ;;  %v157_v49 = vmul.f32 %v1663_v46, %v1886_v26 }
  0xb5   :  { %1674 = vrsqrt.f32 %v135_v20  ;;  %v180_v51 = vmul.f32 %v2011_v56, %v158_v47 }
  0xb6   :  { %v1665_v21 = vpop.eup %1664  ;;  %390 = vmatmul.mubr.bf16.gmra.mrb[4].mxu1 %v196_v48  ;;  %350 = vmatmul.mubr.bf16.gmra.mrb[4].mxu0 %v192_v42  ;;  %v179_v50 = vmul.f32 %v2011_v56, %v157_v49 }
  0xb7   :  { %v1667_v52 = vpop.eup %1666  ;;  %359 = vmatprep.mubr.bf16.mxu0 %v1788_v55  ;;  %399 = vmatprep.mubr.bf16.mxu1 %v1788_v55  ;;  %v166_v53 = vmul.f32 %v1665_v21, %v1895_v30 }
  0xb8   :  { %v165_v25 = vmul.f32 %v1667_v52, %v1897_v31  ;;  %v193_v57 = vpack.c.bf16 %v180_v51, %v179_v50 }
  0xb9   :  { %v188_v54 = vmul.f32 %v2011_v56, %v166_v53 }
  0xba   :  { %v1669_v26 = vpop.eup %1668  ;;  %v187_v58 = vmul.f32 %v2011_v56, %v165_v25 }
  0xbb   :  { %v1671_v59 = vpop.eup %1670  ;;  %v160_v60 = vmul.f32 %v1669_v26, %v1912_v37 }
  0xbc   :  { %v197_v61 = vpack.c.bf16 %v188_v54, %v187_v58  ;;  %v159_v2 = vmul.f32 %v1671_v59, %v1914_v38 }
  0xbd   :  { %v182_v30 = vmul.f32 %v2011_v56, %v160_v60 }
  0xbe   :  { %v1673_v62 = vpop.eup %1672  ;;  %360 = vmatmul.mubr.bf16.gmra.mrb[8].mxu0 %v193_v57  ;;  %400 = vmatmul.mubr.bf16.gmra.mrb[8].mxu1 %v197_v61  ;;  %v181_v63 = vmul.f32 %v2011_v56, %v159_v2 }
  0xbf   :  { %v1675_v31 = vpop.eup %1674  ;;  %369 = vmatprep.mubr.bf16.mxu0 %v1788_v55  ;;  %409 = vmatprep.mubr.bf16.mxu1 %v1788_v55  ;;  %v168_v0 = vmul.f32 %v1673_v62, %v1929_v44  ;;  %v215_v55 = vld [vmem:[%s2594_s3] sm:$0x3] }
  0xc0   :  { %v167_v1 = vmul.f32 %v1675_v31, %v1931_v45  ;;  %v194_v6 = vpack.c.bf16 %v182_v30, %v181_v63  ;;  %v2054_v44 = vrot.slane %v215_v55, %v219_v9  ;;  %v2056_v45 = vrot.slane %v215_v55, %v223_v10 }
  0xc1   :  { %v190_v37 = vmul.f32 %v2011_v56, %v168_v0 }
  0xc2   :  { %v189_v38 = vmul.f32 %v2011_v56, %v167_v1 }
  0xc4   :  { %v198_v7 = vpack.c.bf16 %v190_v37, %v189_v38 }
  0xc6   :  { %370 = vmatmul.mubr.bf16.gmra.mrb[12].mxu0 %v194_v6  ;;  %410 = vmatmul.mubr.bf16.gmra.mrb[12].mxu1 %v198_v7 }
 0x180   :  { %v381_v11 = vpop.f32.mrb[0].mxu1 }
 0x181   :  { %v341_v4 = vpop.f32.mrb[0].mxu0  ;;  %v383_v12 = vpop.f32.mrb[1].mxu1  ;;  %v2065_v22 = vadd.f32 %v381_v11, %v2054_v44 }
 0x182   :  { %v2059_v56 = vadd.f32 %v341_v4, %v2054_v44  ;;  %v343_v13 = vpop.f32.mrb[1].mxu0  ;;  %v385_v14 = vpop.f32.mrb[2].mxu1  ;;  %v2068_v23 = vadd.f32 %v383_v12, %v2056_v45  ;;  %v434_v4 = vld [vmem:[%s2592_s4 + $0x70] sm:$0xff] }
 0x183   :  { %v2062_v17 = vadd.f32 %v343_v13, %v2056_v45  ;;  %v345_v5 = vpop.f32.mrb[2].mxu0  ;;  %v387_v18 = vpop.f32.mrb[3].mxu1  ;;  %v2084_v41 = vadd.f32 %v385_v14, %v2054_v44 }
 0x184   :  { %v347_v19 = vpop.f32.mrb[3].mxu0  ;;  %v2073_v27 = vadd.f32 %v345_v5, %v2054_v44  ;;  %v641_v29 = vmax.f32 %v2065_v22, %v2068_v23  ;;  %v2087_v42 = vadd.f32 %v387_v18, %v2056_v45 }
 0x185   :  { %v617_v24 = vmax.f32 %v2059_v56, %v2062_v17  ;;  %v2076_v28 = vadd.f32 %v347_v19, %v2056_v45  ;;  %v462_v19 = vpop.permute.xlu1 %461 }
 0x186   :  { %v644_v49 = vmax.f32 %v2084_v41, %v2087_v42 }
 0x187   :  { %618 = vmax.xlane.f32.xlu1 %v617_v24  ;;  %v620_v46 = vmax.f32 %v2073_v27, %v2076_v28 }
 0x189   :  { %v391_v15 = vpop.f32.mrb[4].mxu1  ;;  %v351_v32 = vpop.f32.mrb[4].mxu0 }
 0x18a   :  { %v393_v16 = vpop.f32.mrb[5].mxu1  ;;  %v353_v33 = vpop.f32.mrb[5].mxu0  ;;  %v2095_v20 = vadd.f32 %v351_v32, %v2054_v44  ;;  %v2105_v53 = vadd.f32 %v391_v15, %v2054_v44 }
 0x18b   :  { %642 = vmax.xlane.f32.xlu1 %v641_v29  ;;  %v395_v34 = vpop.f32.mrb[6].mxu1  ;;  %v355_v35 = vpop.f32.mrb[6].mxu0  ;;  %v2098_v47 = vadd.f32 %v353_v33, %v2056_v45  ;;  %v2108_v25 = vadd.f32 %v393_v16, %v2056_v45 }
 0x18c   :  { %v2081_v36 = vadd.f32 %v395_v34, %v2054_v44  ;;  %v397_v39 = vpop.f32.mrb[7].mxu1  ;;  %v357_v40 = vpop.f32.mrb[7].mxu0  ;;  %v2115_v61 = vadd.f32 %v355_v35, %v2054_v44 }
 0x18d   :  { %v2090_v43 = vadd.f32 %v397_v39, %v2056_v45  ;;  %v623_v54 = vmax.f32 %v2095_v20, %v2098_v47  ;;  %v647_v60 = vmax.f32 %v2105_v53, %v2108_v25  ;;  %v2118_v2 = vadd.f32 %v357_v40, %v2056_v45  ;;  %v468_v34 = vpop.permute.xlu1 %467 }
 0x18f   :  { %621 = vmax.xlane.f32.xlu1 %v620_v46  ;;  %v650_v48 = vmax.f32 %v2081_v36, %v2090_v43  ;;  %v626_v3 = vmax.f32 %v2115_v61, %v2118_v2 }
 0x191   :  { %651 = vmax.xlane.f32.xlu0 %v650_v48  ;;  %v361_v21 = vpop.f32.mrb[8].mxu0  ;;  %v401_v50 = vpop.f32.mrb[8].mxu1  ;;  %v2180_v48 = vand.u32 127, %v217_v8 }
 0x192   :  { %v363_v51 = vpop.f32.mrb[9].mxu0  ;;  %v403_v52 = vpop.f32.mrb[9].mxu1  ;;  %v2121_v0 = vadd.f32 %v361_v21, %v2054_v44  ;;  %v2129_v9 = vadd.f32 %v401_v50, %v2054_v44 }
 0x193   :  { %645 = vmax.xlane.f32.xlu1 %v644_v49  ;;  %v365_v26 = vpop.f32.mrb[10].mxu0  ;;  %v405_v57 = vpop.f32.mrb[10].mxu1  ;;  %v2124_v1 = vadd.f32 %v363_v51, %v2056_v45  ;;  %v2132_v55 = vadd.f32 %v403_v52, %v2056_v45  ;;  %v2191_v51 = vadd.s32 128, %v2180_v48  ;;  %vm507_vm0 = vcmp.eq.s32.totalorder %v2180_v48, %v462_v19 }
 0x194   :  { %v367_v58 = vpop.f32.mrb[11].mxu0  ;;  %v407_v59 = vpop.f32.mrb[11].mxu1  ;;  %v2142_v12 = vadd.f32 %v365_v26, %v2054_v44  ;;  %v2148_v14 = vadd.f32 %v405_v57, %v2054_v44  ;;  %v539_v8 = vsel %vm507_vm0, %v2073_v27, 0.0  ;;  %vm511_vm2 = vcmp.eq.s32.totalorder %v2180_v48, %v468_v34 }
 0x195   :  { %v629_v10 = vmax.f32 %v2121_v0, %v2124_v1  ;;  %v653_v11 = vmax.f32 %v2129_v9, %v2132_v55  ;;  %v2145_v13 = vadd.f32 %v367_v58, %v2056_v45  ;;  %v2151_v5 = vadd.f32 %v407_v59, %v2056_v45  ;;  %v471_v46 = vpop.permute.xlu1 %470 }
 0x196   :  { %vm508_vm1 = vcmp.eq.s32.totalorder %v2191_v51, %v462_v19  ;;  %vm512_vm3 = vcmp.eq.s32.totalorder %v2191_v51, %v468_v34  ;;  %v543_v57 = vsel %vm511_vm2, %v2115_v61, 0.0  ;;  %vm513_vm12 = vcmp.eq.s32.totalorder %v2180_v48, %v471_v46 }
 0x197   :  { %624 = vmax.xlane.f32.xlu1 %v623_v54  ;;  %v632_v18 = vmax.f32 %v2142_v12, %v2145_v13  ;;  %v656_v29 = vmax.f32 %v2148_v14, %v2151_v5  ;;  %v544_v58 = vsel %vm512_vm3, %v2118_v2, 0.0  ;;  %vm514_vm13 = vcmp.eq.s32.totalorder %v2191_v51, %v471_v46 }
 0x198   :  { %v578_v59 = vadd.f32 %v544_v58, %v543_v57  ;;  %v546_v34 = vsel %vm514_vm13, %v2124_v1, 0.0  ;;  %vm671_vm0 = vcmask 7168  }
 0x199   :  { %v371_v62 = vpop.f32.mrb[12].mxu0  ;;  %v411_v63 = vpop.f32.mrb[12].mxu1 }
 0x19a   :  { %v373_v30 = vpop.f32.mrb[13].mxu0  ;;  %v413_v31 = vpop.f32.mrb[13].mxu1  ;;  %v2156_v24 = vadd.f32 %v371_v62, %v2054_v44  ;;  %v2164_v32 = vadd.f32 %v411_v63, %v2054_v44 }
 0x19b   :  { %648 = vmax.xlane.f32.xlu1 %v647_v60  ;;  %v375_v37 = vpop.f32.mrb[14].mxu0  ;;  %v415_v6 = vpop.f32.mrb[14].mxu1  ;;  %v2159_v15 = vadd.f32 %v373_v30, %v2056_v45  ;;  %v2167_v16 = vadd.f32 %v413_v31, %v2056_v45  ;;  %v435_v31 = vld [vmem:[%s2592_s4 + $0x78] sm:$0xff] }
 0x19c   :  { %v377_v38 = vpop.f32.mrb[15].mxu0  ;;  %v417_v7 = vpop.f32.mrb[15].mxu1  ;;  %v2174_v39 = vadd.f32 %v375_v37, %v2054_v44  ;;  %v2183_v49 = vadd.f32 %v415_v6, %v2054_v44  ;;  %v540_v44 = vsel %vm508_vm1, %v2076_v28, 0.0 }
 0x19d   :  { %v635_v33 = vmax.f32 %v2156_v24, %v2159_v15  ;;  %v659_v35 = vmax.f32 %v2164_v32, %v2167_v16  ;;  %v2177_v40 = vadd.f32 %v377_v38, %v2056_v45  ;;  %v2186_v21 = vadd.f32 %v417_v7, %v2056_v45  ;;  %v474_v52 = vpop.permute.xlu1 %473  ;;  %v459_v7 = vpop.permute.xlu0 %458 }
 0x19e   :  { %v572_v26 = vadd.f32 %v540_v44, %v539_v8  ;;  %vm515_vm4 = vcmp.eq.s32.totalorder %v2180_v48, %v474_v52  ;;  %vm516_vm5 = vcmp.eq.s32.totalorder %v2191_v51, %v474_v52  ;;  %vm505_vm8 = vcmp.eq.s32.totalorder %v2180_v48, %v459_v7 }
 0x19f   :  { %627 = vmax.xlane.f32.xlu1 %v626_v3  ;;  %v638_v50 = vmax.f32 %v2174_v39, %v2177_v40  ;;  %v662_v54 = vmax.f32 %v2183_v49, %v2186_v21  ;;  %v547_v62 = vsel %vm515_vm4, %v2142_v12, 0.0  ;;  %v548_v63 = vsel %vm516_vm5, %v2145_v13, 0.0 }
 0x1a0   :  { %v584_v30 = vadd.f32 %v548_v63, %v547_v62  ;;  %vm506_vm9 = vcmp.eq.s32.totalorder %v2191_v51, %v459_v7 }
 0x1a1   :  { %v477_v45 = vpop.permute.xlu1 %476  ;;  %v465_v3 = vpop.permute.xlu0 %464 }
 0x1a2   :  { %vm509_vm10 = vcmp.eq.s32.totalorder %v2180_v48, %v465_v3  ;;  %vm510_vm11 = vcmp.eq.s32.totalorder %v2191_v51, %v465_v3  ;;  %vm517_vm14 = vcmp.eq.s32.totalorder %v2180_v48, %v477_v45  ;;  %vm518_vm15 = vcmp.eq.s32.totalorder %v2191_v51, %v477_v45 }
 0x1a3   :  { %630 = vmax.xlane.f32.xlu1 %v629_v10  ;;  %v537_v10 = vsel %vm505_vm8, %v2059_v56, 0.0  ;;  %v542_v19 = vsel %vm510_vm11, %v2098_v47, 0.0  ;;  %v550_v52 = vsel %vm518_vm15, %v2159_v15, 0.0 }
 0x1a5   :  { %v480_v60 = vpop.permute.xlu1 %479 }
 0x1a6   :  { %vm519_vm6 = vcmp.eq.s32.totalorder %v2180_v48, %v480_v60  ;;  %vm520_vm7 = vcmp.eq.s32.totalorder %v2191_v51, %v480_v60 }
 0x1a7   :  { %500 = vperm.xlu0 %1618, %v434_v4   ;;  %654 = vmax.xlane.f32.xlu1 %v653_v11  ;;  %v551_v37 = vsel %vm519_vm6, %v2174_v39, 0.0  ;;  %v552_v6 = vsel %vm520_vm7, %v2177_v40, 0.0  ;;  %v538_v11 = vsel %vm506_vm9, %v2062_v17, 0.0 }
 0x1a8   :  { %v590_v38 = vadd.f32 %v552_v6, %v551_v37  ;;  %v569_v4 = vadd.f32 %v538_v11, %v537_v10 }
 0x1a9   :  { %v2230_v46 = vpop.permute.xlu1 %485 }
 0x1aa   :  { %vm523_vm5 = vcmp.eq.s32.totalorder %v2180_v48, %v2230_v46  ;;  %vm524_vm6 = vcmp.eq.s32.totalorder %v2191_v51, %v2230_v46 }
 0x1ab   :  { %633 = vmax.xlane.f32.xlu1 %v632_v18  ;;  %v541_v18 = vsel %vm509_vm10, %v2095_v20, 0.0 }
 0x1ad   :  { %v2232_v8 = vpop.permute.xlu1 %491 }
 0x1ae   :  { %vm527_vm9 = vcmp.eq.s32.totalorder %v2180_v48, %v2232_v8  ;;  %vm528_vm10 = vcmp.eq.s32.totalorder %v2191_v51, %v2232_v8 }
 0x1af   :  { %657 = vmax.xlane.f32.xlu1 %v656_v29  ;;  %v575_v29 = vadd.f32 %v542_v19, %v541_v18 }
 0x1b1   :  { %v2234_v44 = vpop.permute.xlu1 %497 }
 0x1b2   :  { %vm531_vm13 = vcmp.eq.s32.totalorder %v2180_v48, %v2234_v44 }
 0x1b3   :  { %636 = vmax.xlane.f32.xlu1 %v635_v33  ;;  %v545_v33 = vsel %vm513_vm12, %v2121_v0, 0.0  ;;  %v563_v8 = vsel %vm531_vm13, %v2148_v14, 0.0 }
 0x1b7   :  { %660 = vmax.xlane.f32.xlu1 %v659_v35  ;;  %v581_v35 = vadd.f32 %v546_v34, %v545_v33 }
 0x1bb   :  { %639 = vmax.xlane.f32.xlu1 %v638_v50  ;;  %v549_v50 = vsel %vm517_vm14, %v2156_v24, 0.0  ;;  %vm532_vm14 = vcmp.eq.s32.totalorder %v2191_v51, %v2234_v44 }
 0x1bf   :  { %663 = vmax.xlane.f32.xlu1 %v662_v54  ;;  %v587_v54 = vadd.f32 %v550_v52, %v549_v50 }
 0x1c6   :  { %573 = vadd.xlane.f32.xlu0 %v572_v26  ;;  %v2236_v26 = vpop.permute.xlu0 %482 }
 0x1c7   :  { %vm521_vm1 = vcmp.eq.s32.totalorder %v2180_v48, %v2236_v26  ;;  %vm522_vm2 = vcmp.eq.s32.totalorder %v2191_v51, %v2236_v26 }
 0x1ca   :  { %579 = vadd.xlane.f32.xlu0 %v578_v59  ;;  %v2241_v59 = vpop.permute.xlu0 %488 }
 0x1cb   :  { %vm525_vm3 = vcmp.eq.s32.totalorder %v2180_v48, %v2241_v59  ;;  %vm526_vm4 = vcmp.eq.s32.totalorder %v2191_v51, %v2241_v59 }
 0x1ce   :  { %585 = vadd.xlane.f32.xlu0 %v584_v30  ;;  %v2246_v37 = vpop.permute.xlu0 %494 }
 0x1cf   :  { %vm529_vm7 = vcmp.eq.s32.totalorder %v2180_v48, %v2246_v37  ;;  %vm530_vm8 = vcmp.eq.s32.totalorder %v2191_v51, %v2246_v37  ;;  %v555_v37 = vsel %vm523_vm5, %v2084_v41, 0.0 }
 0x1d0   :  { %503 = vperm.xlu1 %1619, %v435_v31  }
 0x1d2   :  { %591 = vadd.xlane.f32.xlu0 %v590_v38 }
 0x1f4   :  { %570 = vadd.xlane.f32.xlu1 %v569_v4 }
 0x1f8   :  { %576 = vadd.xlane.f32.xlu1 %v575_v29 }
 0x1fc   :  { %582 = vadd.xlane.f32.xlu1 %v581_v35 }
 0x200   :  { %588 = vadd.xlane.f32.xlu1 %v587_v54 }
 0x214   :  { %v619_v57 = vpop.xlane.xlu1 %618 }
 0x215   :  { %672 = vst.msk [vmem:[#allocation2] sm:$0xff] %vm671_vm0, %v619_v57  ;;  %v688_v45 = vsub.f32 %v2059_v56, %v619_v57  ;;  %v689_v58 = vsub.f32 %v2062_v17, %v619_v57 }
 0x217   :  { %v720_v60 = vmul.f32 1.442695, %v688_v45  ;;  %v722_v62 = vmul.f32 1.442695, %v689_v58 }
 0x218   :  { %v643_v63 = vpop.xlane.xlu1 %642 }
 0x219   :  { %1676 = vpow2.f32 %v720_v60  ;;  %680 = vst.msk [vmem:[#allocation2 + $0x40] sm:$0xff] %vm671_vm0, %v643_v63  ;;  %v704_v30 = vsub.f32 %v2065_v22, %v643_v63  ;;  %v705_v31 = vsub.f32 %v2068_v23, %v643_v63 }
 0x21a   :  { %1678 = vpow2.f32 %v722_v62 }
 0x21b   :  { %v752_v6 = vmul.f32 1.442695, %v704_v30  ;;  %v754_v38 = vmul.f32 1.442695, %v705_v31 }
 0x21c   :  { %v622_v56 = vpop.xlane.xlu1 %621 }
 0x21d   :  { %1680 = vpow2.f32 %v752_v6  ;;  %673 = vst.msk [vmem:[#allocation2 + $0x8] sm:$0xff] %vm671_vm0, %v622_v56  ;;  %v690_v17 = vsub.f32 %v2073_v27, %v622_v56  ;;  %v691_v7 = vsub.f32 %v2076_v28, %v622_v56 }
 0x21e   :  { %1682 = vpow2.f32 %v754_v38  ;;  %v652_v3 = vpop.xlane.xlu0 %651 }
 0x21f   :  { %v724_v10 = vmul.f32 1.442695, %v690_v17  ;;  %v726_v11 = vmul.f32 1.442695, %v691_v7  ;;  %683 = vst.msk [vmem:[#allocation2 + $0x58] sm:$0xff] %vm671_vm0, %v652_v3  ;;  %v710_v60 = vsub.f32 %v2081_v36, %v652_v3  ;;  %v711_v31 = vsub.f32 %v2090_v43, %v652_v3 }
 0x220   :  { %v646_v4 = vpop.xlane.xlu1 %645 }
 0x221   :  { %1684 = vpow2.f32 %v724_v10  ;;  %681 = vst.msk [vmem:[#allocation2 + $0x48] sm:$0xff] %vm671_vm0, %v646_v4  ;;  %v706_v18 = vsub.f32 %v2084_v41, %v646_v4  ;;  %v707_v19 = vsub.f32 %v2087_v42, %v646_v4  ;;  %v764_v17 = vmul.f32 1.442695, %v710_v60 }
 0x222   :  { %1686 = vpow2.f32 %v726_v11  ;;  %v559_v41 = vsel %vm527_vm9, %v2081_v36, 0.0  ;;  %v564_v36 = vsel %vm532_vm14, %v2151_v5, 0.0 }
 0x223   :  { %v1677_v29 = vpop.eup %1676  ;;  %v756_v33 = vmul.f32 1.442695, %v706_v18  ;;  %v758_v34 = vmul.f32 1.442695, %v707_v19  ;;  %v766_v19 = vmul.f32 1.442695, %v711_v31 }
 0x224   :  { %v1679_v27 = vpop.eup %1678  ;;  %v625_v28 = vpop.xlane.xlu1 %624 }
 0x225   :  { %1688 = vpow2.f32 %v756_v33  ;;  %674 = vst.msk [vmem:[#allocation2 + $0x10] sm:$0xff] %vm671_vm0, %v625_v28  ;;  %v692_v35 = vsub.f32 %v2095_v20, %v625_v28  ;;  %v693_v50 = vsub.f32 %v2098_v47, %v625_v28  ;;  %v784_v52 = vadd.f32 %v1679_v27, %v1677_v29 }
 0x226   :  { %1690 = vpow2.f32 %v758_v34 }
 0x227   :  { %v1681_v54 = vpop.eup %1680  ;;  %v728_v57 = vmul.f32 1.442695, %v692_v35  ;;  %v730_v45 = vmul.f32 1.442695, %v693_v50  ;;  %785 = vadd.xlane.f32.xlu0 %v784_v52 }
 0x228   :  { %v1683_v58 = vpop.eup %1682  ;;  %v649_v62 = vpop.xlane.xlu1 %648 }
 0x229   :  { %1692 = vpow2.f32 %v728_v57  ;;  %682 = vst.msk [vmem:[#allocation2 + $0x50] sm:$0xff] %vm671_vm0, %v649_v62  ;;  %v708_v63 = vsub.f32 %v2105_v53, %v649_v62  ;;  %v709_v30 = vsub.f32 %v2108_v25, %v649_v62  ;;  %v808_v20 = vadd.f32 %v1683_v58, %v1681_v54 }
 0x22a   :  { %1694 = vpow2.f32 %v730_v45 }
 0x22b   :  { %v1685_v47 = vpop.eup %1684  ;;  %v760_v6 = vmul.f32 1.442695, %v708_v63  ;;  %v762_v38 = vmul.f32 1.442695, %v709_v30  ;;  %809 = vadd.xlane.f32.xlu1 %v808_v20 }
 0x22c   :  { %v1687_v56 = vpop.eup %1686  ;;  %v628_v7 = vpop.xlane.xlu1 %627 }
 0x22d   :  { %1696 = vpow2.f32 %v760_v6  ;;  %675 = vst.msk [vmem:[#allocation2 + $0x18] sm:$0xff] %vm671_vm0, %v628_v7  ;;  %v694_v10 = vsub.f32 %v2115_v61, %v628_v7  ;;  %v695_v11 = vsub.f32 %v2118_v2, %v628_v7  ;;  %v787_v4 = vadd.f32 %v1687_v56, %v1685_v47 }
 0x22e   :  { %1698 = vpow2.f32 %v762_v38 }
 0x22f   :  { %v1689_v18 = vpop.eup %1688  ;;  %v732_v29 = vmul.f32 1.442695, %v694_v10  ;;  %v734_v33 = vmul.f32 1.442695, %v695_v11  ;;  %788 = vadd.xlane.f32.xlu1 %v787_v4  ;;  %1700 = vpow2.f32 %v764_v17 }
 0x230   :  { %v1691_v3 = vpop.eup %1690  ;;  %v631_v27 = vpop.xlane.xlu1 %630 }
 0x231   :  { %1702 = vpow2.f32 %v732_v29  ;;  %676 = vst.msk [vmem:[#allocation2 + $0x20] sm:$0xff] %vm671_vm0, %v631_v27  ;;  %v696_v34 = vsub.f32 %v2121_v0, %v631_v27  ;;  %v697_v28 = vsub.f32 %v2124_v1, %v631_v27  ;;  %v811_v61 = vadd.f32 %v1691_v3, %v1689_v18 }
 0x232   :  { %1704 = vpow2.f32 %v734_v33 }
 0x233   :  { %v1693_v2 = vpop.eup %1692  ;;  %1706 = vpow2.f32 %v766_v19  ;;  %v736_v35 = vmul.f32 1.442695, %v696_v34  ;;  %v738_v50 = vmul.f32 1.442695, %v697_v28  ;;  %812 = vadd.xlane.f32.xlu0 %v811_v61 }
 0x234   :  { %v1695_v52 = vpop.eup %1694  ;;  %v655_v54 = vpop.xlane.xlu1 %654 }
 0x235   :  { %1708 = vpow2.f32 %v736_v35  ;;  %684 = vst.msk [vmem:[#allocation2 + $0x60] sm:$0xff] %vm671_vm0, %v655_v54  ;;  %v712_v57 = vsub.f32 %v2129_v9, %v655_v54  ;;  %v713_v45 = vsub.f32 %v2132_v55, %v655_v54  ;;  %v790_v58 = vadd.f32 %v1695_v52, %v1693_v2 }
 0x236   :  { %1710 = vpow2.f32 %v738_v50 }
 0x237   :  { %v1697_v0 = vpop.eup %1696  ;;  %v768_v1 = vmul.f32 1.442695, %v712_v57  ;;  %v770_v60 = vmul.f32 1.442695, %v713_v45  ;;  %791 = vadd.xlane.f32.xlu0 %v790_v58 }
 0x238   :  { %v1699_v62 = vpop.eup %1698  ;;  %v634_v63 = vpop.xlane.xlu1 %633 }
 0x239   :  { %1712 = vpow2.f32 %v768_v1  ;;  %677 = vst.msk [vmem:[#allocation2 + $0x28] sm:$0xff] %vm671_vm0, %v634_v63  ;;  %v698_v30 = vsub.f32 %v2142_v12, %v634_v63  ;;  %v699_v20 = vsub.f32 %v2145_v13, %v634_v63  ;;  %v814_v47 = vadd.f32 %v1699_v62, %v1697_v0  ;;  %v1701_v31 = vpop.eup %1700 }
 0x23a   :  { %1714 = vpow2.f32 %v770_v60 }
 0x23b   :  { %v1703_v6 = vpop.eup %1702  ;;  %v740_v38 = vmul.f32 1.442695, %v698_v30  ;;  %v742_v56 = vmul.f32 1.442695, %v699_v20  ;;  %815 = vadd.xlane.f32.xlu1 %v814_v47 }
 0x23c   :  { %v1705_v17 = vpop.eup %1704  ;;  %v658_v7 = vpop.xlane.xlu1 %657 }
 0x23d   :  { %v1707_v10 = vpop.eup %1706  ;;  %1716 = vpow2.f32 %v740_v38  ;;  %685 = vst.msk [vmem:[#allocation2 + $0x68] sm:$0xff] %vm671_vm0, %v658_v7  ;;  %v714_v11 = vsub.f32 %v2148_v14, %v658_v7  ;;  %v715_v4 = vsub.f32 %v2151_v5, %v658_v7  ;;  %v793_v12 = vadd.f32 %v1705_v17, %v1703_v6  ;;  %v501_v7 = vpop.permute.xlu0 %500 }
 0x23e   :  { %1718 = vpow2.f32 %v742_v56  ;;  %v817_v3 = vadd.f32 %v1707_v10, %v1701_v31  ;;  %vm533_vm11 = vcmp.eq.s32.totalorder %v2180_v48, %v501_v7  ;;  %vm534_vm12 = vcmp.eq.s32.totalorder %v2191_v51, %v501_v7 }
 0x23f   :  { %v1709_v13 = vpop.eup %1708  ;;  %v772_v18 = vmul.f32 1.442695, %v714_v11  ;;  %v774_v19 = vmul.f32 1.442695, %v715_v4  ;;  %794 = vadd.xlane.f32.xlu0 %v793_v12  ;;  %v565_v46 = vsel %vm533_vm11, %v2164_v32, 0.0 }
 0x240   :  { %v1711_v29 = vpop.eup %1710  ;;  %v637_v33 = vpop.xlane.xlu1 %636 }
 0x241   :  { %1720 = vpow2.f32 %v772_v18  ;;  %678 = vst.msk [vmem:[#allocation2 + $0x30] sm:$0xff] %vm671_vm0, %v637_v33  ;;  %v700_v27 = vsub.f32 %v2156_v24, %v637_v33  ;;  %v701_v34 = vsub.f32 %v2159_v15, %v637_v33  ;;  %v796_v28 = vadd.f32 %v1711_v29, %v1709_v13 }
 0x242   :  { %1722 = vpow2.f32 %v774_v19  ;;  %v553_v29 = vsel %vm521_vm1, %v2065_v22, 0.0  ;;  %v554_v33 = vsel %vm522_vm2, %v2068_v23, 0.0  ;;  %v557_v22 = vsel %vm525_vm3, %v2105_v53, 0.0 }
 0x243   :  { %v1713_v61 = vpop.eup %1712  ;;  %v744_v2 = vmul.f32 1.442695, %v700_v27  ;;  %v746_v35 = vmul.f32 1.442695, %v701_v34  ;;  %797 = vadd.xlane.f32.xlu1 %v796_v28  ;;  %818 = vadd.xlane.f32.xlu0 %v817_v3  ;;  %v593_v34 = vadd.f32 %v554_v33, %v553_v29  ;;  %v558_v23 = vsel %vm526_vm4, %v2108_v25, 0.0  ;;  %v1773_v33 = vld [vmem:[%s2592_s4 + $0x8] sm:$0xff] }
 0x244   :  { %v1715_v50 = vpop.eup %1714  ;;  %v661_v52 = vpop.xlane.xlu1 %660  ;;  %v599_v53 = vadd.f32 %v558_v23, %v557_v22  ;;  %vm1391_vm3 = vcmp.ne.s32.totalorder %v1773_v33, 4294967196 }
 0x245   :  { %1724 = vpow2.f32 %v744_v2  ;;  %686 = vst.msk [vmem:[#allocation2 + $0x70] sm:$0xff] %vm671_vm0, %v661_v52  ;;  %v716_v54 = vsub.f32 %v2164_v32, %v661_v52  ;;  %v717_v57 = vsub.f32 %v2167_v16, %v661_v52  ;;  %v820_v45 = vadd.f32 %v1715_v50, %v1713_v61 }
 0x246   :  { %1726 = vpow2.f32 %v746_v35  ;;  %v561_v35 = vsel %vm529_vm7, %v2129_v9, 0.0  ;;  %v562_v50 = vsel %vm530_vm8, %v2132_v55, 0.0  ;;  %v556_v52 = vsel %vm524_vm6, %v2087_v42, 0.0 }
 0x247   :  { %v1717_v24 = vpop.eup %1716  ;;  %v776_v15 = vmul.f32 1.442695, %v716_v54  ;;  %v778_v58 = vmul.f32 1.442695, %v717_v57  ;;  %821 = vadd.xlane.f32.xlu1 %v820_v45  ;;  %v605_v9 = vadd.f32 %v562_v50, %v561_v35  ;;  %v596_v55 = vadd.f32 %v556_v52, %v555_v37  ;;  %v1318_v50 = vld [vmem:[#allocation2 + $0x48] sm:$0xff] }
 0x248   :  { %v1719_v0 = vpop.eup %1718  ;;  %v640_v1 = vpop.xlane.xlu1 %639  ;;  %v560_v42 = vsel %vm528_vm10, %v2090_v43, 0.0  ;;  %v566_v57 = vsel %vm534_vm12, %v2167_v16, 0.0  ;;  %v608_v43 = vadd.f32 %v564_v36, %v563_v8 }
 0x249   :  { %1728 = vpow2.f32 %v776_v15  ;;  %679 = vst.msk [vmem:[#allocation2 + $0x38] sm:$0xff] %vm671_vm0, %v640_v1  ;;  %v702_v60 = vsub.f32 %v2174_v39, %v640_v1  ;;  %v703_v62 = vsub.f32 %v2177_v40, %v640_v1  ;;  %v799_v63 = vadd.f32 %v1719_v0, %v1717_v24 }
 0x24a   :  { %1730 = vpow2.f32 %v778_v58  ;;  %v602_v24 = vadd.f32 %v560_v42, %v559_v41  ;;  %v611_v15 = vadd.f32 %v566_v57, %v565_v46  ;;  %v1311_v57 = vld [vmem:[#allocation2 + $0x10] sm:$0xff] }
 0x24b   :  { %v1721_v30 = vpop.eup %1720  ;;  %v748_v20 = vmul.f32 1.442695, %v702_v60  ;;  %v750_v47 = vmul.f32 1.442695, %v703_v62  ;;  %800 = vadd.xlane.f32.xlu0 %v799_v63 }
 0x24c   :  { %v1723_v31 = vpop.eup %1722  ;;  %v664_v6 = vpop.xlane.xlu1 %663 }
 0x24d   :  { %1732 = vpow2.f32 %v748_v20  ;;  %687 = vst.msk [vmem:[#allocation2 + $0x78] sm:$0xff] %vm671_vm0, %v664_v6  ;;  %v718_v38 = vsub.f32 %v2183_v49, %v664_v6  ;;  %v719_v56 = vsub.f32 %v2186_v21, %v664_v6  ;;  %v823_v17 = vadd.f32 %v1723_v31, %v1721_v30  ;;  %v1772_v20 = vld [vmem:[%s2592_s4] sm:$0xff] }
 0x24e   :  { %1734 = vpow2.f32 %v750_v47  ;;  %vm1390_vm2 = vcmp.ne.s32.totalorder %v1772_v20, 4294967196  ;;  %v1776_v20 = vld [vmem:[%s2592_s4 + $0x20] sm:$0xff] }
 0x24f   :  { %v1725_v39 = vpop.eup %1724  ;;  %v780_v40 = vmul.f32 1.442695, %v718_v38  ;;  %v782_v10 = vmul.f32 1.442695, %v719_v56  ;;  %824 = vadd.xlane.f32.xlu0 %v823_v17  ;;  %v1309_v38 = vld [vmem:[#allocation2] sm:$0xff]  ;;  %vm1394_vm6 = vcmp.ne.s32.totalorder %v1776_v20, 4294967196 }
 0x250   :  { %v1727_v11 = vpop.eup %1726  ;;  %v504_v45 = vpop.permute.xlu1 %503 }
 0x251   :  { %1736 = vpow2.f32 %v780_v40  ;;  %v802_v4 = vadd.f32 %v1727_v11, %v1725_v39  ;;  %vm535_vm15 = vcmp.eq.s32.totalorder %v2180_v48, %v504_v45  ;;  %vm536_vm1 = vcmp.eq.s32.totalorder %v2191_v51, %v504_v45 }
 0x252   :  { %1738 = vpow2.f32 %v782_v10  ;;  %v567_v32 = vsel %vm535_vm15, %v2183_v49, 0.0  ;;  %v568_v16 = vsel %vm536_vm1, %v2186_v21, 0.0  ;;  %v1789_v39 = vmov 0.0  }
 0x253   :  { %v1729_v12 = vpop.eup %1728  ;;  %803 = vadd.xlane.f32.xlu1 %v802_v4  ;;  %v574_v13 = vpop.xlane.xlu0 %573  ;;  %v614_v44 = vadd.f32 %v568_v16, %v567_v32  ;;  %v1545_v7 = vsel %vm1390_vm2, 1.0, %v1789_v39 }
 0x254   :  { %v1731_v18 = vpop.eup %1730  ;;  %851 = vst.msk [vmem:[#allocation4 + $0x8] sm:$0xff] %vm671_vm0, %v574_v13  ;;  %v1317_v13 = vld [vmem:[#allocation2 + $0x40] sm:$0xff] }
 0x255   :  { %v826_v19 = vadd.f32 %v1731_v18, %v1729_v12 }
 0x257   :  { %v1733_v3 = vpop.eup %1732  ;;  %827 = vadd.xlane.f32.xlu1 %v826_v19  ;;  %v580_v27 = vpop.xlane.xlu0 %579 }
 0x258   :  { %v1735_v26 = vpop.eup %1734  ;;  %853 = vst.msk [vmem:[#allocation4 + $0x18] sm:$0xff] %vm671_vm0, %v580_v27 }
 0x259   :  { %v805_v28 = vadd.f32 %v1735_v26, %v1733_v3 }
 0x25b   :  { %v1737_v61 = vpop.eup %1736  ;;  %594 = vadd.xlane.f32.xlu1 %v593_v34  ;;  %806 = vadd.xlane.f32.xlu0 %v805_v28  ;;  %v586_v59 = vpop.xlane.xlu0 %585  ;;  %v1310_v28 = vld [vmem:[#allocation2 + $0x8] sm:$0xff] }
 0x25c   :  { %v1739_v2 = vpop.eup %1738  ;;  %855 = vst.msk [vmem:[#allocation4 + $0x28] sm:$0xff] %vm671_vm0, %v586_v59  ;;  %v1457_v59 = vld [vmem:[#allocation4 + $0x8] sm:$0xff] }
 0x25d   :  { %v829_v25 = vadd.f32 %v1739_v2, %v1737_v61  ;;  %v1546_v61 = vsel %vm1391_vm3, 1.0, %v1789_v39 }
 0x25f   :  { %600 = vadd.xlane.f32.xlu1 %v599_v53  ;;  %830 = vadd.xlane.f32.xlu0 %v829_v25  ;;  %v592_v54 = vpop.xlane.xlu0 %591 }
 0x260   :  { %857 = vst.msk [vmem:[#allocation4 + $0x38] sm:$0xff] %vm671_vm0, %v592_v54 }
 0x263   :  { %606 = vadd.xlane.f32.xlu1 %v605_v9  ;;  %597 = vadd.xlane.f32.xlu0 %v596_v55  ;;  %v1774_v9 = vld [vmem:[%s2592_s4 + $0x10] sm:$0xff] }
 0x264   :  { %vm1392_vm4 = vcmp.ne.s32.totalorder %v1774_v9, 4294967196  ;;  %v1461_v9 = vld [vmem:[#allocation4 + $0x28] sm:$0xff] }
 0x267   :  { %603 = vadd.xlane.f32.xlu0 %v602_v24  ;;  %612 = vadd.xlane.f32.xlu1 %v611_v15  ;;  %v1547_v15 = vsel %vm1392_vm4, 1.0, %v1789_v39 }
 0x26b   :  { %609 = vadd.xlane.f32.xlu0 %v608_v43 }
 0x26f   :  { %615 = vadd.xlane.f32.xlu0 %v614_v44  ;;  %v1319_v44 = vld [vmem:[#allocation2 + $0x50] sm:$0xff] }
 0x281   :  { %v571_v58 = vpop.xlane.xlu1 %570 }
 0x282   :  { %850 = vst.msk [vmem:[#allocation4] sm:$0xff] %vm671_vm0, %v571_v58 }
 0x285   :  { %v577_v14 = vpop.xlane.xlu1 %576 }
 0x286   :  { %852 = vst.msk [vmem:[#allocation4 + $0x10] sm:$0xff] %vm671_vm0, %v577_v14 }
 0x289   :  { %v583_v5 = vpop.xlane.xlu1 %582  ;;  %v1456_v40 = vld [vmem:[#allocation4] sm:$0xff] }
 0x28a   :  { %854 = vst.msk [vmem:[#allocation4 + $0x20] sm:$0xff] %vm671_vm0, %v583_v5 }
 0x28d   :  { %v589_v48 = vpop.xlane.xlu1 %588  ;;  %v1458_v8 = vld [vmem:[#allocation4 + $0x10] sm:$0xff] }
 0x28e   :  { %856 = vst.msk [vmem:[#allocation4 + $0x30] sm:$0xff] %vm671_vm0, %v589_v48  ;;  %v1775_v48 = vld [vmem:[%s2592_s4 + $0x18] sm:$0xff] }
 0x28f   :  { %vm1393_vm5 = vcmp.ne.s32.totalorder %v1775_v48, 4294967196 }
 0x2b4   :  { %v786_v51 = vpop.xlane.xlu0 %785 }
 0x2b5   :  { %833 = vst.msk [vmem:[#allocation3] sm:$0xff] %vm671_vm0, %v786_v51 }
 0x2b8   :  { %v810_v49 = vpop.xlane.xlu1 %809 }
 0x2b9   :  { %841 = vst.msk [vmem:[#allocation3 + $0x40] sm:$0xff] %vm671_vm0, %v810_v49 }
 0x2bc   :  { %v1326_v21 = vld [vmem:[#allocation3] sm:$0xff]  ;;  %v789_v0 = vpop.xlane.xlu1 %788 }
 0x2bd   :  { %1740 = vlog2.f32 %v1326_v21  ;;  %834 = vst.msk [vmem:[#allocation3 + $0x8] sm:$0xff] %vm671_vm0, %v789_v0  ;;  %v1312_v0 = vld [vmem:[#allocation2 + $0x18] sm:$0xff] }
 0x2c0   :  { %v1334_v1 = vld [vmem:[#allocation3 + $0x40] sm:$0xff]  ;;  %v813_v60 = vpop.xlane.xlu0 %812 }
 0x2c1   :  { %1742 = vlog2.f32 %v1334_v1  ;;  %842 = vst.msk [vmem:[#allocation3 + $0x48] sm:$0xff] %vm671_vm0, %v813_v60 }
 0x2c4   :  { %v1327_v62 = vld [vmem:[#allocation3 + $0x8] sm:$0xff]  ;;  %v792_v63 = vpop.xlane.xlu0 %791 }
 0x2c5   :  { %1744 = vlog2.f32 %v1327_v62  ;;  %835 = vst.msk [vmem:[#allocation3 + $0x10] sm:$0xff] %vm671_vm0, %v792_v63  ;;  %v1548_v62 = vsel %vm1393_vm5, 1.0, %v1789_v39  ;;  %v1459_v63 = vld [vmem:[#allocation4 + $0x18] sm:$0xff] }
 0x2c7   :  { %v1741_v30 = vpop.eup %1740 }
 0x2c8   :  { %v1343_v47 = vmul.f32 0.6931472, %v1741_v30  ;;  %v1335_v31 = vld [vmem:[#allocation3 + $0x48] sm:$0xff]  ;;  %v816_v6 = vpop.xlane.xlu1 %815 }
 0x2c9   :  { %1746 = vlog2.f32 %v1335_v31  ;;  %843 = vst.msk [vmem:[#allocation3 + $0x50] sm:$0xff] %vm671_vm0, %v816_v6 }
 0x2ca   :  { %v1374_v56 = vadd.f32 %v1343_v47, %v1309_v38 }
 0x2cb   :  { %v1743_v17 = vpop.eup %1742 }
 0x2cc   :  { %1439 = vst.msk [vmem:[%s2595_s5] sm:$0xff] %vm671_vm0, %v1374_v56  ;;  %v1472_v10 = vsub.f32 %v1374_v56, %v1456_v40  ;;  %v1359_v11 = vmul.f32 0.6931472, %v1743_v17  ;;  %v1328_v4 = vld [vmem:[#allocation3 + $0x10] sm:$0xff]  ;;  %v795_v12 = vpop.xlane.xlu0 %794  ;;  %v1313_v56 = vld [vmem:[#allocation2 + $0x20] sm:$0xff] }
 0x2cd   :  { %1748 = vlog2.f32 %v1328_v4  ;;  %836 = vst.msk [vmem:[#allocation3 + $0x18] sm:$0xff] %vm671_vm0, %v795_v12  ;;  %v1549_v4 = vsel %vm1394_vm6, 1.0, %v1789_v39  ;;  %v1460_v12 = vld [vmem:[#allocation4 + $0x20] sm:$0xff] }
 0x2ce   :  { %v1488_v18 = vmul.f32 %v1545_v7, %v1472_v10  ;;  %v2363_v19 = vadd.f32 %v1359_v11, %v1317_v13  ;;  %v1320_v7 = vld [vmem:[#allocation2 + $0x58] sm:$0xff] }
 0x2cf   :  { %v1745_v29 = vpop.eup %1744 }
 0x2d0   :  { %1504 = vst.msk [vmem:[%s2596_s6] sm:$0xff] %vm671_vm0, %v1488_v18  ;;  %v1345_v3 = vmul.f32 0.6931472, %v1745_v29  ;;  %v1336_v27 = vld [vmem:[#allocation3 + $0x50] sm:$0xff]  ;;  %v798_v26 = vpop.xlane.xlu1 %797  ;;  %v819_v34 = vpop.xlane.xlu0 %818  ;;  %1447 = vst.msk [vmem:[%s2595_s5 + $0x40] sm:$0xff] %vm671_vm0, %v2363_v19 }
 0x2d1   :  { %1750 = vlog2.f32 %v1336_v27  ;;  %837 = vst.msk [vmem:[#allocation3 + $0x20] sm:$0xff] %vm671_vm0, %v798_v26  ;;  %844 = vst.msk [vmem:[#allocation3 + $0x58] sm:$0xff] %vm671_vm0, %v819_v34  ;;  %v1321_v26 = vld [vmem:[#allocation2 + $0x60] sm:$0xff] }
 0x2d2   :  { %v1375_v22 = vadd.f32 %v1345_v3, %v1310_v28 }
 0x2d3   :  { %v1747_v23 = vpop.eup %1746 }
 0x2d4   :  { %1440 = vst.msk [vmem:[%s2595_s5 + $0x8] sm:$0xff] %vm671_vm0, %v1375_v22  ;;  %v1473_v2 = vsub.f32 %v1375_v22, %v1457_v59  ;;  %v1361_v53 = vmul.f32 0.6931472, %v1747_v23  ;;  %v1329_v25 = vld [vmem:[#allocation3 + $0x18] sm:$0xff]  ;;  %v822_v35 = vpop.xlane.xlu1 %821  ;;  %v1777_v23 = vld [vmem:[%s2592_s4 + $0x28] sm:$0xff] }
 0x2d5   :  { %1752 = vlog2.f32 %v1329_v25  ;;  %845 = vst.msk [vmem:[#allocation3 + $0x60] sm:$0xff] %vm671_vm0, %v822_v35  ;;  %vm1395_vm7 = vcmp.ne.s32.totalorder %v1777_v23, 4294967196  ;;  %v1778_v25 = vld [vmem:[%s2592_s4 + $0x40] sm:$0xff]  ;;  %v1314_v35 = vld [vmem:[#allocation2 + $0x28] sm:$0xff] }
 0x2d6   :  { %v1489_v37 = vmul.f32 %v1546_v61, %v1473_v2  ;;  %v2385_v52 = vadd.f32 %v1361_v53, %v1318_v50  ;;  %vm1398_vm8 = vcmp.ne.s32.totalorder %v1778_v25, 4294967196 }
 0x2d7   :  { %v1749_v54 = vpop.eup %1748 }
 0x2d8   :  { %1505 = vst.msk [vmem:[%s2596_s6 + $0x8] sm:$0xff] %vm671_vm0, %v1489_v37  ;;  %v1347_v55 = vmul.f32 0.6931472, %v1749_v54  ;;  %v1330_v41 = vld [vmem:[#allocation3 + $0x20] sm:$0xff]  ;;  %v1337_v42 = vld [vmem:[#allocation3 + $0x58] sm:$0xff]  ;;  %v801_v46 = vpop.xlane.xlu0 %800  ;;  %1448 = vst.msk [vmem:[%s2595_s5 + $0x48] sm:$0xff] %vm671_vm0, %v2385_v52 }
 0x2d9   :  { %1754 = vlog2.f32 %v1330_v41  ;;  %838 = vst.msk [vmem:[#allocation3 + $0x28] sm:$0xff] %vm671_vm0, %v801_v46  ;;  %v1550_v54 = vsel %vm1395_vm7, 1.0, %v1789_v39 }
 0x2da   :  { %v1376_v45 = vadd.f32 %v1347_v55, %v1311_v57  ;;  %1756 = vlog2.f32 %v1337_v42  ;;  %v1553_v55 = vsel %vm1398_vm8, 1.0, %v1789_v39 }
 0x2db   :  { %v1751_v24 = vpop.eup %1750 }
 0x2dc   :  { %1441 = vst.msk [vmem:[%s2595_s5 + $0x10] sm:$0xff] %vm671_vm0, %v1376_v45  ;;  %v1474_v36 = vsub.f32 %v1376_v45, %v1458_v8  ;;  %v1363_v43 = vmul.f32 0.6931472, %v1751_v24  ;;  %v1338_v32 = vld [vmem:[#allocation3 + $0x60] sm:$0xff]  ;;  %v825_v16 = vpop.xlane.xlu0 %824  ;;  %v1322_v8 = vld [vmem:[#allocation2 + $0x68] sm:$0xff] }
 0x2dd   :  { %1758 = vlog2.f32 %v1338_v32  ;;  %846 = vst.msk [vmem:[#allocation3 + $0x68] sm:$0xff] %vm671_vm0, %v825_v16 }
 0x2de   :  { %v1490_v58 = vmul.f32 %v1547_v15, %v1474_v36  ;;  %v2406_v14 = vadd.f32 %v1363_v43, %v1319_v44  ;;  %v1779_v15 = vld [vmem:[%s2592_s4 + $0x50] sm:$0xff] }
 0x2df   :  { %v1753_v5 = vpop.eup %1752  ;;  %vm1400_vm9 = vcmp.ne.s32.totalorder %v1779_v15, 4294967196 }
 0x2e0   :  { %1506 = vst.msk [vmem:[%s2596_s6 + $0x10] sm:$0xff] %vm671_vm0, %v1490_v58  ;;  %v1349_v51 = vmul.f32 0.6931472, %v1753_v5  ;;  %v1331_v49 = vld [vmem:[#allocation3 + $0x28] sm:$0xff]  ;;  %v804_v21 = vpop.xlane.xlu1 %803  ;;  %1449 = vst.msk [vmem:[%s2595_s5 + $0x50] sm:$0xff] %vm671_vm0, %v2406_v14  ;;  %v1780_v58 = vld [vmem:[%s2592_s4 + $0x30] sm:$0xff] }
 0x2e1   :  { %1760 = vlog2.f32 %v1331_v49  ;;  %839 = vst.msk [vmem:[#allocation3 + $0x30] sm:$0xff] %vm671_vm0, %v804_v21  ;;  %vm1396_vm10 = vcmp.ne.s32.totalorder %v1780_v58, 4294967196  ;;  %v1555_v5 = vsel %vm1400_vm9, 1.0, %v1789_v39 }
 0x2e2   :  { %v1377_v1 = vadd.f32 %v1349_v51, %v1312_v0  ;;  %v1781_v0 = vld [vmem:[%s2592_s4 + $0x48] sm:$0xff]  ;;  %v1551_v20 = vsel %vm1396_vm10, 1.0, %v1789_v39 }
 0x2e3   :  { %v1755_v60 = vpop.eup %1754  ;;  %vm1399_vm11 = vcmp.ne.s32.totalorder %v1781_v0, 4294967196 }
 0x2e4   :  { %v1757_v30 = vpop.eup %1756  ;;  %1442 = vst.msk [vmem:[%s2595_s5 + $0x18] sm:$0xff] %vm671_vm0, %v1377_v1  ;;  %v1475_v47 = vsub.f32 %v1377_v1, %v1459_v63  ;;  %v1351_v31 = vmul.f32 0.6931472, %v1755_v60  ;;  %v1339_v6 = vld [vmem:[#allocation3 + $0x68] sm:$0xff]  ;;  %v828_v38 = vpop.xlane.xlu1 %827  ;;  %v1782_v1 = vld [vmem:[%s2592_s4 + $0x60] sm:$0xff]  ;;  %v1315_v60 = vld [vmem:[#allocation2 + $0x30] sm:$0xff] }
 0x2e5   :  { %v1365_v17 = vmul.f32 0.6931472, %v1757_v30  ;;  %1762 = vlog2.f32 %v1339_v6  ;;  %847 = vst.msk [vmem:[#allocation3 + $0x70] sm:$0xff] %vm671_vm0, %v828_v38  ;;  %vm1402_vm12 = vcmp.ne.s32.totalorder %v1782_v1, 4294967196  ;;  %v1554_v6 = vsel %vm1399_vm11, 1.0, %v1789_v39 }
 0x2e6   :  { %v1491_v40 = vmul.f32 %v1548_v62, %v1475_v47  ;;  %v1378_v10 = vadd.f32 %v1351_v31, %v1313_v56  ;;  %v1462_v47 = vld [vmem:[#allocation4 + $0x30] sm:$0xff]  ;;  %v1557_v38 = vsel %vm1402_vm12, 1.0, %v1789_v39 }
 0x2e7   :  { %v1759_v11 = vpop.eup %1758  ;;  %v2431_v13 = vadd.f32 %v1365_v17, %v1320_v7 }
 0x2e8   :  { %1507 = vst.msk [vmem:[%s2596_s6 + $0x18] sm:$0xff] %vm671_vm0, %v1491_v40  ;;  %1443 = vst.msk [vmem:[%s2595_s5 + $0x20] sm:$0xff] %vm671_vm0, %v1378_v10  ;;  %v1476_v18 = vsub.f32 %v1378_v10, %v1460_v12  ;;  %v1367_v29 = vmul.f32 0.6931472, %v1759_v11  ;;  %v1332_v33 = vld [vmem:[#allocation3 + $0x30] sm:$0xff]  ;;  %v595_v3 = vpop.xlane.xlu1 %594  ;;  %v807_v27 = vpop.xlane.xlu0 %806  ;;  %v1783_v10 = vld [vmem:[%s2592_s4 + $0x58] sm:$0xff] }
 0x2e9   :  { %1764 = vlog2.f32 %v1332_v33  ;;  %858 = vst.msk [vmem:[#allocation4 + $0x40] sm:$0xff] %vm671_vm0, %v595_v3  ;;  %840 = vst.msk [vmem:[#allocation3 + $0x38] sm:$0xff] %vm671_vm0, %v807_v27  ;;  %vm1401_vm13 = vcmp.ne.s32.totalorder %v1783_v10, 4294967196  ;;  %v1784_v11 = vld [vmem:[%s2592_s4 + $0x70] sm:$0xff]  ;;  %v1785_v27 = vld [vmem:[%s2592_s4 + $0x38] sm:$0xff] }
 0x2ea   :  { %1450 = vst.msk [vmem:[%s2595_s5 + $0x58] sm:$0xff] %vm671_vm0, %v2431_v13  ;;  %v1492_v34 = vmul.f32 %v1549_v4, %v1476_v18  ;;  %v2448_v28 = vadd.f32 %v1367_v29, %v1321_v26  ;;  %vm1404_vm14 = vcmp.ne.s32.totalorder %v1784_v11, 4294967196  ;;  %v1323_v4 = vld [vmem:[#allocation2 + $0x70] sm:$0xff]  ;;  %vm1397_vm15 = vcmp.ne.s32.totalorder %v1785_v27, 4294967196 }
 0x2eb   :  { %v1761_v22 = vpop.eup %1760  ;;  %v1559_v23 = vsel %vm1404_vm14, 1.0, %v1789_v39 }
 0x2ec   :  { %1508 = vst.msk [vmem:[%s2596_s6 + $0x20] sm:$0xff] %vm671_vm0, %v1492_v34  ;;  %v1353_v61 = vmul.f32 0.6931472, %v1761_v22  ;;  %v1340_v59 = vld [vmem:[#allocation3 + $0x70] sm:$0xff]  ;;  %v601_v2 = vpop.xlane.xlu1 %600  ;;  %v831_v53 = vpop.xlane.xlu0 %830  ;;  %1451 = vst.msk [vmem:[%s2595_s5 + $0x60] sm:$0xff] %vm671_vm0, %v2448_v28  ;;  %v1556_v22 = vsel %vm1401_vm13, 1.0, %v1789_v39 }
 0x2ed   :  { %1766 = vlog2.f32 %v1340_v59  ;;  %860 = vst.msk [vmem:[#allocation4 + $0x50] sm:$0xff] %vm671_vm0, %v601_v2  ;;  %848 = vst.msk [vmem:[#allocation3 + $0x78] sm:$0xff] %vm671_vm0, %v831_v53  ;;  %v1786_v2 = vld [vmem:[%s2592_s4 + $0x68] sm:$0xff]  ;;  %v1316_v53 = vld [vmem:[#allocation2 + $0x38] sm:$0xff] }
 0x2ee   :  { %v1379_v50 = vadd.f32 %v1353_v61, %v1314_v35  ;;  %vm1403_vm1 = vcmp.ne.s32.totalorder %v1786_v2, 4294967196 }
 0x2ef   :  { %v1763_v37 = vpop.eup %1762 }
 0x2f0   :  { %1444 = vst.msk [vmem:[%s2595_s5 + $0x28] sm:$0xff] %vm671_vm0, %v1379_v50  ;;  %v1477_v41 = vsub.f32 %v1379_v50, %v1461_v9  ;;  %v1369_v42 = vmul.f32 0.6931472, %v1763_v37  ;;  %v1464_v46 = vld [vmem:[#allocation4 + $0x40] sm:$0xff]  ;;  %v1333_v57 = vld [vmem:[#allocation3 + $0x38] sm:$0xff]  ;;  %v607_v45 = vpop.xlane.xlu1 %606  ;;  %v598_v24 = vpop.xlane.xlu0 %597 }
 0x2f1   :  { %v1480_v36 = vsub.f32 %v2363_v19, %v1464_v46  ;;  %1768 = vlog2.f32 %v1333_v57  ;;  %862 = vst.msk [vmem:[#allocation4 + $0x60] sm:$0xff] %vm671_vm0, %v607_v45  ;;  %859 = vst.msk [vmem:[#allocation4 + $0x48] sm:$0xff] %vm671_vm0, %v598_v24  ;;  %v1463_v9 = vld [vmem:[#allocation4 + $0x38] sm:$0xff] }
 0x2f2   :  { %v1493_v43 = vmul.f32 %v1550_v54, %v1477_v41  ;;  %v2479_v32 = vadd.f32 %v1369_v42, %v1322_v8  ;;  %v1552_v54 = vsel %vm1397_vm15, 1.0, %v1789_v39  ;;  %v1558_v42 = vsel %vm1403_vm1, 1.0, %v1789_v39  ;;  %v1787_v45 = vld [vmem:[%s2592_s4 + $0x78] sm:$0xff] }
 0x2f3   :  { %v1765_v16 = vpop.eup %1764  ;;  %v1496_v44 = vmul.f32 %v1553_v55, %v1480_v36  ;;  %vm1405_vm2 = vcmp.ne.s32.totalorder %v1787_v45, 4294967196  ;;  %v1324_v24 = vld [vmem:[#allocation2 + $0x78] sm:$0xff] }
 0x2f4   :  { %1509 = vst.msk [vmem:[%s2596_s6 + $0x28] sm:$0xff] %vm671_vm0, %v1493_v43  ;;  %v1355_v19 = vmul.f32 0.6931472, %v1765_v16  ;;  %v1466_v48 = vld [vmem:[#allocation4 + $0x50] sm:$0xff]  ;;  %v1341_v51 = vld [vmem:[#allocation3 + $0x78] sm:$0xff]  ;;  %v613_v49 = vpop.xlane.xlu1 %612  ;;  %v604_v21 = vpop.xlane.xlu0 %603  ;;  %1452 = vst.msk [vmem:[%s2595_s5 + $0x68] sm:$0xff] %vm671_vm0, %v2479_v32 }
 0x2f5   :  { %1512 = vst.msk [vmem:[%s2596_s6 + $0x40] sm:$0xff] %vm671_vm0, %v1496_v44  ;;  %v1482_v62 = vsub.f32 %v2406_v14, %v1466_v48  ;;  %1770 = vlog2.f32 %v1341_v51  ;;  %864 = vst.msk [vmem:[#allocation4 + $0x70] sm:$0xff] %vm671_vm0, %v613_v49  ;;  %v1560_v16 = vsel %vm1405_vm2, 1.0, %v1789_v39 }
 0x2f6   :  { %861 = vst.msk [vmem:[#allocation4 + $0x58] sm:$0xff] %vm671_vm0, %v604_v21  ;;  %v1380_v63 = vadd.f32 %v1355_v19, %v1315_v60 }
 0x2f7   :  { %v1767_v30 = vpop.eup %1766  ;;  %v1498_v31 = vmul.f32 %v1555_v5, %v1482_v62 }
 0x2f8   :  { %1445 = vst.msk [vmem:[%s2595_s5 + $0x30] sm:$0xff] %vm671_vm0, %v1380_v63  ;;  %v1478_v14 = vsub.f32 %v1380_v63, %v1462_v47  ;;  %v1371_v56 = vmul.f32 0.6931472, %v1767_v30  ;;  %v1468_v17 = vld [vmem:[#allocation4 + $0x60] sm:$0xff]  ;;  %v1465_v7 = vld [vmem:[#allocation4 + $0x48] sm:$0xff]  ;;  %v610_v40 = vpop.xlane.xlu0 %609 }
 0x2f9   :  { %1514 = vst.msk [vmem:[%s2596_s6 + $0x50] sm:$0xff] %vm671_vm0, %v1498_v31  ;;  %v1484_v12 = vsub.f32 %v2448_v28, %v1468_v17  ;;  %v1481_v18 = vsub.f32 %v2385_v52, %v1465_v7  ;;  %863 = vst.msk [vmem:[#allocation4 + $0x68] sm:$0xff] %vm671_vm0, %v610_v40 }
 0x2fa   :  { %v1494_v29 = vmul.f32 %v1551_v20, %v1478_v14  ;;  %v1388_v33 = vadd.f32 %v1371_v56, %v1323_v4 }
 0x2fb   :  { %v1769_v3 = vpop.eup %1768  ;;  %v1500_v26 = vmul.f32 %v1557_v38, %v1484_v12  ;;  %v1497_v34 = vmul.f32 %v1554_v6, %v1481_v18 }
 0x2fc   :  { %1510 = vst.msk [vmem:[%s2596_s6 + $0x30] sm:$0xff] %vm671_vm0, %v1494_v29  ;;  %v1357_v52 = vmul.f32 0.6931472, %v1769_v3  ;;  %1453 = vst.msk [vmem:[%s2595_s5 + $0x70] sm:$0xff] %vm671_vm0, %v1388_v33  ;;  %v1470_v28 = vld [vmem:[#allocation4 + $0x70] sm:$0xff]  ;;  %v616_v59 = vpop.xlane.xlu0 %615 }
 0x2fd   :  { %v1467_v61 = vld [vmem:[#allocation4 + $0x58] sm:$0xff]  ;;  %1516 = vst.msk [vmem:[%s2596_s6 + $0x60] sm:$0xff] %vm671_vm0, %v1500_v26  ;;  %1513 = vst.msk [vmem:[%s2596_s6 + $0x48] sm:$0xff] %vm671_vm0, %v1497_v34  ;;  %v1486_v25 = vsub.f32 %v1388_v33, %v1470_v28 }
 0x2fe   :  { %v1483_v35 = vsub.f32 %v2431_v13, %v1467_v61  ;;  %865 = vst.msk [vmem:[#allocation4 + $0x78] sm:$0xff] %vm671_vm0, %v616_v59  ;;  %v1381_v50 = vadd.f32 %v1357_v52, %v1316_v53 }
 0x2ff   :  { %v1771_v37 = vpop.eup %1770  ;;  %v1502_v55 = vmul.f32 %v1559_v23, %v1486_v25 }
 0x300   :  { %v1499_v41 = vmul.f32 %v1556_v22, %v1483_v35  ;;  %1446 = vst.msk [vmem:[%s2595_s5 + $0x38] sm:$0xff] %vm671_vm0, %v1381_v50  ;;  %v1479_v46 = vsub.f32 %v1381_v50, %v1463_v9  ;;  %v1373_v57 = vmul.f32 0.6931472, %v1771_v37  ;;  %v1469_v13 = vld [vmem:[#allocation4 + $0x68] sm:$0xff] }
 0x301   :  { %1518 = vst.msk [vmem:[%s2596_s6 + $0x70] sm:$0xff] %vm671_vm0, %v1502_v55  ;;  %v1485_v15 = vsub.f32 %v2479_v32, %v1469_v13 }
 0x302   :  { %1515 = vst.msk [vmem:[%s2596_s6 + $0x58] sm:$0xff] %vm671_vm0, %v1499_v41  ;;  %v1495_v8 = vmul.f32 %v1552_v54, %v1479_v46  ;;  %v1389_v36 = vadd.f32 %v1373_v57, %v1324_v24 }
 0x303   :  { %v1501_v43 = vmul.f32 %v1558_v42, %v1485_v15 }
 0x304   :  { %1511 = vst.msk [vmem:[%s2596_s6 + $0x38] sm:$0xff] %vm671_vm0, %v1495_v8  ;;  %1454 = vst.msk [vmem:[%s2595_s5 + $0x78] sm:$0xff] %vm671_vm0, %v1389_v36 }
 0x305   :  { %v1471_v44 = vld [vmem:[#allocation4 + $0x78] sm:$0xff]  ;;  %1517 = vst.msk [vmem:[%s2596_s6 + $0x68] sm:$0xff] %vm671_vm0, %v1501_v43 }
 0x306   :  { %v1487_v32 = vsub.f32 %v1389_v36, %v1471_v44 }
 0x308   :  { %v1503_v58 = vmul.f32 %v1560_v16, %v1487_v32 }
 0x30a   :  { %1519 = vst.msk [vmem:[%s2596_s6 + $0x78] sm:$0xff] %vm671_vm0, %v1503_v58 }

// kernel: vq_transformer_forward.4
= control target key start
LH: loop header
LB: loop body
LE: loop exit
PB: predicated region body
PF: predicated region fallthrough
CT: control target
= control target key end

     0   :  { %s3653_s0 = inlined_call_operand.vmem [shape: bf16[128,128], index: 0, kind: input, shape index: {}]   ;;  %s3654_s2 = inlined_call_operand.vmem [shape: bf16[128,512], index: 2, kind: input, shape index: {}]   ;;  %s3655_s4 = inlined_call_operand.vmem [shape: bf16[512,128], index: 4, kind: input, shape index: {}]   ;;  %s3656_s1 = inlined_call_operand.vmem [shape: f32[1,128], index: 1, kind: input, shape index: {}]   ;;  %s3657_s3 = inlined_call_operand.vmem [shape: f32[1,512], index: 3, kind: input, shape index: {}]   ;;  %s3658_s5 = inlined_call_operand.vmem [shape: f32[1,128], index: 5, kind: input, shape index: {}]   ;;  %s3659_s6 = inlined_call_operand.vmem [shape: bf16[128,128], index: 6, kind: output, shape index: {}]  }
   0x1   :  { %v1904_v0 = vld [vmem:[%s3653_s0] sm:$0xff]   ;;  %v1975_v1 = vld [vmem:[%s3653_s0 + $0x8] sm:$0xff]   ;;  %v1976_v6 = vld [vmem:[%s3653_s0 + $0x10] sm:$0xff]  }
   0x2   :  { %v2400_v2 = vunpack.c.l.bf16 %v1904_v0  ;;  %v2402_v3 = vunpack.c.l.bf16 %v1975_v1  ;;  %v2404_v4 = vunpack.c.h.bf16 %v1904_v0  ;;  %v2406_v5 = vunpack.c.h.bf16 %v1975_v1  ;;  %v2118_v9 = vld [vmem:[%s3654_s2 + $0x4] ss:$16 sps:$4 sm:$0xff]   ;;  %v1977_v10 = vld [vmem:[%s3653_s0 + $0x18] sm:$0xff]   ;;  %v2122_v12 = vld [vmem:[%s3654_s2] ss:$16 sps:$4 sm:$0xff]  }
   0x3   :  { %v2120_v11 = vld [vmem:[%s3654_s2 + $0xc] ss:$16 sps:$4 sm:$0xff]   ;;  %v2431_v15 = vunpack.c.h.bf16 %v1976_v6  ;;  %v2433_v16 = vunpack.c.l.bf16 %v1976_v6  ;;  %v2123_v17 = vld [vmem:[%s3654_s2 + $0x8] ss:$16 sps:$4 sm:$0xff]   ;;  %414 = vmatprep.subr.bf16.mxu0 %v2118_v9  ;;  %v2124_v18 = vld [vmem:[%s3654_s2 + $0x24] ss:$16 sps:$4 sm:$0xff]   ;;  %v2457_v25 = vunpack.c.h.bf16 %v1977_v10  ;;  %v2459_v26 = vunpack.c.l.bf16 %v1977_v10 }
   0x4   :  { %3715 = vst [vmem:[#allocation2_spill] sm:$0xff] %v2400_v2  ;;  %3716 = vst [vmem:[#allocation3_spill] sm:$0xff] %v2402_v3  ;;  %v57_v7 = vmul.f32 %v2400_v2, %v2400_v2  ;;  %v59_v8 = vmul.f32 %v2402_v3, %v2402_v3  ;;  %v58_v13 = vmul.f32 %v2404_v4, %v2404_v4  ;;  %527 = vmatprep.subr.bf16.mxu1 %v2120_v11  ;;  %v2126_v19 = vld [vmem:[%s3654_s2 + $0x2c] ss:$16 sps:$4 sm:$0xff]   ;;  %v2128_v20 = vld [vmem:[%s3654_s2 + $0x20] ss:$16 sps:$4 sm:$0xff]  }
   0x5   :  { %3717 = vst [vmem:[#allocation4_spill] sm:$0xff] %v2404_v4  ;;  %3718 = vst [vmem:[#allocation5_spill] sm:$0xff] %v2406_v5  ;;  %v60_v14 = vmul.f32 %v2406_v5, %v2406_v5  ;;  %415 = vmatpush1.bf16.msra.mxu0 %v2122_v12  ;;  %v2129_v21 = vld [vmem:[%s3654_s2 + $0x28] ss:$16 sps:$4 sm:$0xff]   ;;  %v1978_v22 = vld [vmem:[%s3653_s0 + $0x20] sm:$0xff]   ;;  %528 = vmatpush1.bf16.msra.mxu1 %v2123_v17  ;;  %v62_v23 = vmul.f32 %v2431_v15, %v2431_v15  ;;  %v2358_v10 = vmov 0  }
   0x6   :  { %73 = vadd.xlane.f32.xlu0 %v57_v7  ;;  %77 = vadd.xlane.f32.xlu1 %v59_v8  ;;  %3719 = vst [vmem:[#allocation6_spill] sm:$0xff] %v2431_v15  ;;  %3720 = vst [vmem:[#allocation7_spill] sm:$0xff] %v2433_v16  ;;  %v61_v24 = vmul.f32 %v2433_v16, %v2433_v16  ;;  %v1979_v27 = vld [vmem:[%s3653_s0 + $0x28] sm:$0xff]   ;;  %v64_v28 = vmul.f32 %v2457_v25, %v2457_v25  ;;  %v2468_v30 = vunpack.c.h.bf16 %v1978_v22  ;;  %v1980_v36 = vld [vmem:[%s3653_s0 + $0x30] sm:$0xff]  }
   0x7   :  { %3721 = vst [vmem:[#allocation8_spill] sm:$0xff] %v2457_v25  ;;  %3722 = vst [vmem:[#allocation9_spill] sm:$0xff] %v2459_v26  ;;  %416 = vmatprep.subr.bf16.mxu0 %v2124_v18  ;;  %529 = vmatprep.subr.bf16.mxu1 %v2126_v19  ;;  %v63_v29 = vmul.f32 %v2459_v26, %v2459_v26  ;;  %v2470_v31 = vunpack.c.l.bf16 %v1978_v22  ;;  %v2476_v34 = vunpack.c.h.bf16 %v1979_v27  ;;  %v2478_v35 = vunpack.c.l.bf16 %v1979_v27  ;;  %v2130_v37 = vld [vmem:[%s3654_s2 + $0x44] ss:$16 sps:$4 sm:$0xff]   ;;  %v2132_v38 = vld [vmem:[%s3654_s2 + $0x4c] ss:$16 sps:$4 sm:$0xff]  }
   0x8   :  { %3723 = vst [vmem:[#allocation10_spill] sm:$0xff] %v2468_v30  ;;  %v66_v32 = vmul.f32 %v2468_v30, %v2468_v30  ;;  %v2134_v39 = vld [vmem:[%s3654_s2 + $0x40] ss:$16 sps:$4 sm:$0xff]   ;;  %v2135_v40 = vld [vmem:[%s3654_s2 + $0x48] ss:$16 sps:$4 sm:$0xff]   ;;  %v2499_v43 = vunpack.c.h.bf16 %v1980_v36  ;;  %v2501_v44 = vunpack.c.l.bf16 %v1980_v36  ;;  %446 = vmatprep.mubr.bf16.mxu0 %v2358_v10  ;;  %559 = vmatprep.mubr.bf16.mxu1 %v2358_v10 }
   0x9   :  { %417 = vmatpush1.bf16.msra.mxu0 %v2128_v20  ;;  %530 = vmatpush1.bf16.msra.mxu1 %v2129_v21  ;;  %3724 = vst [vmem:[#allocation11_spill] sm:$0xff] %v2470_v31  ;;  %v65_v33 = vmul.f32 %v2470_v31, %v2470_v31  ;;  %3725 = vst [vmem:[#allocation12_spill] sm:$0xff] %v2476_v34  ;;  %v68_v41 = vmul.f32 %v2476_v34, %v2476_v34  ;;  %v1981_v45 = vld [vmem:[%s3653_s0 + $0x38] sm:$0xff]   ;;  %v2136_v46 = vld [vmem:[%s3654_s2 + $0x64] ss:$16 sps:$4 sm:$0xff]  }
   0xa   :  { %75 = vadd.xlane.f32.xlu0 %v58_v13  ;;  %79 = vadd.xlane.f32.xlu1 %v60_v14  ;;  %3726 = vst [vmem:[#allocation13_spill] sm:$0xff] %v2478_v35  ;;  %v67_v42 = vmul.f32 %v2478_v35, %v2478_v35  ;;  %3727 = vst [vmem:[#allocation14_spill] sm:$0xff] %v2499_v43  ;;  %v2138_v47 = vld [vmem:[%s3654_s2 + $0x6c] ss:$16 sps:$4 sm:$0xff]   ;;  %v2140_v48 = vld [vmem:[%s3654_s2 + $0x60] ss:$16 sps:$4 sm:$0xff]   ;;  %v70_v50 = vmul.f32 %v2499_v43, %v2499_v43  ;;  %v2522_v52 = vunpack.c.h.bf16 %v1981_v45 }
   0xb   :  { %418 = vmatprep.subr.bf16.mxu0 %v2130_v37  ;;  %531 = vmatprep.subr.bf16.mxu1 %v2132_v38  ;;  %3728 = vst [vmem:[#allocation15_spill] sm:$0xff] %v2501_v44  ;;  %v2141_v49 = vld [vmem:[%s3654_s2 + $0x68] ss:$16 sps:$4 sm:$0xff]   ;;  %v69_v51 = vmul.f32 %v2501_v44, %v2501_v44  ;;  %v2524_v53 = vunpack.c.l.bf16 %v1981_v45  ;;  %v2142_v54 = vld [vmem:[%s3654_s2 + $0x84] ss:$16 sps:$4 sm:$0xff]  }
   0xc   :  { %3729 = vst [vmem:[#allocation16_spill] sm:$0xff] %v2522_v52  ;;  %v2144_v55 = vld [vmem:[%s3654_s2 + $0x8c] ss:$16 sps:$4 sm:$0xff]   ;;  %v2146_v56 = vld [vmem:[%s3654_s2 + $0x80] ss:$16 sps:$4 sm:$0xff]   ;;  %v72_v60 = vmul.f32 %v2522_v52, %v2522_v52 }
   0xd   :  { %419 = vmatpush1.bf16.msra.mxu0 %v2134_v39  ;;  %532 = vmatpush1.bf16.msra.mxu1 %v2135_v40  ;;  %3730 = vst [vmem:[#allocation17_spill] sm:$0xff] %v2524_v53  ;;  %v2147_v57 = vld [vmem:[%s3654_s2 + $0x88] ss:$16 sps:$4 sm:$0xff]   ;;  %v2148_v58 = vld [vmem:[%s3654_s2 + $0xa4] ss:$16 sps:$4 sm:$0xff]   ;;  %v71_v61 = vmul.f32 %v2524_v53, %v2524_v53 }
   0xe   :  { %83 = vadd.xlane.f32.xlu1 %v62_v23  ;;  %81 = vadd.xlane.f32.xlu0 %v61_v24  ;;  %v2150_v59 = vld [vmem:[%s3654_s2 + $0xac] ss:$16 sps:$4 sm:$0xff]   ;;  %v2152_v62 = vld [vmem:[%s3654_s2 + $0xa0] ss:$16 sps:$4 sm:$0xff]   ;;  %v2153_v63 = vld [vmem:[%s3654_s2 + $0xa8] ss:$16 sps:$4 sm:$0xff]  }
   0xf   :  { %420 = vmatprep.subr.bf16.mxu0 %v2136_v46  ;;  %533 = vmatprep.subr.bf16.mxu1 %v2138_v47  ;;  %v2154_v0 = vld [vmem:[%s3654_s2 + $0xc4] ss:$16 sps:$4 sm:$0xff]   ;;  %v2156_v1 = vld [vmem:[%s3654_s2 + $0xcc] ss:$16 sps:$4 sm:$0xff]   ;;  %v2158_v6 = vld [vmem:[%s3654_s2 + $0xc0] ss:$16 sps:$4 sm:$0xff]  }
  0x10   :  { %v2159_v7 = vld [vmem:[%s3654_s2 + $0xc8] ss:$16 sps:$4 sm:$0xff]   ;;  %v2160_v8 = vld [vmem:[%s3654_s2 + $0xe4] ss:$16 sps:$4 sm:$0xff]   ;;  %v2162_v9 = vld [vmem:[%s3654_s2 + $0xec] ss:$16 sps:$4 sm:$0xff]  }
  0x11   :  { %421 = vmatpush1.bf16.msra.mxu0 %v2140_v48  ;;  %534 = vmatpush1.bf16.msra.mxu1 %v2141_v49  ;;  %v2164_v11 = vld [vmem:[%s3654_s2 + $0xe0] ss:$16 sps:$4 sm:$0xff]   ;;  %v2165_v12 = vld [vmem:[%s3654_s2 + $0xe8] ss:$16 sps:$4 sm:$0xff]  }
  0x12   :  { %87 = vadd.xlane.f32.xlu1 %v64_v28  ;;  %85 = vadd.xlane.f32.xlu0 %v63_v29  ;;  %v2166_v13 = vld [vmem:[%s3655_s4 + $0x40] sm:$0xff]  }
  0x13   :  { %422 = vmatprep.subr.bf16.mxu0 %v2142_v54  ;;  %535 = vmatprep.subr.bf16.mxu1 %v2144_v55  ;;  %v2168_v14 = vld [vmem:[%s3655_s4 + $0xc0] sm:$0xff]  }
  0x15   :  { %423 = vmatpush1.bf16.msra.mxu0 %v2146_v56  ;;  %536 = vmatpush1.bf16.msra.mxu1 %v2147_v57 }
  0x16   :  { %91 = vadd.xlane.f32.xlu1 %v66_v32  ;;  %89 = vadd.xlane.f32.xlu0 %v65_v33 }
  0x17   :  { %424 = vmatprep.subr.bf16.mxu0 %v2148_v58  ;;  %537 = vmatprep.subr.bf16.mxu1 %v2150_v59 }
  0x19   :  { %425 = vmatpush1.bf16.msra.mxu0 %v2152_v62  ;;  %538 = vmatpush1.bf16.msra.mxu1 %v2153_v63 }
  0x1a   :  { %95 = vadd.xlane.f32.xlu1 %v68_v41  ;;  %93 = vadd.xlane.f32.xlu0 %v67_v42 }
  0x1b   :  { %426 = vmatprep.subr.bf16.mxu0 %v2154_v0  ;;  %539 = vmatprep.subr.bf16.mxu1 %v2156_v1 }
  0x1d   :  { %427 = vmatpush1.bf16.msra.mxu0 %v2158_v6  ;;  %540 = vmatpush1.bf16.msra.mxu1 %v2159_v7  ;;  %v2167_v6 = vld [vmem:[%s3655_s4] sm:$0xff]  }
  0x1e   :  { %99 = vadd.xlane.f32.xlu1 %v70_v50  ;;  %97 = vadd.xlane.f32.xlu0 %v69_v51  ;;  %v2590_v50 = vld [vmem:[%s3656_s1] ss:$0 sm:$0xff] }
  0x1f   :  { %428 = vmatprep.subr.bf16.mxu0 %v2160_v8  ;;  %541 = vmatprep.subr.bf16.mxu1 %v2162_v9  ;;  %v2169_v7 = vld [vmem:[%s3655_s4 + $0x80] sm:$0xff]   ;;  %v2170_v9 = vld [vmem:[%s3655_s4 + $0x48] sm:$0xff]  }
  0x21   :  { %429 = vmatpush1.bf16.msra.mxu0 %v2164_v11  ;;  %542 = vmatpush1.bf16.msra.mxu1 %v2165_v12  ;;  %v2172_v11 = vld [vmem:[%s3655_s4 + $0xc8] sm:$0xff]  }
  0x22   :  { %103 = vadd.xlane.f32.xlu1 %v72_v60  ;;  %101 = vadd.xlane.f32.xlu0 %v71_v61 }
  0x23   :  { %1989 = vmatprep.subr.bf16.mxu0 %v2166_v13  ;;  %2053 = vmatprep.subr.bf16.mxu1 %v2168_v14 }
  0x93   :  { %v74_v17 = vpop.xlane.xlu0 %73  ;;  %v78_v18 = vpop.xlane.xlu1 %77 }
  0x94   :  { %v106_v19 = vmul.f32 0.0078125, %v74_v17  ;;  %v108_v20 = vmul.f32 0.0078125, %v78_v18 }
  0x96   :  { %v122_v21 = vadd.f32 1e-06, %v106_v19  ;;  %v124_v28 = vadd.f32 1e-06, %v108_v20  ;;  %v2171_v19 = vld [vmem:[%s3655_s4 + $0x8] sm:$0xff]  }
  0x97   :  { %v76_v22 = vpop.xlane.xlu0 %75  ;;  %v80_v23 = vpop.xlane.xlu1 %79  ;;  %v2173_v20 = vld [vmem:[%s3655_s4 + $0x88] sm:$0xff]  }
  0x98   :  { %2198 = vrsqrt.f32 %v122_v21  ;;  %v107_v24 = vmul.f32 0.0078125, %v76_v22  ;;  %v109_v27 = vmul.f32 0.0078125, %v80_v23  ;;  %v2174_v23 = vld [vmem:[%s3655_s4 + $0x50] sm:$0xff]  }
  0x9a   :  { %v123_v29 = vadd.f32 1e-06, %v107_v24  ;;  %v125_v32 = vadd.f32 1e-06, %v109_v27  ;;  %v2176_v24 = vld [vmem:[%s3655_s4 + $0xd0] sm:$0xff]  }
  0x9b   :  { %v84_v33 = vpop.xlane.xlu1 %83  ;;  %v82_v36 = vpop.xlane.xlu0 %81 }
  0x9c   :  { %2200 = vrsqrt.f32 %v123_v29  ;;  %v111_v37 = vmul.f32 0.0078125, %v84_v33  ;;  %v110_v38 = vmul.f32 0.0078125, %v82_v36  ;;  %v2175_v36 = vld [vmem:[%s3655_s4 + $0x10] sm:$0xff]  }
  0x9d   :  { %2202 = vrsqrt.f32 %v124_v28 }
  0x9e   :  { %2204 = vrsqrt.f32 %v125_v32  ;;  %v127_v39 = vadd.f32 1e-06, %v111_v37  ;;  %v126_v41 = vadd.f32 1e-06, %v110_v38  ;;  %v2177_v37 = vld [vmem:[%s3655_s4 + $0x90] sm:$0xff]  }
  0x9f   :  { %v88_v40 = vpop.xlane.xlu1 %87  ;;  %v86_v42 = vpop.xlane.xlu0 %85 }
  0xa0   :  { %v113_v46 = vmul.f32 0.0078125, %v88_v40  ;;  %2206 = vrsqrt.f32 %v127_v39  ;;  %v112_v47 = vmul.f32 0.0078125, %v86_v42  ;;  %v2178_v40 = vld [vmem:[%s3655_s4 + $0x58] sm:$0xff]  }
  0xa1   :  { %2208 = vrsqrt.f32 %v126_v41  ;;  %v2180_v41 = vld [vmem:[%s3655_s4 + $0xd8] sm:$0xff]  }
  0xa2   :  { %v2199_v45 = vpop.eup %2198  ;;  %v129_v51 = vadd.f32 1e-06, %v113_v46  ;;  %v128_v57 = vadd.f32 1e-06, %v112_v47 }
  0xa3   :  { %v154_v48 = vmul.f32 %v2199_v45, %v2400_v2  ;;  %v92_v58 = vpop.xlane.xlu1 %91  ;;  %v90_v61 = vpop.xlane.xlu0 %89 }
  0xa4   :  { %2210 = vrsqrt.f32 %v129_v51  ;;  %v115_v1 = vmul.f32 0.0078125, %v92_v58  ;;  %v114_v8 = vmul.f32 0.0078125, %v90_v61 }
  0xa5   :  { %v176_v59 = vmul.f32 %v2590_v50, %v154_v48  ;;  %2212 = vrsqrt.f32 %v128_v57  ;;  %v2179_v48 = vld [vmem:[%s3655_s4 + $0x18] sm:$0xff]  }
  0xa6   :  { %v2201_v49 = vpop.eup %2200  ;;  %v131_v18 = vadd.f32 1e-06, %v115_v1  ;;  %v130_v21 = vadd.f32 1e-06, %v114_v8 }
  0xa7   :  { %v2203_v54 = vpop.eup %2202  ;;  %v155_v55 = vmul.f32 %v2201_v49, %v2404_v4  ;;  %v96_v22 = vpop.xlane.xlu1 %95  ;;  %v2181_v49 = vld [vmem:[%s3655_s4 + $0x98] sm:$0xff]  }
  0xa8   :  { %v2205_v56 = vpop.eup %2204  ;;  %v156_v63 = vmul.f32 %v2203_v54, %v2402_v3  ;;  %v94_v29 = vpop.xlane.xlu0 %93  ;;  %2214 = vrsqrt.f32 %v131_v18  ;;  %v117_v33 = vmul.f32 0.0078125, %v96_v22 }
  0xa9   :  { %v177_v60 = vmul.f32 %v2590_v50, %v155_v55  ;;  %v157_v0 = vmul.f32 %v2205_v56, %v2406_v5  ;;  %2216 = vrsqrt.f32 %v130_v21  ;;  %v116_v39 = vmul.f32 0.0078125, %v94_v29 }
  0xaa   :  { %v2207_v12 = vpop.eup %2206  ;;  %v178_v14 = vmul.f32 %v2590_v50, %v156_v63  ;;  %v133_v47 = vadd.f32 1e-06, %v117_v33 }
  0xab   :  { %v192_v62 = vpack.c.bf16 %v177_v60, %v176_v59  ;;  %v2209_v13 = vpop.eup %2208  ;;  %v179_v17 = vmul.f32 %v2590_v50, %v157_v0  ;;  %v159_v28 = vmul.f32 %v2207_v12, %v2431_v15  ;;  %v132_v51 = vadd.f32 1e-06, %v116_v39  ;;  %v100_v54 = vpop.xlane.xlu1 %99 }
  0xac   :  { %v158_v27 = vmul.f32 %v2209_v13, %v2433_v16  ;;  %v98_v58 = vpop.xlane.xlu0 %97  ;;  %2218 = vrsqrt.f32 %v133_v47  ;;  %v119_v59 = vmul.f32 0.0078125, %v100_v54  ;;  %v2182_v54 = vld [vmem:[%s3655_s4 + $0x60] sm:$0xff]  }
  0xad   :  { %447 = vmatmul.mubr.bf16.vlgmr.msra.gmra.mrb[0].mxu0 %v192_v62  ;;  %560 = vmatmul.mubr.bf16.vlgmr.msra.gmra.mrb[0].mxu1 %v192_v62  ;;  %v193_v32 = vpack.c.bf16 %v179_v17, %v178_v14  ;;  %v181_v45 = vmul.f32 %v2590_v50, %v159_v28  ;;  %2220 = vrsqrt.f32 %v132_v51  ;;  %v118_v60 = vmul.f32 0.0078125, %v98_v58  ;;  %v2187_v58 = vld [vmem:[%s3655_s4 + $0x28] sm:$0xff]  }
  0xae   :  { %456 = vmatprep.mubr.bf16.mxu0 %v2358_v10  ;;  %569 = vmatprep.mubr.bf16.mxu1 %v2358_v10  ;;  %v2211_v38 = vpop.eup %2210  ;;  %v180_v42 = vmul.f32 %v2590_v50, %v158_v27  ;;  %v135_v1 = vadd.f32 1e-06, %v119_v59  ;;  %v2189_v59 = vld [vmem:[%s3655_s4 + $0xa8] sm:$0xff]  }
  0xaf   :  { %1990 = vmatpush3.bf16.msra.mxu0 %v2167_v6  ;;  %2054 = vmatpush3.bf16.msra.mxu1 %v2169_v7  ;;  %v2213_v46 = vpop.eup %2212  ;;  %v161_v57 = vmul.f32 %v2211_v38, %v2457_v25  ;;  %v134_v6 = vadd.f32 1e-06, %v118_v60  ;;  %v104_v7 = vpop.xlane.xlu1 %103  ;;  %v2190_v60 = vld [vmem:[%s3655_s4 + $0x70] sm:$0xff]  }
  0xb0   :  { %1991 = vmatprep.subr.bf16.mxu0 %v2170_v9  ;;  %2055 = vmatprep.subr.bf16.mxu1 %v2172_v11  ;;  %v194_v55 = vpack.c.bf16 %v181_v45, %v180_v42  ;;  %v160_v56 = vmul.f32 %v2213_v46, %v2459_v26  ;;  %v102_v12 = vpop.xlane.xlu0 %101  ;;  %2222 = vrsqrt.f32 %v135_v1  ;;  %v121_v13 = vmul.f32 0.0078125, %v104_v7  ;;  %v2196_v1 = vld [vmem:[%s3655_s4 + $0xf8] sm:$0xff]  }
  0xb1   :  { %v183_v63 = vmul.f32 %v2590_v50, %v161_v57  ;;  %2224 = vrsqrt.f32 %v134_v6  ;;  %v120_v14 = vmul.f32 0.0078125, %v102_v12  ;;  %v2188_v57 = vld [vmem:[%s3655_s4 + $0xe8] sm:$0xff]   ;;  %v2195_v6 = vld [vmem:[%s3655_s4 + $0x38] sm:$0xff]  }
  0xb2   :  { %v2215_v61 = vpop.eup %2214  ;;  %v182_v62 = vmul.f32 %v2590_v50, %v160_v56  ;;  %v137_v21 = vadd.f32 1e-06, %v121_v13  ;;  %v2183_v56 = vld [vmem:[%s3655_s4 + $0x20] sm:$0xff]   ;;  %v2197_v7 = vld [vmem:[%s3655_s4 + $0xb8] sm:$0xff]  }
  0xb3   :  { %1992 = vmatpush3.bf16.msra.mxu0 %v2171_v19  ;;  %2056 = vmatpush3.bf16.msra.mxu1 %v2173_v20  ;;  %v2217_v0 = vpop.eup %2216  ;;  %v163_v11 = vmul.f32 %v2215_v61, %v2468_v30  ;;  %v136_v22 = vadd.f32 1e-06, %v120_v14  ;;  %v2192_v61 = vld [vmem:[%s3655_s4 + $0xf0] sm:$0xff]   ;;  %v232_v13 = vld [vmem:[%s3657_s3] sm:$0xf] }
  0xb4   :  { %1993 = vmatprep.subr.bf16.mxu0 %v2174_v23  ;;  %2057 = vmatprep.subr.bf16.mxu1 %v2176_v24  ;;  %v195_v8 = vpack.c.bf16 %v183_v63, %v182_v62  ;;  %v162_v9 = vmul.f32 %v2217_v0, %v2470_v31  ;;  %2226 = vrsqrt.f32 %v137_v21  ;;  %v2191_v62 = vld [vmem:[%s3655_s4 + $0x30] sm:$0xff]   ;;  %v2194_v0 = vld [vmem:[%s3655_s4 + $0x78] sm:$0xff]  }
  0xb5   :  { %457 = vmatmul.mubr.bf16.gmra.mrb[4].mxu0 %v193_v32  ;;  %570 = vmatmul.mubr.bf16.gmra.mrb[4].mxu1 %v193_v32  ;;  %v185_v19 = vmul.f32 %v2590_v50, %v163_v11  ;;  %2228 = vrsqrt.f32 %v136_v22  ;;  %v2193_v63 = vld [vmem:[%s3655_s4 + $0xb0] sm:$0xff]  }
  0xb6   :  { %466 = vmatprep.mubr.bf16.mxu0 %v2358_v10  ;;  %579 = vmatprep.mubr.bf16.mxu1 %v2358_v10  ;;  %v2219_v17 = vpop.eup %2218  ;;  %v184_v18 = vmul.f32 %v2590_v50, %v162_v9 }
  0xb7   :  { %1994 = vmatpush3.bf16.msra.mxu0 %v2175_v36  ;;  %2058 = vmatpush3.bf16.msra.mxu1 %v2177_v37  ;;  %v2221_v20 = vpop.eup %2220  ;;  %v165_v27 = vmul.f32 %v2219_v17, %v2476_v34 }
  0xb8   :  { %1995 = vmatprep.subr.bf16.mxu0 %v2178_v40  ;;  %2059 = vmatprep.subr.bf16.mxu1 %v2180_v41  ;;  %v196_v23 = vpack.c.bf16 %v185_v19, %v184_v18  ;;  %v164_v24 = vmul.f32 %v2221_v20, %v2478_v35 }
  0xb9   :  { %v187_v32 = vmul.f32 %v2590_v50, %v165_v27 }
  0xba   :  { %v2223_v28 = vpop.eup %2222  ;;  %v186_v29 = vmul.f32 %v2590_v50, %v164_v24 }
  0xbb   :  { %1996 = vmatpush3.bf16.msra.mxu0 %v2179_v48  ;;  %2060 = vmatpush3.bf16.msra.mxu1 %v2181_v49  ;;  %v2225_v33 = vpop.eup %2224  ;;  %v167_v38 = vmul.f32 %v2223_v28, %v2499_v43 }
  0xbc   :  { %v197_v36 = vpack.c.bf16 %v187_v32, %v186_v29  ;;  %v166_v37 = vmul.f32 %v2225_v33, %v2501_v44  ;;  %1997 = vmatprep.subr.bf16.mxu0 %v2182_v54 }
  0xbd   :  { %467 = vmatmul.mubr.bf16.gmra.mrb[8].mxu0 %v194_v55  ;;  %580 = vmatmul.mubr.bf16.gmra.mrb[8].mxu1 %v194_v55  ;;  %v189_v41 = vmul.f32 %v2590_v50, %v167_v38  ;;  %v2184_v55 = vld [vmem:[%s3655_s4 + $0xe0] sm:$0xff]  }
  0xbe   :  { %476 = vmatprep.mubr.bf16.mxu0 %v2358_v10  ;;  %589 = vmatprep.mubr.bf16.mxu1 %v2358_v10  ;;  %v2227_v39 = vpop.eup %2226  ;;  %v188_v40 = vmul.f32 %v2590_v50, %v166_v37 }
  0xbf   :  { %v2229_v42 = vpop.eup %2228  ;;  %v169_v47 = vmul.f32 %v2227_v39, %v2522_v52  ;;  %2061 = vmatprep.subr.bf16.mxu1 %v2184_v55  ;;  %1998 = vmatpush3.bf16.msra.mxu0 %v2183_v56 }
  0xc0   :  { %v198_v45 = vpack.c.bf16 %v189_v41, %v188_v40  ;;  %v168_v46 = vmul.f32 %v2229_v42, %v2524_v53 }
  0xc1   :  { %v191_v49 = vmul.f32 %v2590_v50, %v169_v47 }
  0xc2   :  { %v190_v48 = vmul.f32 %v2590_v50, %v168_v46  ;;  %v2185_v50 = vld [vmem:[%s3655_s4 + $0xa0] sm:$0xff]  }
  0xc3   :  { %2062 = vmatpush3.bf16.msra.mxu1 %v2185_v50 }
  0xc4   :  { %v199_v51 = vpack.c.bf16 %v191_v49, %v190_v48  ;;  %2063 = vmatprep.subr.bf16.mxu1 %v2188_v57 }
  0xc5   :  { %477 = vmatmul.mubr.bf16.gmra.mrb[12].mxu0 %v195_v8  ;;  %590 = vmatmul.mubr.bf16.gmra.mrb[12].mxu1 %v195_v8  ;;  %v234_v8 = vlaneseq }
  0xc6   :  { %486 = vmatprep.mubr.bf16.mxu0 %v2358_v10  ;;  %599 = vmatprep.mubr.bf16.mxu1 %v2358_v10 }
  0xc7   :  { %2064 = vmatpush3.bf16.msra.mxu1 %v2189_v59  ;;  %v235_v9 = vshrl.u32 %v234_v8, 7 }
  0xc8   :  { %2065 = vmatprep.subr.bf16.mxu1 %v2192_v61 }
  0xc9   :  { %v236_v11 = vsub.s32 0, %v235_v9  ;;  %v244_v12 = vsub.s32 2, %v235_v9  ;;  %v240_v14 = vsub.s32 1, %v235_v9  ;;  %v248_v17 = vsub.s32 3, %v235_v9 }
  0xcb   :  { %2066 = vmatpush3.bf16.msra.mxu1 %v2193_v63  ;;  %v2730_v18 = vrot.slane %v232_v13, %v236_v11  ;;  %v2732_v19 = vrot.slane %v232_v13, %v244_v12  ;;  %v2734_v20 = vrot.slane %v232_v13, %v240_v14  ;;  %v2736_v21 = vrot.slane %v232_v13, %v248_v17 }
  0xcc   :  { %2067 = vmatprep.subr.bf16.mxu1 %v2196_v1 }
  0xcd   :  { %487 = vmatmul.mubr.bf16.gmra.mrb[16].mxu0 %v196_v23  ;;  %600 = vmatmul.mubr.bf16.gmra.mrb[16].mxu1 %v196_v23 }
  0xce   :  { %496 = vmatprep.mubr.bf16.mxu0 %v2358_v10  ;;  %609 = vmatprep.mubr.bf16.mxu1 %v2358_v10 }
  0xcf   :  { %2068 = vmatpush3.bf16.msra.mxu1 %v2197_v7 }
  0xd5   :  { %497 = vmatmul.mubr.bf16.gmra.mrb[20].mxu0 %v197_v36  ;;  %610 = vmatmul.mubr.bf16.gmra.mrb[20].mxu1 %v197_v36 }
  0xd6   :  { %506 = vmatprep.mubr.bf16.mxu0 %v2358_v10  ;;  %619 = vmatprep.mubr.bf16.mxu1 %v2358_v10 }
  0xdd   :  { %507 = vmatmul.mubr.bf16.gmra.mrb[24].mxu0 %v198_v45  ;;  %620 = vmatmul.mubr.bf16.gmra.mrb[24].mxu1 %v198_v45 }
  0xde   :  { %516 = vmatprep.mubr.bf16.mxu0 %v2358_v10  ;;  %629 = vmatprep.mubr.bf16.mxu1 %v2358_v10  ;;  %v2186_v10 = vld [vmem:[%s3655_s4 + $0x68] sm:$0xff]  }
  0xdf   :  { %1999 = vmatprep.subr.bf16.mxu0 %v2186_v10 }
  0xe0   :  { %2000 = vmatpush3.bf16.msra.mxu0 %v2187_v58 }
  0xe1   :  { %2001 = vmatprep.subr.bf16.mxu0 %v2190_v60 }
  0xe4   :  { %2002 = vmatpush3.bf16.msra.mxu0 %v2191_v62 }
  0xe5   :  { %517 = vmatmul.mubr.bf16.gmra.mrb[28].mxu0 %v199_v51  ;;  %630 = vmatmul.mubr.bf16.gmra.mrb[28].mxu1 %v199_v51 }
  0xe6   :  { %2003 = vmatprep.subr.bf16.mxu0 %v2194_v0 }
  0xe8   :  { %2004 = vmatpush3.bf16.msra.mxu0 %v2195_v6 }
 0x180   :  { %v448_v22 = vpop.f32.mrb[0].mxu0  ;;  %v561_v23 = vpop.f32.mrb[0].mxu1 }
 0x181   :  { %v2739_v24 = vadd.f32 %v448_v22, %v2730_v18  ;;  %v2742_v27 = vadd.f32 %v561_v23, %v2732_v19  ;;  %v450_v28 = vpop.f32.mrb[1].mxu0  ;;  %v563_v29 = vpop.f32.mrb[1].mxu1 }
 0x182   :  { %v2745_v32 = vadd.f32 %v450_v28, %v2734_v20  ;;  %v2748_v33 = vadd.f32 %v563_v29, %v2736_v21  ;;  %v452_v36 = vpop.f32.mrb[2].mxu0  ;;  %v565_v37 = vpop.f32.mrb[2].mxu1 }
 0x183   :  { %v640_v38 = vmul.f32 %v2739_v24, %v2739_v24  ;;  %v642_v39 = vmul.f32 %v2742_v27, %v2742_v27  ;;  %v2755_v40 = vadd.f32 %v452_v36, %v2730_v18  ;;  %v2758_v41 = vadd.f32 %v565_v37, %v2732_v19  ;;  %v454_v42 = vpop.f32.mrb[3].mxu0  ;;  %v567_v45 = vpop.f32.mrb[3].mxu1 }
 0x184   :  { %v641_v46 = vmul.f32 %v2745_v32, %v2745_v32  ;;  %v643_v47 = vmul.f32 %v2748_v33, %v2748_v33  ;;  %v2765_v48 = vadd.f32 %v454_v42, %v2734_v20  ;;  %v2768_v49 = vadd.f32 %v567_v45, %v2736_v21 }
 0x185   :  { %v704_v51 = vmul.f32 %v640_v38, %v2739_v24  ;;  %v706_v54 = vmul.f32 %v642_v39, %v2742_v27  ;;  %v644_v55 = vmul.f32 %v2755_v40, %v2755_v40  ;;  %v646_v56 = vmul.f32 %v2758_v41, %v2758_v41 }
 0x186   :  { %v705_v50 = vmul.f32 %v641_v46, %v2745_v32  ;;  %v707_v10 = vmul.f32 %v643_v47, %v2748_v33  ;;  %v645_v57 = vmul.f32 %v2765_v48, %v2765_v48  ;;  %v647_v58 = vmul.f32 %v2768_v49, %v2768_v49 }
 0x187   :  { %v768_v59 = vmul.f32 0.044715, %v704_v51  ;;  %v770_v60 = vmul.f32 0.044715, %v706_v54  ;;  %v708_v61 = vmul.f32 %v644_v55, %v2755_v40  ;;  %v710_v62 = vmul.f32 %v646_v56, %v2758_v41 }
 0x188   :  { %v769_v63 = vmul.f32 0.044715, %v705_v50  ;;  %v771_v0 = vmul.f32 0.044715, %v707_v10  ;;  %v709_v1 = vmul.f32 %v645_v57, %v2765_v48  ;;  %v711_v6 = vmul.f32 %v647_v58, %v2768_v49  ;;  %v458_v7 = vpop.f32.mrb[4].mxu0  ;;  %v571_v8 = vpop.f32.mrb[4].mxu1 }
 0x189   :  { %v832_v9 = vadd.f32 %v768_v59, %v2739_v24  ;;  %v834_v11 = vadd.f32 %v770_v60, %v2742_v27  ;;  %v772_v12 = vmul.f32 0.044715, %v708_v61  ;;  %v774_v13 = vmul.f32 0.044715, %v710_v62  ;;  %v460_v14 = vpop.f32.mrb[5].mxu0  ;;  %v573_v17 = vpop.f32.mrb[5].mxu1 }
 0x18a   :  { %v833_v22 = vadd.f32 %v769_v63, %v2745_v32  ;;  %v835_v23 = vadd.f32 %v771_v0, %v2748_v33  ;;  %v773_v28 = vmul.f32 0.044715, %v709_v1  ;;  %v775_v29 = vmul.f32 0.044715, %v711_v6  ;;  %v462_v36 = vpop.f32.mrb[6].mxu0  ;;  %v575_v37 = vpop.f32.mrb[6].mxu1 }
 0x18b   :  { %v896_v38 = vmul.f32 0.7978846, %v832_v9  ;;  %v898_v39 = vmul.f32 0.7978846, %v834_v11  ;;  %v836_v42 = vadd.f32 %v772_v12, %v2755_v40  ;;  %v838_v45 = vadd.f32 %v774_v13, %v2758_v41  ;;  %v464_v46 = vpop.f32.mrb[7].mxu0  ;;  %v577_v47 = vpop.f32.mrb[7].mxu1 }
 0x18c   :  { %v897_v51 = vmul.f32 0.7978846, %v833_v22  ;;  %v899_v54 = vmul.f32 0.7978846, %v835_v23  ;;  %v837_v55 = vadd.f32 %v773_v28, %v2765_v48  ;;  %v839_v56 = vadd.f32 %v775_v29, %v2768_v49 }
 0x18d   :  { %2230 = vtanh.f32 %v896_v38  ;;  %v900_v50 = vmul.f32 0.7978846, %v836_v42  ;;  %v902_v10 = vmul.f32 0.7978846, %v838_v45  ;;  %v2795_v57 = vadd.f32 %v458_v7, %v2730_v18 }
 0x18e   :  { %2232 = vtanh.f32 %v898_v39  ;;  %v901_v58 = vmul.f32 0.7978846, %v837_v55  ;;  %v903_v59 = vmul.f32 0.7978846, %v839_v56  ;;  %v2798_v60 = vadd.f32 %v571_v8, %v2732_v19 }
 0x18f   :  { %3731 = vst [vmem:[#allocation18_spill] sm:$0xff] %v2795_v57  ;;  %2234 = vtanh.f32 %v897_v51  ;;  %v648_v61 = vmul.f32 %v2795_v57, %v2795_v57  ;;  %v2803_v62 = vadd.f32 %v460_v14, %v2734_v20  ;;  %v2806_v63 = vadd.f32 %v573_v17, %v2736_v21 }
 0x190   :  { %3732 = vst [vmem:[#allocation19_spill] sm:$0xff] %v2798_v60  ;;  %2236 = vtanh.f32 %v899_v54  ;;  %v650_v0 = vmul.f32 %v2798_v60, %v2798_v60  ;;  %v2811_v1 = vadd.f32 %v462_v36, %v2730_v18  ;;  %v2814_v6 = vadd.f32 %v575_v37, %v2732_v19  ;;  %v2816_v7 = vpop.f32.mrb[8].mxu0  ;;  %v2818_v8 = vpop.f32.mrb[8].mxu1 }
 0x191   :  { %3733 = vst [vmem:[#allocation20_spill] sm:$0xff] %v2806_v63  ;;  %2238 = vtanh.f32 %v900_v50  ;;  %v712_v9 = vmul.f32 %v648_v61, %v2795_v57  ;;  %v649_v11 = vmul.f32 %v2803_v62, %v2803_v62  ;;  %v651_v12 = vmul.f32 %v2806_v63, %v2806_v63  ;;  %v2825_v13 = vpop.f32.mrb[9].mxu0  ;;  %v2827_v14 = vpop.f32.mrb[9].mxu1 }
 0x192   :  { %3734 = vst [vmem:[#allocation21_spill] sm:$0xff] %v2811_v1  ;;  %3735 = vst [vmem:[#allocation22_spill] sm:$0xff] %v2814_v6  ;;  %2240 = vtanh.f32 %v902_v10  ;;  %v714_v17 = vmul.f32 %v650_v0, %v2798_v60  ;;  %v652_v22 = vmul.f32 %v2811_v1, %v2811_v1  ;;  %v654_v23 = vmul.f32 %v2814_v6, %v2814_v6  ;;  %v2834_v28 = vpop.f32.mrb[10].mxu0  ;;  %v2836_v29 = vpop.f32.mrb[10].mxu1 }
 0x193   :  { %2242 = vtanh.f32 %v901_v58  ;;  %v776_v36 = vmul.f32 0.044715, %v712_v9  ;;  %v713_v37 = vmul.f32 %v649_v11, %v2803_v62  ;;  %v715_v38 = vmul.f32 %v651_v12, %v2806_v63  ;;  %v2840_v39 = vpop.f32.mrb[11].mxu0  ;;  %v2842_v42 = vpop.f32.mrb[11].mxu1 }
 0x194   :  { %2244 = vtanh.f32 %v903_v59  ;;  %v778_v45 = vmul.f32 0.044715, %v714_v17  ;;  %v716_v51 = vmul.f32 %v652_v22, %v2811_v1  ;;  %v718_v54 = vmul.f32 %v654_v23, %v2814_v6 }
 0x195   :  { %v840_v55 = vadd.f32 %v776_v36, %v2795_v57  ;;  %v777_v56 = vmul.f32 0.044715, %v713_v37  ;;  %v779_v50 = vmul.f32 0.044715, %v715_v38  ;;  %v2848_v10 = vadd.f32 %v464_v46, %v2734_v20 }
 0x196   :  { %v842_v58 = vadd.f32 %v778_v45, %v2798_v60  ;;  %v780_v61 = vmul.f32 0.044715, %v716_v51  ;;  %v782_v0 = vmul.f32 0.044715, %v718_v54  ;;  %v2852_v9 = vadd.f32 %v577_v47, %v2736_v21 }
 0x197   :  { %3736 = vst [vmem:[#allocation23_spill] sm:$0xff] %v2848_v10  ;;  %v2231_v59 = vpop.eup %2230  ;;  %v904_v11 = vmul.f32 0.7978846, %v840_v55  ;;  %v841_v12 = vadd.f32 %v777_v56, %v2803_v62  ;;  %v843_v17 = vadd.f32 %v779_v50, %v2806_v63  ;;  %v653_v22 = vmul.f32 %v2848_v10, %v2848_v10 }
 0x198   :  { %3737 = vst [vmem:[#allocation24_spill] sm:$0xff] %v2852_v9  ;;  %v2233_v23 = vpop.eup %2232  ;;  %v1024_v36 = vadd.f32 1.0, %v2231_v59  ;;  %v906_v46 = vmul.f32 0.7978846, %v842_v58  ;;  %v844_v37 = vadd.f32 %v780_v61, %v2811_v1  ;;  %v846_v38 = vadd.f32 %v782_v0, %v2814_v6  ;;  %v2860_v45 = vpop.f32.mrb[12].mxu0 }
 0x199   :  { %v2862_v47 = vpop.f32.mrb[12].mxu1  ;;  %v2864_v51 = vpop.eup %2234  ;;  %v1026_v54 = vadd.f32 1.0, %v2233_v23  ;;  %2246 = vtanh.f32 %v904_v11  ;;  %v905_v55 = vmul.f32 0.7978846, %v841_v12  ;;  %v907_v56 = vmul.f32 0.7978846, %v843_v17 }
 0x19a   :  { %v2866_v50 = vpop.f32.mrb[13].mxu0  ;;  %v2868_v52 = vpop.eup %2236  ;;  %v1088_v59 = vmul.f32 0.5, %v1024_v36  ;;  %2248 = vtanh.f32 %v906_v46  ;;  %v908_v58 = vmul.f32 0.7978846, %v844_v37  ;;  %v910_v61 = vmul.f32 0.7978846, %v846_v38 }
 0x19b   :  { %v2870_v53 = vpop.f32.mrb[13].mxu1  ;;  %v2239_v0 = vpop.eup %2238  ;;  %v1090_v43 = vmul.f32 0.5, %v1026_v54  ;;  %2250 = vtanh.f32 %v905_v55  ;;  %v717_v44 = vmul.f32 %v653_v22, %v2848_v10  ;;  %v655_v11 = vmul.f32 %v2852_v9, %v2852_v9 }
 0x19c   :  { %v2875_v12 = vpop.f32.mrb[14].mxu0  ;;  %v2877_v17 = vpop.f32.mrb[14].mxu1  ;;  %v2880_v36 = vmul.f32 %v1088_v59, %v2739_v24  ;;  %v1028_v46 = vadd.f32 1.0, %v2239_v0  ;;  %2252 = vtanh.f32 %v907_v56  ;;  %v2884_v37 = vadd.f32 %v2816_v7, %v2730_v18 }
 0x19d   :  { %v2241_v23 = vpop.eup %2240  ;;  %v2886_v38 = vpop.f32.mrb[15].mxu0  ;;  %v2893_v55 = vmul.f32 %v1090_v43, %v2742_v27  ;;  %2254 = vtanh.f32 %v908_v58  ;;  %v781_v35 = vmul.f32 0.044715, %v717_v44  ;;  %v719_v56 = vmul.f32 %v655_v11, %v2852_v9 }
 0x19e   :  { %3738 = vst [vmem:[#allocation25_spill] sm:$0xff] %v2884_v37  ;;  %v2888_v22 = vpop.f32.mrb[15].mxu1  ;;  %v2890_v54 = vpop.eup %2242  ;;  %v1030_v34 = vadd.f32 1.0, %v2241_v23  ;;  %v1092_v59 = vmul.f32 0.5, %v1028_v46  ;;  %2256 = vtanh.f32 %v910_v61  ;;  %v656_v7 = vmul.f32 %v2884_v37, %v2884_v37 }
 0x19f   :  { %v2895_v24 = vpop.eup %2244  ;;  %v845_v30 = vadd.f32 %v781_v35, %v2848_v10  ;;  %v2903_v31 = vadd.f32 %v2818_v8, %v2732_v19  ;;  %v2907_v43 = vadd.f32 %v2825_v13, %v2734_v20  ;;  %v783_v27 = vmul.f32 0.044715, %v719_v56 }
 0x1a0   :  { %v1094_v0 = vmul.f32 0.5, %v1030_v34  ;;  %v2910_v44 = vmul.f32 %v1092_v59, %v2755_v40  ;;  %v720_v58 = vmul.f32 %v656_v7, %v2884_v37  ;;  %v2915_v61 = vadd.f32 %v2827_v14, %v2736_v21  ;;  %v2917_v34 = vpop.f32.mrb[16].mxu0  ;;  %v2919_v35 = vpop.f32.mrb[16].mxu1 }
 0x1a1   :  { %3739 = vst [vmem:[#allocation26_spill] sm:$0xff] %v2903_v31  ;;  %3740 = vst [vmem:[#allocation27_spill] sm:$0xff] %v2907_v43  ;;  %v909_v11 = vmul.f32 0.7978846, %v845_v30  ;;  %v658_v13 = vmul.f32 %v2903_v31, %v2903_v31  ;;  %v657_v40 = vmul.f32 %v2907_v43, %v2907_v43  ;;  %v2928_v23 = vpop.f32.mrb[17].mxu0  ;;  %v2930_v46 = vpop.f32.mrb[17].mxu1  ;;  %v847_v59 = vadd.f32 %v783_v27, %v2852_v9 }
 0x1a2   :  { %3741 = vst [vmem:[#allocation28_spill] sm:$0xff] %v2915_v61  ;;  %v2922_v8 = vmul.f32 %v1094_v0, %v2758_v41  ;;  %v784_v56 = vmul.f32 0.044715, %v720_v58  ;;  %v659_v41 = vmul.f32 %v2915_v61, %v2915_v61  ;;  %v2937_v30 = vpop.f32.mrb[18].mxu0  ;;  %v2939_v7 = vpop.f32.mrb[18].mxu1  ;;  %v2957_v4 = vadd.f32 %v2834_v28, %v2730_v18 }
 0x1a3   :  { %v2941_v0 = vpop.eup %2246  ;;  %2258 = vtanh.f32 %v909_v11  ;;  %v722_v26 = vmul.f32 %v658_v13, %v2903_v31  ;;  %v721_v14 = vmul.f32 %v657_v40, %v2907_v43  ;;  %v2947_v15 = vpop.f32.mrb[19].mxu0  ;;  %v911_v16 = vmul.f32 0.7978846, %v847_v59 }
 0x1a4   :  { %v2949_v27 = vpop.f32.mrb[19].mxu1  ;;  %v2951_v58 = vpop.eup %2248  ;;  %v848_v5 = vadd.f32 %v784_v56, %v2884_v37  ;;  %v723_v3 = vmul.f32 %v659_v41, %v2915_v61  ;;  %3743 = vst [vmem:[#allocation30_spill] sm:$0xff] %v2957_v4  ;;  %v2963_v40 = vadd.f32 %v2836_v29, %v2732_v19  ;;  %v2967_v2 = vadd.f32 %v2840_v39, %v2734_v20 }
 0x1a5   :  { %3742 = vst [vmem:[#allocation29_spill] sm:$0xff] %v2951_v58  ;;  %v2959_v11 = vpop.eup %2250  ;;  %v786_v13 = vmul.f32 0.044715, %v722_v26  ;;  %v785_v25 = vmul.f32 0.044715, %v721_v14  ;;  %2260 = vtanh.f32 %v911_v16  ;;  %v660_v28 = vmul.f32 %v2957_v4, %v2957_v4 }
 0x1a6   :  { %3744 = vst [vmem:[#allocation31_spill] sm:$0xff] %v2963_v40  ;;  %3745 = vst [vmem:[#allocation32_spill] sm:$0xff] %v2967_v2  ;;  %v2969_v59 = vpop.eup %2252  ;;  %v912_v56 = vmul.f32 0.7978846, %v848_v5  ;;  %v787_v41 = vmul.f32 0.044715, %v723_v3  ;;  %v662_v29 = vmul.f32 %v2963_v40, %v2963_v40  ;;  %v661_v39 = vmul.f32 %v2967_v2, %v2967_v2 }
 0x1a7   :  { %v2973_v37 = vpop.eup %2254  ;;  %v850_v26 = vadd.f32 %v786_v13, %v2903_v31  ;;  %v849_v14 = vadd.f32 %v785_v25, %v2907_v43  ;;  %v724_v5 = vmul.f32 %v660_v28, %v2957_v4  ;;  %v2987_v16 = vadd.f32 %v2842_v42, %v2736_v21 }
 0x1a8   :  { %3746 = vst [vmem:[#allocation33_spill] sm:$0xff] %v2973_v37  ;;  %v2981_v6 = vpop.eup %2256  ;;  %2262 = vtanh.f32 %v912_v56  ;;  %v851_v3 = vadd.f32 %v787_v41, %v2915_v61  ;;  %v2989_v13 = vpop.f32.mrb[20].mxu0  ;;  %v726_v60 = vmul.f32 %v662_v29, %v2963_v40  ;;  %v725_v1 = vmul.f32 %v661_v39, %v2967_v2 }
 0x1a9   :  { %3747 = vst [vmem:[#allocation34_spill] sm:$0xff] %v2981_v6  ;;  %3748 = vst [vmem:[#allocation35_spill] sm:$0xff] %v2987_v16  ;;  %v2991_v25 = vpop.f32.mrb[20].mxu1  ;;  %v914_v31 = vmul.f32 0.7978846, %v850_v26  ;;  %v2995_v57 = vpop.f32.mrb[21].mxu0  ;;  %v663_v42 = vmul.f32 %v2987_v16, %v2987_v16  ;;  %v3003_v61 = vadd.f32 %v2860_v45, %v2730_v18  ;;  %v3011_v39 = vadd.f32 %v2862_v47, %v2732_v19 }
 0x1aa   :  { %v913_v43 = vmul.f32 0.7978846, %v849_v14  ;;  %v2997_v56 = vpop.f32.mrb[21].mxu1  ;;  %v915_v41 = vmul.f32 0.7978846, %v851_v3  ;;  %v3005_v6 = vpop.f32.mrb[22].mxu0 }
 0x1ab   :  { %v788_v28 = vmul.f32 0.044715, %v724_v5  ;;  %3749 = vst [vmem:[#allocation36_spill] sm:$0xff] %v3003_v61  ;;  %v3007_v26 = vpop.f32.mrb[22].mxu1  ;;  %2264 = vtanh.f32 %v914_v31  ;;  %v790_v14 = vmul.f32 0.044715, %v726_v60  ;;  %v727_v45 = vmul.f32 %v663_v42, %v2987_v16 }
 0x1ac   :  { %v789_v29 = vmul.f32 0.044715, %v725_v1  ;;  %3750 = vst [vmem:[#allocation37_spill] sm:$0xff] %v3011_v39  ;;  %v3013_v3 = vpop.f32.mrb[23].mxu0  ;;  %v3015_v5 = vpop.f32.mrb[23].mxu1  ;;  %2266 = vtanh.f32 %v913_v43  ;;  %v664_v9 = vmul.f32 %v3003_v61, %v3003_v61  ;;  %v666_v1 = vmul.f32 %v3011_v39, %v3011_v39 }
 0x1ad   :  { %v852_v58 = vadd.f32 %v788_v28, %v2957_v4  ;;  %v3021_v37 = vpop.eup %2258  ;;  %2268 = vtanh.f32 %v915_v41  ;;  %v854_v31 = vadd.f32 %v790_v14, %v2963_v40  ;;  %v791_v63 = vmul.f32 0.044715, %v727_v45 }
 0x1ae   :  { %v853_v60 = vadd.f32 %v789_v29, %v2967_v2  ;;  %v728_v43 = vmul.f32 %v664_v9, %v3003_v61  ;;  %v3030_v28 = vadd.f32 %v2866_v50, %v2734_v20  ;;  %v730_v10 = vmul.f32 %v666_v1, %v3011_v39 }
 0x1af   :  { %v916_v47 = vmul.f32 0.7978846, %v852_v58  ;;  %v918_v42 = vmul.f32 0.7978846, %v854_v31  ;;  %v3035_v41 = vadd.f32 %v2870_v53, %v2736_v21  ;;  %v3037_v14 = vpop.eup %2260  ;;  %v855_v58 = vadd.f32 %v791_v63, %v2987_v16 }
 0x1b0   :  { %3751 = vst [vmem:[#allocation38_spill] sm:$0xff] %v3030_v28  ;;  %v917_v4 = vmul.f32 0.7978846, %v853_v60  ;;  %v792_v29 = vmul.f32 0.044715, %v728_v43  ;;  %v665_v9 = vmul.f32 %v3030_v28, %v3030_v28  ;;  %v3042_v45 = vpop.f32.mrb[24].mxu0  ;;  %v3050_v53 = vadd.f32 %v2875_v12, %v2730_v18 }
 0x1b1   :  { %3752 = vst [vmem:[#allocation39_spill] sm:$0xff] %v3035_v41  ;;  %2270 = vtanh.f32 %v916_v47  ;;  %v3044_v50 = vpop.f32.mrb[24].mxu1  ;;  %v794_v31 = vmul.f32 0.044715, %v730_v10  ;;  %v667_v60 = vmul.f32 %v3035_v41, %v3035_v41  ;;  %v3052_v1 = vpop.f32.mrb[25].mxu0 }
 0x1b2   :  { %2272 = vtanh.f32 %v918_v42  ;;  %3753 = vst [vmem:[#allocation40_spill] sm:$0xff] %v3050_v53  ;;  %3754 = vst [vmem:[#allocation41_spill] sm:$0xff] %v3052_v1  ;;  %v3054_v63 = vpop.f32.mrb[25].mxu1  ;;  %v3056_v47 = vpop.eup %2262  ;;  %v919_v43 = vmul.f32 0.7978846, %v855_v58  ;;  %v856_v40 = vadd.f32 %v792_v29, %v3003_v61  ;;  %v729_v42 = vmul.f32 %v665_v9, %v3030_v28 }
 0x1b3   :  { %3755 = vst [vmem:[#allocation42_spill] sm:$0xff] %v3056_v47  ;;  %2274 = vtanh.f32 %v917_v4  ;;  %v3060_v10 = vpop.f32.mrb[26].mxu0  ;;  %v3062_v16 = vpop.f32.mrb[26].mxu1  ;;  %v858_v2 = vadd.f32 %v794_v31, %v3011_v39  ;;  %v731_v12 = vmul.f32 %v667_v60, %v3035_v41  ;;  %v668_v1 = vmul.f32 %v3050_v53, %v3050_v53 }
 0x1b4   :  { %3756 = vst [vmem:[#allocation43_spill] sm:$0xff] %v3060_v10  ;;  %3757 = vst [vmem:[#allocation44_spill] sm:$0xff] %v3062_v16  ;;  %v3070_v47 = vadd.f32 %v2877_v17, %v2732_v19  ;;  %v3072_v4 = vpop.f32.mrb[27].mxu0  ;;  %v3074_v58 = vpop.f32.mrb[27].mxu1  ;;  %2276 = vtanh.f32 %v919_v43  ;;  %v920_v29 = vmul.f32 0.7978846, %v856_v40  ;;  %v3078_v61 = vadd.f32 %v2886_v38, %v2734_v20 }
 0x1b5   :  { %v793_v9 = vmul.f32 0.044715, %v729_v42  ;;  %v3080_v31 = vpop.eup %2264  ;;  %v922_v60 = vmul.f32 0.7978846, %v858_v2  ;;  %v795_v39 = vmul.f32 0.044715, %v731_v12  ;;  %v732_v16 = vmul.f32 %v668_v1, %v3050_v53 }
 0x1b6   :  { %3758 = vst [vmem:[#allocation45_spill] sm:$0xff] %v3070_v47  ;;  %3759 = vst [vmem:[#allocation46_spill] sm:$0xff] %v3078_v61  ;;  %v670_v17 = vmul.f32 %v3070_v47, %v3070_v47  ;;  %v3085_v10 = vpop.eup %2266  ;;  %2278 = vtanh.f32 %v920_v29  ;;  %v669_v40 = vmul.f32 %v3078_v61, %v3078_v61  ;;  %v3092_v38 = vadd.f32 %v2888_v22, %v2736_v21 }
 0x1b7   :  { %3760 = vst [vmem:[#allocation47_spill] sm:$0xff] %v3080_v31  ;;  %3761 = vst [vmem:[#allocation48_spill] sm:$0xff] %v3085_v10  ;;  %v857_v43 = vadd.f32 %v793_v9, %v3030_v28  ;;  %v3094_v42 = vpop.eup %2268  ;;  %2280 = vtanh.f32 %v922_v60  ;;  %v859_v2 = vadd.f32 %v795_v39, %v3035_v41  ;;  %v796_v1 = vmul.f32 0.044715, %v732_v16 }
 0x1b8   :  { %3762 = vst [vmem:[#allocation49_spill] sm:$0xff] %v3092_v38  ;;  %v734_v12 = vmul.f32 %v670_v17, %v3070_v47  ;;  %v733_v29 = vmul.f32 %v669_v40, %v3078_v61  ;;  %v671_v9 = vmul.f32 %v3092_v38, %v3092_v38  ;;  %v3103_v28 = vadd.f32 %v2917_v34, %v2730_v18  ;;  %v3105_v22 = vpop.f32.mrb[28].mxu0  ;;  %v3107_v10 = vpop.f32.mrb[28].mxu1 }
 0x1b9   :  { %v921_v31 = vmul.f32 0.7978846, %v857_v43  ;;  %3764 = vst [vmem:[#allocation51_spill] sm:$0xff] %v3105_v22  ;;  %3765 = vst [vmem:[#allocation52_spill] sm:$0xff] %v3107_v10  ;;  %v923_v60 = vmul.f32 0.7978846, %v859_v2  ;;  %v860_v39 = vadd.f32 %v796_v1, %v3050_v53  ;;  %v3112_v17 = vadd.f32 %v2919_v35, %v2732_v19 }
 0x1ba   :  { %3763 = vst [vmem:[#allocation50_spill] sm:$0xff] %v3103_v28  ;;  %v798_v16 = vmul.f32 0.044715, %v734_v12  ;;  %v3114_v43 = vpop.f32.mrb[29].mxu0  ;;  %v3116_v40 = vpop.f32.mrb[29].mxu1  ;;  %v735_v22 = vmul.f32 %v671_v9, %v3092_v38  ;;  %v672_v2 = vmul.f32 %v3103_v28, %v3103_v28 }
 0x1bb   :  { %3766 = vst [vmem:[#allocation53_spill] sm:$0xff] %v3112_v17  ;;  %3767 = vst [vmem:[#allocation54_spill] sm:$0xff] %v3114_v43  ;;  %v3118_v41 = vpop.eup %2270  ;;  %2282 = vtanh.f32 %v921_v31  ;;  %v797_v34 = vmul.f32 0.044715, %v733_v29  ;;  %v3123_v10 = vpop.f32.mrb[30].mxu0 }
 0x1bc   :  { %3768 = vst [vmem:[#allocation55_spill] sm:$0xff] %v3116_v40  ;;  %3769 = vst [vmem:[#allocation56_spill] sm:$0xff] %v3123_v10  ;;  %v3125_v1 = vpop.f32.mrb[30].mxu1  ;;  %v3127_v12 = vpop.eup %2272  ;;  %2284 = vtanh.f32 %v923_v60  ;;  %v924_v35 = vmul.f32 0.7978846, %v860_v39  ;;  %v862_v53 = vadd.f32 %v798_v16, %v3070_v47  ;;  %v674_v40 = vmul.f32 %v3112_v17, %v3112_v17 }
 0x1bd   :  { %3770 = vst [vmem:[#allocation57_spill] sm:$0xff] %v3125_v1  ;;  %v3132_v31 = vpop.f32.mrb[31].mxu0  ;;  %v3134_v29 = vpop.f32.mrb[31].mxu1  ;;  %v861_v43 = vadd.f32 %v797_v34, %v3078_v61  ;;  %v799_v10 = vmul.f32 0.044715, %v735_v22  ;;  %v736_v1 = vmul.f32 %v672_v2, %v3103_v28  ;;  %v3142_v60 = vadd.f32 %v2928_v23, %v2734_v20 }
 0x1be   :  { %3771 = vst [vmem:[#allocation58_spill] sm:$0xff] %v3132_v31  ;;  %3772 = vst [vmem:[#allocation59_spill] sm:$0xff] %v3134_v29  ;;  %v3136_v9 = vpop.eup %2274  ;;  %2286 = vtanh.f32 %v924_v35  ;;  %v926_v39 = vmul.f32 0.7978846, %v862_v53  ;;  %v738_v16 = vmul.f32 %v674_v40, %v3112_v17  ;;  %v3147_v47 = vadd.f32 %v2930_v46, %v2736_v21 }
 0x1bf   :  { %3773 = vst [vmem:[#allocation60_spill] sm:$0xff] %v3142_v60  ;;  %v3149_v29 = vpop.eup %2276  ;;  %v925_v31 = vmul.f32 0.7978846, %v861_v43  ;;  %v863_v34 = vadd.f32 %v799_v10, %v3092_v38  ;;  %v800_v22 = vmul.f32 0.044715, %v736_v1  ;;  %v673_v2 = vmul.f32 %v3142_v60, %v3142_v60 }
 0x1c0   :  { %3774 = vst [vmem:[#allocation61_spill] sm:$0xff] %v3147_v47  ;;  %2288 = vtanh.f32 %v926_v39  ;;  %v802_v23 = vmul.f32 0.044715, %v738_v16  ;;  %v675_v53 = vmul.f32 %v3147_v47, %v3147_v47  ;;  %v3158_v40 = vadd.f32 %v2937_v30, %v2730_v18  ;;  %v3160_v46 = vpop.eup %2278 }
 0x1c1   :  { %3775 = vst [vmem:[#allocation62_spill] sm:$0xff] %v3160_v46  ;;  %2290 = vtanh.f32 %v925_v31  ;;  %v927_v35 = vmul.f32 0.7978846, %v863_v34  ;;  %v864_v43 = vadd.f32 %v800_v22, %v3103_v28  ;;  %v737_v10 = vmul.f32 %v673_v2, %v3142_v60  ;;  %v3164_v1 = vpop.eup %2280 }
 0x1c2   :  { %3776 = vst [vmem:[#allocation63_spill] sm:$0xff] %v3164_v1  ;;  %v866_v39 = vadd.f32 %v802_v23, %v3112_v17  ;;  %v739_v16 = vmul.f32 %v675_v53, %v3147_v47  ;;  %v676_v38 = vmul.f32 %v3158_v40, %v3158_v40  ;;  %v3172_v30 = vadd.f32 %v2939_v7, %v2732_v19 }
 0x1c3   :  { %2292 = vtanh.f32 %v927_v35  ;;  %v928_v31 = vmul.f32 0.7978846, %v864_v43  ;;  %v801_v34 = vmul.f32 0.044715, %v737_v10  ;;  %v3176_v22 = vadd.f32 %v2947_v15, %v2734_v20 }
 0x1c4   :  { %v930_v2 = vmul.f32 0.7978846, %v866_v39  ;;  %v803_v28 = vmul.f32 0.044715, %v739_v16  ;;  %v740_v23 = vmul.f32 %v676_v38, %v3158_v40  ;;  %v678_v53 = vmul.f32 %v3172_v30, %v3172_v30 }
 0x1c5   :  { %v3181_v17 = vpop.eup %2282  ;;  %2294 = vtanh.f32 %v928_v31  ;;  %v865_v7 = vadd.f32 %v801_v34, %v3142_v60  ;;  %v677_v35 = vmul.f32 %v3176_v22, %v3176_v22  ;;  %v3188_v43 = vadd.f32 %v2949_v27, %v2736_v21 }
 0x1c6   :  { %v3190_v15 = vpop.eup %2284  ;;  %2296 = vtanh.f32 %v930_v2  ;;  %v867_v38 = vadd.f32 %v803_v28, %v3147_v47  ;;  %v804_v10 = vmul.f32 0.044715, %v740_v23  ;;  %v742_v39 = vmul.f32 %v678_v53, %v3172_v30 }
 0x1c7   :  { %3777 = vst [vmem:[#allocation64_spill] sm:$0xff] %v3190_v15  ;;  %v929_v16 = vmul.f32 0.7978846, %v865_v7  ;;  %v741_v31 = vmul.f32 %v677_v35, %v3176_v22  ;;  %v679_v34 = vmul.f32 %v3188_v43, %v3188_v43  ;;  %v1025_v60 = vadd.f32 1.0, %v2864_v51 }
 0x1c8   :  { %v3198_v1 = vpop.eup %2286  ;;  %v931_v27 = vmul.f32 0.7978846, %v867_v38  ;;  %v868_v61 = vadd.f32 %v804_v10, %v3158_v40  ;;  %v806_v46 = vmul.f32 0.044715, %v742_v39  ;;  %v1029_v2 = vadd.f32 1.0, %v2890_v54 }
 0x1c9   :  { %2298 = vtanh.f32 %v929_v16  ;;  %v805_v28 = vmul.f32 0.044715, %v741_v31  ;;  %v743_v23 = vmul.f32 %v679_v34, %v3188_v43  ;;  %v1089_v53 = vmul.f32 0.5, %v1025_v60 }
 0x1ca   :  { %v3203_v7 = vpop.eup %2288  ;;  %2300 = vtanh.f32 %v931_v27  ;;  %v932_v35 = vmul.f32 0.7978846, %v868_v61  ;;  %v870_v47 = vadd.f32 %v806_v46, %v3172_v30  ;;  %v1093_v51 = vmul.f32 0.5, %v1029_v2 }
 0x1cb   :  { %v3206_v15 = vpop.eup %2290  ;;  %v869_v38 = vadd.f32 %v805_v28, %v3176_v22  ;;  %v807_v10 = vmul.f32 0.044715, %v743_v23  ;;  %v1153_v39 = vmul.f32 %v1089_v53, %v2745_v32  ;;  %v1027_v54 = vadd.f32 1.0, %v2868_v52 }
 0x1cc   :  { %2302 = vtanh.f32 %v932_v35  ;;  %v934_v16 = vmul.f32 0.7978846, %v870_v47  ;;  %v1157_v60 = vmul.f32 %v1093_v51, %v2765_v48  ;;  %v1031_v31 = vadd.f32 1.0, %v2895_v24 }
 0x1cd   :  { %v3213_v34 = vpop.eup %2292  ;;  %v933_v61 = vmul.f32 0.7978846, %v869_v38  ;;  %v871_v46 = vadd.f32 %v807_v10, %v3188_v43  ;;  %v1091_v27 = vmul.f32 0.5, %v1027_v54  ;;  %v3218_v2 = vadd.f32 %v2989_v13, %v2730_v18 }
 0x1ce   :  { %2304 = vtanh.f32 %v934_v16  ;;  %v1217_v32 = vpack.c.bf16 %v1157_v60, %v1153_v39  ;;  %v1095_v28 = vmul.f32 0.5, %v1031_v31  ;;  %v3222_v52 = vadd.f32 %v2991_v25, %v2732_v19 }
 0x1cf   :  { %3778 = vst [vmem:[#allocation65_spill] sm:$0xff] %v3218_v2  ;;  %v3224_v48 = vpop.eup %2294  ;;  %2306 = vtanh.f32 %v933_v61  ;;  %v935_v24 = vmul.f32 0.7978846, %v871_v46  ;;  %v1155_v47 = vmul.f32 %v1091_v27, %v2748_v33  ;;  %v680_v23 = vmul.f32 %v3218_v2, %v3218_v2 }
 0x1d0   :  { %3779 = vst [vmem:[#allocation66_spill] sm:$0xff] %v3222_v52  ;;  %v3229_v53 = vpop.eup %2296  ;;  %1543 = vmatprep.mubr.bf16.mxu0 %v1217_v32  ;;  %v1159_v13 = vmul.f32 %v1095_v28, %v2768_v49  ;;  %v682_v35 = vmul.f32 %v3222_v52, %v3222_v52  ;;  %v3236_v25 = vadd.f32 %v2995_v57, %v2734_v20 }
 0x1d1   :  { %v3240_v51 = vadd.f32 %v2997_v56, %v2736_v21  ;;  %2308 = vtanh.f32 %v935_v24  ;;  %v3780_v33 = vpack.c.bf16 %v2910_v44, %v2880_v36  ;;  %v744_v38 = vmul.f32 %v680_v23, %v3218_v2 }
 0x1d2   :  { %v3248_v49 = vadd.f32 %v3005_v6, %v2730_v18  ;;  %v3252_v10 = vadd.f32 %v3007_v26, %v2732_v19  ;;  %v1219_v57 = vpack.c.bf16 %v1159_v13, %v1155_v47  ;;  %v746_v39 = vmul.f32 %v682_v35, %v3222_v52 }
 0x1d3   :  { %1544 = vmatmul.mubr.bf16.vlgmr.msra.gmra.mrb[32].mxu0 %v3780_v33  ;;  %v681_v56 = vmul.f32 %v3236_v25, %v3236_v25  ;;  %v683_v36 = vmul.f32 %v3240_v51, %v3240_v51  ;;  %v3259_v44 = vpop.eup %2298  ;;  %v808_v54 = vmul.f32 0.044715, %v744_v38  ;;  %v3267_v26 = vadd.f32 %v3013_v3, %v2734_v20 }
 0x1d4   :  { %3781 = vst [vmem:[#allocation67_spill] sm:$0xff] %v3248_v49  ;;  %3782 = vst [vmem:[#allocation68_spill] sm:$0xff] %v3252_v10  ;;  %v684_v6 = vmul.f32 %v3248_v49, %v3248_v49  ;;  %v686_v16 = vmul.f32 %v3252_v10, %v3252_v10  ;;  %v3269_v60 = vpop.eup %2300  ;;  %1640 = vmatprep.mubr.bf16.mxu1 %v1219_v57  ;;  %v810_v31 = vmul.f32 0.044715, %v746_v39 }
 0x1d5   :  { %v745_v61 = vmul.f32 %v681_v56, %v3236_v25  ;;  %v747_v46 = vmul.f32 %v683_v36, %v3240_v51  ;;  %v3275_v27 = vadd.f32 %v3015_v5, %v2736_v21  ;;  %v3783_v32 = vpack.c.bf16 %v2922_v8, %v2893_v55 }
 0x1d6   :  { %v872_v28 = vadd.f32 %v808_v54, %v3218_v2  ;;  %v748_v3 = vmul.f32 %v684_v6, %v3248_v49  ;;  %v750_v24 = vmul.f32 %v686_v16, %v3252_v10  ;;  %v685_v47 = vmul.f32 %v3267_v26, %v3267_v26  ;;  %v3285_v23 = vpop.eup %2302 }
 0x1d7   :  { %1641 = vmatmul.mubr.bf16.vlgmr.msra.gmra.mrb[32].mxu1 %v3783_v32  ;;  %v874_v13 = vadd.f32 %v810_v31, %v3222_v52  ;;  %v809_v35 = vmul.f32 0.044715, %v745_v61  ;;  %v811_v5 = vmul.f32 0.044715, %v747_v46  ;;  %v687_v33 = vmul.f32 %v3275_v27, %v3275_v27 }
 0x1d8   :  { %v936_v55 = vmul.f32 0.7978846, %v872_v28  ;;  %v812_v8 = vmul.f32 0.044715, %v748_v3  ;;  %v814_v38 = vmul.f32 0.044715, %v750_v24  ;;  %v749_v57 = vmul.f32 %v685_v47, %v3267_v26  ;;  %v3291_v39 = vpop.eup %2304 }
 0x1d9   :  { %v938_v56 = vmul.f32 0.7978846, %v874_v13  ;;  %v873_v36 = vadd.f32 %v809_v35, %v3236_v25  ;;  %v875_v54 = vadd.f32 %v811_v5, %v3240_v51  ;;  %v751_v6 = vmul.f32 %v687_v33, %v3275_v27  ;;  %v3296_v16 = vpop.eup %2306 }
 0x1da   :  { %2310 = vtanh.f32 %v936_v55  ;;  %v876_v31 = vadd.f32 %v812_v8, %v3248_v49  ;;  %v878_v61 = vadd.f32 %v814_v38, %v3252_v10  ;;  %v813_v46 = vmul.f32 0.044715, %v749_v57 }
 0x1db   :  { %2312 = vtanh.f32 %v938_v56  ;;  %v937_v32 = vmul.f32 0.7978846, %v873_v36  ;;  %v939_v28 = vmul.f32 0.7978846, %v875_v54  ;;  %v815_v3 = vmul.f32 0.044715, %v751_v6  ;;  %v3300_v24 = vpop.eup %2308 }
 0x1dc   :  { %v940_v47 = vmul.f32 0.7978846, %v876_v31  ;;  %v942_v13 = vmul.f32 0.7978846, %v878_v61  ;;  %v877_v35 = vadd.f32 %v813_v46, %v3267_v26  ;;  %v1033_v5 = vadd.f32 1.0, %v2959_v11  ;;  %v3784_v46 = vld [vmem:[#allocation23_spill] sm:$0xff] }
 0x1dd   :  { %2314 = vtanh.f32 %v937_v32  ;;  %v879_v33 = vadd.f32 %v815_v3, %v3275_v27  ;;  %v1037_v55 = vadd.f32 1.0, %v3021_v37  ;;  %v1035_v8 = vadd.f32 1.0, %v2969_v59  ;;  %v3785_v32 = vld [vmem:[#allocation20_spill] sm:$0xff] }
 0x1de   :  { %2316 = vtanh.f32 %v939_v28  ;;  %v941_v38 = vmul.f32 0.7978846, %v877_v35  ;;  %v1097_v57 = vmul.f32 0.5, %v1033_v5  ;;  %v1039_v56 = vadd.f32 1.0, %v3037_v14  ;;  %v3786_v28 = vld [vmem:[#allocation33_spill] sm:$0xff]  ;;  %v3787_v35 = vld [vmem:[#allocation24_spill] sm:$0xff] }
 0x1df   :  { %2318 = vtanh.f32 %v940_v47  ;;  %v943_v36 = vmul.f32 0.7978846, %v879_v33  ;;  %v1101_v54 = vmul.f32 0.5, %v1037_v55  ;;  %v1099_v6 = vmul.f32 0.5, %v1035_v8  ;;  %v3788_v5 = vld [vmem:[#allocation29_spill] sm:$0xff]  ;;  %v3789_v8 = vld [vmem:[#allocation34_spill] sm:$0xff] }
 0x1e0   :  { %2320 = vtanh.f32 %v942_v13  ;;  %v1161_v31 = vmul.f32 %v1097_v57, %v2803_v62  ;;  %v1103_v11 = vmul.f32 0.5, %v1039_v56  ;;  %v1032_v61 = vadd.f32 1.0, %v2941_v0  ;;  %v3791_v56 = vld [vmem:[#allocation18_spill] sm:$0xff] }
 0x1e1   :  { %2322 = vtanh.f32 %v941_v38  ;;  %v1165_v37 = vmul.f32 %v1101_v54, %v3784_v46  ;;  %v1163_v59 = vmul.f32 %v1099_v6, %v3785_v32  ;;  %v1036_v3 = vadd.f32 1.0, %v3786_v28 }
 0x1e2   :  { %2324 = vtanh.f32 %v943_v36  ;;  %v1167_v14 = vmul.f32 %v1103_v11, %v3787_v35  ;;  %v1096_v47 = vmul.f32 0.5, %v1032_v61  ;;  %v1034_v33 = vadd.f32 1.0, %v3788_v5  ;;  %v3797_v35 = vld [vmem:[#allocation43_spill] sm:$0xff] }
 0x1e3   :  { %v1221_v55 = vpack.c.bf16 %v1165_v37, %v1161_v31  ;;  %v1100_v13 = vmul.f32 0.5, %v1036_v3  ;;  %v1038_v62 = vadd.f32 1.0, %v3789_v8  ;;  %v3318_v0 = vadd.f32 %v3042_v45, %v2730_v18  ;;  %v3793_v31 = vld [vmem:[#allocation21_spill] sm:$0xff] }
 0x1e4   :  { %v3320_v38 = vpop.eup %2310  ;;  %v1223_v57 = vpack.c.bf16 %v1167_v14, %v1163_v59  ;;  %v1160_v54 = vmul.f32 %v1096_v47, %v3791_v56  ;;  %v1098_v6 = vmul.f32 0.5, %v1034_v33  ;;  %v3325_v36 = vadd.f32 %v3044_v50, %v2732_v19  ;;  %v3794_v37 = vld [vmem:[#allocation41_spill] sm:$0xff]  ;;  %v3796_v59 = vld [vmem:[#allocation19_spill] sm:$0xff]  ;;  %v3799_v33 = vld [vmem:[#allocation22_spill] sm:$0xff] }
 0x1e5   :  { %3790 = vst [vmem:[#allocation23_spill] sm:$0xff] %v3318_v0  ;;  %v3327_v11 = vpop.eup %2312  ;;  %1551 = vmatprep.mubr.bf16.mxu0 %v1221_v55  ;;  %v1164_v61 = vmul.f32 %v1100_v13, %v3793_v31  ;;  %v1102_v46 = vmul.f32 0.5, %v1038_v62  ;;  %v688_v45 = vmul.f32 %v3318_v0, %v3318_v0  ;;  %v3334_v32 = vadd.f32 %v3794_v37, %v2734_v20 }
 0x1e6   :  { %3792 = vst [vmem:[#allocation20_spill] sm:$0xff] %v3325_v36  ;;  %1648 = vmatprep.mubr.bf16.mxu1 %v1223_v57  ;;  %v1162_v28 = vmul.f32 %v1098_v6, %v3796_v59  ;;  %v690_v50 = vmul.f32 %v3325_v36, %v3325_v36  ;;  %v3341_v3 = vadd.f32 %v3054_v63, %v2736_v21  ;;  %v3800_v6 = vld [vmem:[#allocation44_spill] sm:$0xff] }
 0x1e7   :  { %3795 = vst [vmem:[#allocation33_spill] sm:$0xff] %v3334_v32  ;;  %v3345_v14 = vadd.f32 %v3797_v35, %v2730_v18  ;;  %v3347_v47 = vpop.eup %2314  ;;  %v1220_v5 = vpack.c.bf16 %v1164_v61, %v1160_v54  ;;  %v1166_v55 = vmul.f32 %v1102_v46, %v3799_v33  ;;  %v752_v13 = vmul.f32 %v688_v45, %v3318_v0 }
 0x1e8   :  { %v689_v8 = vmul.f32 %v3334_v32, %v3334_v32  ;;  %v3353_v62 = vpop.eup %2316  ;;  %v754_v57 = vmul.f32 %v690_v50, %v3325_v36  ;;  %v691_v63 = vmul.f32 %v3341_v3, %v3341_v3  ;;  %v3362_v54 = vadd.f32 %v3800_v6, %v2732_v19 }
 0x1e9   :  { %3798 = vst [vmem:[#allocation24_spill] sm:$0xff] %v3345_v14  ;;  %v692_v56 = vmul.f32 %v3345_v14, %v3345_v14  ;;  %v3364_v31 = vpop.eup %2318  ;;  %1552 = vmatmul.mubr.bf16.gmra.mrb[36].mxu0 %v1220_v5  ;;  %v1222_v61 = vpack.c.bf16 %v1166_v55, %v1162_v28  ;;  %v816_v46 = vmul.f32 0.044715, %v752_v13  ;;  %v3369_v37 = vadd.f32 %v3072_v4, %v2734_v20 }
 0x1ea   :  { %3801 = vst [vmem:[#allocation29_spill] sm:$0xff] %v3362_v54  ;;  %v753_v45 = vmul.f32 %v689_v8, %v3334_v32  ;;  %v3371_v59 = vpop.eup %2320  ;;  %v818_v50 = vmul.f32 0.044715, %v754_v57  ;;  %v755_v35 = vmul.f32 %v691_v63, %v3341_v3  ;;  %v694_v6 = vmul.f32 %v3362_v54, %v3362_v54 }
 0x1eb   :  { %v756_v33 = vmul.f32 %v692_v56, %v3345_v14  ;;  %v3377_v10 = vpop.eup %2322  ;;  %1649 = vmatmul.mubr.bf16.gmra.mrb[36].mxu1 %v1222_v61  ;;  %v880_v28 = vadd.f32 %v816_v46, %v3318_v0  ;;  %v693_v4 = vmul.f32 %v3369_v37, %v3369_v37  ;;  %v3384_v55 = vadd.f32 %v3074_v58, %v2736_v21 }
 0x1ec   :  { %v817_v5 = vmul.f32 0.044715, %v753_v45  ;;  %v3386_v13 = vpop.eup %2324  ;;  %v882_v8 = vadd.f32 %v818_v50, %v3325_v36  ;;  %v819_v57 = vmul.f32 0.044715, %v755_v35  ;;  %v758_v56 = vmul.f32 %v694_v6, %v3362_v54 }
 0x1ed   :  { %3802 = vst [vmem:[#allocation34_spill] sm:$0xff] %v3384_v55  ;;  %v820_v63 = vmul.f32 0.044715, %v756_v33  ;;  %v944_v52 = vmul.f32 0.7978846, %v880_v28  ;;  %v757_v46 = vmul.f32 %v693_v4, %v3369_v37  ;;  %v695_v45 = vmul.f32 %v3384_v55, %v3384_v55 }
 0x1ee   :  { %v881_v61 = vadd.f32 %v817_v5, %v3334_v32  ;;  %v946_v0 = vmul.f32 0.7978846, %v882_v8  ;;  %v883_v58 = vadd.f32 %v819_v57, %v3341_v3  ;;  %v822_v2 = vmul.f32 0.044715, %v758_v56  ;;  %v3803_v8 = vld [vmem:[#allocation48_spill] sm:$0xff] }
 0x1ef   :  { %v884_v49 = vadd.f32 %v820_v63, %v3345_v14  ;;  %2326 = vtanh.f32 %v944_v52  ;;  %v821_v35 = vmul.f32 0.044715, %v757_v46  ;;  %v759_v33 = vmul.f32 %v695_v45, %v3384_v55 }
 0x1f0   :  { %v945_v50 = vmul.f32 0.7978846, %v881_v61  ;;  %2328 = vtanh.f32 %v946_v0  ;;  %v947_v6 = vmul.f32 0.7978846, %v883_v58  ;;  %v886_v5 = vadd.f32 %v822_v2, %v3362_v54  ;;  %v3804_v58 = vld [vmem:[#allocation27_spill] sm:$0xff] }
 0x1f1   :  { %v948_v28 = vmul.f32 0.7978846, %v884_v49  ;;  %v885_v4 = vadd.f32 %v821_v35, %v3369_v37  ;;  %v823_v36 = vmul.f32 0.044715, %v759_v33  ;;  %v1041_v32 = vadd.f32 1.0, %v3803_v8  ;;  %v3805_v35 = vld [vmem:[#allocation42_spill] sm:$0xff] }
 0x1f2   :  { %2330 = vtanh.f32 %v945_v50  ;;  %v950_v57 = vmul.f32 0.7978846, %v886_v5  ;;  %v1045_v63 = vadd.f32 1.0, %v3136_v9  ;;  %v1043_v52 = vadd.f32 1.0, %v3094_v42  ;;  %v3807_v42 = vld [vmem:[#allocation28_spill] sm:$0xff] }
 0x1f3   :  { %2332 = vtanh.f32 %v947_v6  ;;  %v949_v56 = vmul.f32 0.7978846, %v885_v4  ;;  %v887_v0 = vadd.f32 %v823_v36, %v3384_v55  ;;  %v1105_v61 = vmul.f32 0.5, %v1041_v32  ;;  %v3806_v6 = vld [vmem:[#allocation32_spill] sm:$0xff]  ;;  %v3808_v32 = vld [vmem:[#allocation47_spill] sm:$0xff] }
 0x1f4   :  { %2334 = vtanh.f32 %v948_v28  ;;  %v1109_v49 = vmul.f32 0.5, %v1045_v63  ;;  %v1047_v2 = vadd.f32 1.0, %v3149_v29  ;;  %v1107_v46 = vmul.f32 0.5, %v1043_v52  ;;  %v3809_v63 = vld [vmem:[#allocation35_spill] sm:$0xff] }
 0x1f5   :  { %2336 = vtanh.f32 %v950_v57  ;;  %v951_v45 = vmul.f32 0.7978846, %v887_v0  ;;  %v1169_v50 = vmul.f32 %v1105_v61, %v3804_v58  ;;  %v1040_v33 = vadd.f32 1.0, %v3805_v35  ;;  %v3810_v0 = vld [vmem:[#allocation51_spill] sm:$0xff] }
 0x1f6   :  { %2338 = vtanh.f32 %v949_v56  ;;  %v1173_v9 = vmul.f32 %v1109_v49, %v3806_v6  ;;  %v1111_v5 = vmul.f32 0.5, %v1047_v2  ;;  %v1171_v28 = vmul.f32 %v1107_v46, %v3807_v42  ;;  %v3812_v2 = vld [vmem:[#allocation25_spill] sm:$0xff] }
 0x1f7   :  { %v1044_v4 = vadd.f32 1.0, %v3118_v41  ;;  %2340 = vtanh.f32 %v951_v45  ;;  %v1104_v36 = vmul.f32 0.5, %v1040_v33  ;;  %v1042_v8 = vadd.f32 1.0, %v3808_v32  ;;  %v3813_v45 = vld [vmem:[#allocation52_spill] sm:$0xff] }
 0x1f8   :  { %v1046_v29 = vadd.f32 1.0, %v3127_v12  ;;  %v1225_v57 = vpack.c.bf16 %v1173_v9, %v1169_v50  ;;  %v1175_v52 = vmul.f32 %v1111_v5, %v3809_v63  ;;  %v3414_v61 = vadd.f32 %v3810_v0, %v2730_v18  ;;  %v3816_v50 = vld [vmem:[#allocation30_spill] sm:$0xff] }
 0x1f9   :  { %v1108_v56 = vmul.f32 0.5, %v1044_v4  ;;  %v3416_v49 = vpop.eup %2326  ;;  %v1168_v46 = vmul.f32 %v1104_v36, %v3812_v2  ;;  %v1106_v58 = vmul.f32 0.5, %v1042_v8  ;;  %v3421_v35 = vadd.f32 %v3813_v45, %v2732_v19  ;;  %v3817_v5 = vld [vmem:[#allocation54_spill] sm:$0xff]  ;;  %v3819_v8 = vld [vmem:[#allocation31_spill] sm:$0xff] }
 0x1fa   :  { %3811 = vst [vmem:[#allocation18_spill] sm:$0xff] %v3414_v61  ;;  %v1110_v41 = vmul.f32 0.5, %v1046_v29  ;;  %v3423_v33 = vpop.eup %2328  ;;  %1559 = vmatprep.mubr.bf16.mxu0 %v1225_v57  ;;  %v1227_v12 = vpack.c.bf16 %v1175_v52, %v1171_v28  ;;  %v696_v9 = vmul.f32 %v3414_v61, %v3414_v61  ;;  %v3430_v42 = vadd.f32 %v3817_v5, %v2734_v20  ;;  %v3818_v36 = vld [vmem:[#allocation26_spill] sm:$0xff]  ;;  %v3820_v28 = vld [vmem:[#allocation55_spill] sm:$0xff] }
 0x1fb   :  { %3814 = vst [vmem:[#allocation21_spill] sm:$0xff] %v3421_v35  ;;  %3815 = vst [vmem:[#allocation41_spill] sm:$0xff] %v3423_v33  ;;  %v1172_v6 = vmul.f32 %v1108_v56, %v3816_v50  ;;  %v1170_v32 = vmul.f32 %v1106_v58, %v3818_v36  ;;  %v698_v63 = vmul.f32 %v3421_v35, %v3421_v35  ;;  %v3821_v58 = vld [vmem:[#allocation56_spill] sm:$0xff] }
 0x1fc   :  { %v3432_v4 = vpop.eup %2330  ;;  %v1174_v29 = vmul.f32 %v1110_v41, %v3819_v8  ;;  %v3440_v57 = vadd.f32 %v3820_v28, %v2736_v21  ;;  %1656 = vmatprep.mubr.bf16.mxu1 %v1227_v12  ;;  %v760_v0 = vmul.f32 %v696_v9, %v3414_v61  ;;  %v697_v2 = vmul.f32 %v3430_v42, %v3430_v42  ;;  %v3822_v12 = vld [vmem:[#allocation57_spill] sm:$0xff] }
 0x1fd   :  { %v3442_v52 = vpop.eup %2332  ;;  %v1224_v56 = vpack.c.bf16 %v1172_v6, %v1168_v46  ;;  %v3449_v45 = vadd.f32 %v3821_v58, %v2730_v18  ;;  %v762_v5 = vmul.f32 %v698_v63, %v3421_v35  ;;  %v3458_v46 = vadd.f32 %v3822_v12, %v2732_v19 }
 0x1fe   :  { %v3451_v41 = vpop.eup %2334  ;;  %v1226_v50 = vpack.c.bf16 %v1174_v29, %v1170_v32  ;;  %v699_v36 = vmul.f32 %v3440_v57, %v3440_v57  ;;  %v824_v9 = vmul.f32 0.044715, %v760_v0  ;;  %v761_v8 = vmul.f32 %v697_v2, %v3430_v42  ;;  %v3824_v32 = vld [vmem:[#allocation58_spill] sm:$0xff] }
 0x1ff   :  { %v3460_v6 = vpop.eup %2336  ;;  %1560 = vmatmul.mubr.bf16.gmra.mrb[40].mxu0 %v1224_v56  ;;  %v700_v18 = vmul.f32 %v3449_v45, %v3449_v45  ;;  %v3467_v29 = vadd.f32 %v3824_v32, %v2734_v20  ;;  %v826_v28 = vmul.f32 0.044715, %v762_v5  ;;  %v702_v58 = vmul.f32 %v3458_v46, %v3458_v46  ;;  %v3825_v56 = vld [vmem:[#allocation59_spill] sm:$0xff] }
 0x200   :  { %3823 = vst [vmem:[#allocation19_spill] sm:$0xff] %v3460_v6  ;;  %v3469_v63 = vpop.eup %2338  ;;  %1657 = vmatmul.mubr.bf16.gmra.mrb[40].mxu1 %v1226_v50  ;;  %v763_v19 = vmul.f32 %v699_v36, %v3440_v57  ;;  %v3476_v0 = vadd.f32 %v3825_v56, %v2736_v21  ;;  %v888_v2 = vadd.f32 %v824_v9, %v3414_v61  ;;  %v825_v12 = vmul.f32 0.044715, %v761_v8 }
 0x201   :  { %v764_v54 = vmul.f32 %v700_v18, %v3449_v45  ;;  %v701_v20 = vmul.f32 %v3467_v29, %v3467_v29  ;;  %v3482_v32 = vpop.eup %2340  ;;  %v890_v50 = vadd.f32 %v826_v28, %v3421_v35  ;;  %v766_v36 = vmul.f32 %v702_v58, %v3458_v46 }
 0x202   :  { %v827_v5 = vmul.f32 0.044715, %v763_v19  ;;  %v703_v14 = vmul.f32 %v3476_v0, %v3476_v0  ;;  %v952_v21 = vmul.f32 0.7978846, %v888_v2  ;;  %v889_v56 = vadd.f32 %v825_v12, %v3430_v42 }
 0x203   :  { %v828_v9 = vmul.f32 0.044715, %v764_v54  ;;  %v765_v8 = vmul.f32 %v701_v20, %v3467_v29  ;;  %v954_v18 = vmul.f32 0.7978846, %v890_v50  ;;  %v830_v55 = vmul.f32 0.044715, %v766_v36 }
 0x204   :  { %v891_v61 = vadd.f32 %v827_v5, %v3440_v57  ;;  %v767_v6 = vmul.f32 %v703_v14, %v3476_v0  ;;  %2342 = vtanh.f32 %v952_v21  ;;  %v953_v28 = vmul.f32 0.7978846, %v889_v56  ;;  %v3826_v56 = vld [vmem:[#allocation64_spill] sm:$0xff] }
 0x205   :  { %v892_v19 = vadd.f32 %v828_v9, %v3449_v45  ;;  %v829_v58 = vmul.f32 0.044715, %v765_v8  ;;  %2344 = vtanh.f32 %v954_v18  ;;  %v894_v2 = vadd.f32 %v830_v55, %v3458_v46  ;;  %v3827_v8 = vld [vmem:[#allocation38_spill] sm:$0xff] }
 0x206   :  { %v955_v35 = vmul.f32 0.7978846, %v891_v61  ;;  %v831_v33 = vmul.f32 0.044715, %v767_v6  ;;  %2346 = vtanh.f32 %v953_v28  ;;  %v1049_v20 = vadd.f32 1.0, %v3181_v17 }
 0x207   :  { %v956_v54 = vmul.f32 0.7978846, %v892_v19  ;;  %v893_v12 = vadd.f32 %v829_v58, %v3467_v29  ;;  %v958_v50 = vmul.f32 0.7978846, %v894_v2  ;;  %v1053_v5 = vadd.f32 1.0, %v3206_v15  ;;  %v3830_v2 = vld [vmem:[#allocation39_spill] sm:$0xff] }
 0x208   :  { %2348 = vtanh.f32 %v955_v35  ;;  %v895_v14 = vadd.f32 %v831_v33, %v3476_v0  ;;  %v1113_v21 = vmul.f32 0.5, %v1049_v20  ;;  %v1051_v61 = vadd.f32 1.0, %v3826_v56  ;;  %v3828_v35 = vld [vmem:[#allocation62_spill] sm:$0xff]  ;;  %v3831_v20 = vld [vmem:[#allocation63_spill] sm:$0xff] }
 0x209   :  { %2350 = vtanh.f32 %v956_v54  ;;  %v957_v36 = vmul.f32 0.7978846, %v893_v12  ;;  %v1117_v6 = vmul.f32 0.5, %v1053_v5  ;;  %v1055_v9 = vadd.f32 1.0, %v3213_v34  ;;  %v3829_v33 = vld [vmem:[#allocation46_spill] sm:$0xff]  ;;  %v3832_v5 = vld [vmem:[#allocation49_spill] sm:$0xff] }
 0x20a   :  { %2352 = vtanh.f32 %v958_v50  ;;  %v959_v55 = vmul.f32 0.7978846, %v895_v14  ;;  %v1177_v18 = vmul.f32 %v1113_v21, %v3827_v8  ;;  %v1115_v17 = vmul.f32 0.5, %v1051_v61 }
 0x20b   :  { %2354 = vtanh.f32 %v957_v36  ;;  %v1048_v28 = vadd.f32 1.0, %v3828_v35  ;;  %v1181_v19 = vmul.f32 %v1117_v6, %v3829_v33  ;;  %v1119_v15 = vmul.f32 0.5, %v1055_v9 }
 0x20c   :  { %2356 = vtanh.f32 %v959_v55  ;;  %v1052_v58 = vadd.f32 1.0, %v3198_v1  ;;  %v1179_v54 = vmul.f32 %v1115_v17, %v3830_v2  ;;  %v1050_v50 = vadd.f32 1.0, %v3831_v20  ;;  %v3833_v55 = vld [vmem:[#allocation36_spill] sm:$0xff] }
 0x20d   :  { %v1112_v12 = vmul.f32 0.5, %v1048_v28  ;;  %v1054_v14 = vadd.f32 1.0, %v3203_v7  ;;  %v1229_v34 = vpack.c.bf16 %v1181_v19, %v1177_v18  ;;  %v1183_v36 = vmul.f32 %v1119_v15, %v3832_v5  ;;  %v3834_v28 = vld [vmem:[#allocation40_spill] sm:$0xff] }
 0x20e   :  { %v1116_v21 = vmul.f32 0.5, %v1052_v58  ;;  %v1057_v56 = vadd.f32 1.0, %v3259_v44  ;;  %v3509_v61 = vpop.eup %2342  ;;  %v1114_v9 = vmul.f32 0.5, %v1050_v50  ;;  %v1061_v1 = vadd.f32 1.0, %v3296_v16  ;;  %v3835_v44 = vld [vmem:[#allocation37_spill] sm:$0xff] }
 0x20f   :  { %v1176_v6 = vmul.f32 %v1112_v12, %v3833_v55  ;;  %v1118_v8 = vmul.f32 0.5, %v1054_v14  ;;  %v3513_v17 = vpop.eup %2344  ;;  %1567 = vmatprep.mubr.bf16.mxu0 %v1229_v34  ;;  %v1231_v35 = vpack.c.bf16 %v1183_v36, %v1179_v54  ;;  %v1059_v33 = vadd.f32 1.0, %v3269_v60  ;;  %v3836_v58 = vld [vmem:[#allocation45_spill] sm:$0xff]  ;;  %v3837_v14 = vld [vmem:[#allocation60_spill] sm:$0xff] }
 0x210   :  { %v1180_v7 = vmul.f32 %v1116_v21, %v3834_v28  ;;  %v1121_v18 = vmul.f32 0.5, %v1057_v56  ;;  %v3517_v19 = vpop.eup %2346  ;;  %v1178_v15 = vmul.f32 %v1114_v9, %v3835_v44  ;;  %v1125_v12 = vmul.f32 0.5, %v1061_v1 }
 0x211   :  { %v1182_v2 = vmul.f32 %v1118_v8, %v3836_v58  ;;  %v1063_v20 = vadd.f32 1.0, %v3300_v24  ;;  %1664 = vmatprep.mubr.bf16.mxu1 %v1231_v35  ;;  %v1123_v34 = vmul.f32 0.5, %v1059_v33  ;;  %v1056_v5 = vadd.f32 1.0, %v3224_v48  ;;  %v3838_v24 = vld [vmem:[#allocation61_spill] sm:$0xff]  ;;  %v3839_v33 = vld [vmem:[#allocation50_spill] sm:$0xff] }
 0x212   :  { %v3522_v50 = vpop.eup %2348  ;;  %v1228_v16 = vpack.c.bf16 %v1180_v7, %v1176_v6  ;;  %v1185_v54 = vmul.f32 %v1121_v18, %v3837_v14  ;;  %v1189_v21 = vmul.f32 %v1125_v12, %v3176_v22  ;;  %v1060_v55 = vadd.f32 1.0, %v3285_v23 }
 0x213   :  { %v3526_v36 = vpop.eup %2350  ;;  %v1230_v60 = vpack.c.bf16 %v1182_v2, %v1178_v15  ;;  %v1127_v56 = vmul.f32 0.5, %v1063_v20  ;;  %v1187_v8 = vmul.f32 %v1123_v34, %v3838_v24  ;;  %v1120_v1 = vmul.f32 0.5, %v1056_v5 }
 0x214   :  { %v3530_v9 = vpop.eup %2352  ;;  %1568 = vmatmul.mubr.bf16.gmra.mrb[44].mxu0 %v1228_v16  ;;  %v1058_v6 = vadd.f32 1.0, %v3229_v53  ;;  %v1062_v35 = vadd.f32 1.0, %v3291_v39  ;;  %v1233_v48 = vpack.c.bf16 %v1189_v21, %v1185_v54  ;;  %v1124_v22 = vmul.f32 0.5, %v1060_v55  ;;  %v3840_v16 = vld [vmem:[#allocation53_spill] sm:$0xff] }
 0x215   :  { %v3535_v28 = vpop.eup %2354  ;;  %1665 = vmatmul.mubr.bf16.gmra.mrb[44].mxu1 %v1230_v60  ;;  %v1191_v7 = vmul.f32 %v1127_v56, %v3188_v43  ;;  %v1065_v18 = vadd.f32 1.0, %v3347_v47  ;;  %v1184_v44 = vmul.f32 %v1120_v1, %v3839_v33  ;;  %v1069_v2 = vadd.f32 1.0, %v3377_v10 }
 0x216   :  { %v3539_v23 = vpop.eup %2356  ;;  %v1122_v15 = vmul.f32 0.5, %v1058_v6  ;;  %v1126_v58 = vmul.f32 0.5, %v1062_v35  ;;  %1575 = vmatprep.mubr.bf16.mxu0 %v1233_v48  ;;  %v1188_v39 = vmul.f32 %v1124_v22, %v3158_v40  ;;  %v1067_v20 = vadd.f32 1.0, %v3353_v62  ;;  %v3841_v6 = vld [vmem:[#allocation65_spill] sm:$0xff] }
 0x217   :  { %v1235_v53 = vpack.c.bf16 %v1191_v7, %v1187_v8  ;;  %v1129_v12 = vmul.f32 0.5, %v1065_v18  ;;  %v1133_v47 = vmul.f32 0.5, %v1069_v2  ;;  %v1071_v54 = vadd.f32 1.0, %v3386_v13  ;;  %v3842_v7 = vld [vmem:[#allocation67_spill] sm:$0xff]  ;;  %v3843_v18 = vld [vmem:[#allocation66_spill] sm:$0xff]  ;;  %v3845_v2 = vld [vmem:[#allocation33_spill] sm:$0xff] }
 0x218   :  { %v1186_v43 = vmul.f32 %v1122_v15, %v3840_v16  ;;  %v1190_v14 = vmul.f32 %v1126_v58, %v3172_v30  ;;  %v1232_v34 = vpack.c.bf16 %v1188_v39, %v1184_v44  ;;  %v1131_v60 = vmul.f32 0.5, %v1067_v20 }
 0x219   :  { %1672 = vmatprep.mubr.bf16.mxu1 %v1235_v53  ;;  %v1193_v5 = vmul.f32 %v1129_v12, %v3236_v25  ;;  %v1064_v10 = vadd.f32 1.0, %v3320_v38  ;;  %v1197_v40 = vmul.f32 %v1133_v47, %v3267_v26  ;;  %v1135_v56 = vmul.f32 0.5, %v1071_v54  ;;  %v3846_v47 = vld [vmem:[#allocation41_spill] sm:$0xff] }
 0x21a   :  { %v1234_v21 = vpack.c.bf16 %v1190_v14, %v1186_v43  ;;  %v1068_v62 = vadd.f32 1.0, %v3364_v31  ;;  %v1195_v55 = vmul.f32 %v1131_v60, %v3240_v51  ;;  %v1066_v30 = vadd.f32 1.0, %v3327_v11  ;;  %v3848_v60 = vld [vmem:[#allocation34_spill] sm:$0xff] }
 0x21b   :  { %v1128_v24 = vmul.f32 0.5, %v1064_v10  ;;  %v1070_v13 = vadd.f32 1.0, %v3371_v59  ;;  %v1237_v8 = vpack.c.bf16 %v1197_v40, %v1193_v5  ;;  %v1199_v25 = vmul.f32 %v1135_v56, %v3275_v27  ;;  %v3844_v27 = vld [vmem:[#allocation68_spill] sm:$0xff] }
 0x21c   :  { %1576 = vmatmul.mubr.bf16.gmra.mrb[48].mxu0 %v1232_v34  ;;  %v1132_v1 = vmul.f32 0.5, %v1068_v62  ;;  %v1073_v38 = vadd.f32 1.0, %v3432_v4  ;;  %v1130_v35 = vmul.f32 0.5, %v1066_v30  ;;  %v1077_v31 = vadd.f32 1.0, %v3469_v63  ;;  %v3847_v34 = vld [vmem:[#allocation19_spill] sm:$0xff] }
 0x21d   :  { %1673 = vmatmul.mubr.bf16.gmra.mrb[48].mxu1 %v1234_v21  ;;  %v1192_v26 = vmul.f32 %v1128_v24, %v3841_v6  ;;  %v1134_v48 = vmul.f32 0.5, %v1070_v13  ;;  %1583 = vmatprep.mubr.bf16.mxu0 %v1237_v8  ;;  %v1239_v51 = vpack.c.bf16 %v1199_v25, %v1195_v55  ;;  %v1075_v59 = vadd.f32 1.0, %v3442_v52  ;;  %v3850_v55 = vld [vmem:[#allocation24_spill] sm:$0xff] }
 0x21e   :  { %v1196_v11 = vmul.f32 %v1132_v1, %v3842_v7  ;;  %v1137_v22 = vmul.f32 0.5, %v1073_v38  ;;  %v1194_v33 = vmul.f32 %v1130_v35, %v3843_v18  ;;  %v1141_v15 = vmul.f32 0.5, %v1077_v31  ;;  %v3851_v8 = vld [vmem:[#allocation20_spill] sm:$0xff]  ;;  %v3852_v1 = vld [vmem:[#allocation29_spill] sm:$0xff] }
 0x21f   :  { %v1198_v44 = vmul.f32 %v1134_v48, %v3844_v27  ;;  %v1079_v4 = vadd.f32 1.0, %v3482_v32  ;;  %1680 = vmatprep.mubr.bf16.mxu1 %v1239_v51  ;;  %v1139_v39 = vmul.f32 0.5, %v1075_v59  ;;  %v1072_v63 = vadd.f32 1.0, %v3416_v49  ;;  %v3849_v49 = vld [vmem:[#allocation23_spill] sm:$0xff] }
 0x220   :  { %v1236_v58 = vpack.c.bf16 %v1196_v11, %v1192_v26  ;;  %v1201_v53 = vmul.f32 %v1137_v22, %v3845_v2  ;;  %v1205_v20 = vmul.f32 %v1141_v15, %v3369_v37  ;;  %v1076_v52 = vadd.f32 1.0, %v3451_v41  ;;  %v3853_v15 = vld [vmem:[#allocation18_spill] sm:$0xff] }
 0x221   :  { %v1238_v12 = vpack.c.bf16 %v1198_v44, %v1194_v33  ;;  %v1143_v16 = vmul.f32 0.5, %v1079_v4  ;;  %v1203_v43 = vmul.f32 %v1139_v39, %v3341_v3  ;;  %v1136_v14 = vmul.f32 0.5, %v1072_v63  ;;  %v3595_v2 = vld [vmem:[%s3658_s5] ss:$0 sm:$0xff] }
 0x222   :  { %v1074_v54 = vadd.f32 1.0, %v3846_v47  ;;  %v1078_v32 = vadd.f32 1.0, %v3847_v34  ;;  %v1241_v5 = vpack.c.bf16 %v1205_v20, %v1201_v53  ;;  %v1140_v21 = vmul.f32 0.5, %v1076_v52 }
 0x223   :  { %v1207_v10 = vmul.f32 %v1143_v16, %v3848_v60  ;;  %v1081_v40 = vadd.f32 1.0, %v3517_v19  ;;  %v1200_v56 = vmul.f32 %v1136_v14, %v3849_v49  ;;  %v1085_v41 = vadd.f32 1.0, %v3535_v28 }
 0x224   :  { %1584 = vmatmul.mubr.bf16.gmra.mrb[52].mxu0 %v1236_v58  ;;  %v1138_v37 = vmul.f32 0.5, %v1074_v54  ;;  %v1142_v62 = vmul.f32 0.5, %v1078_v32  ;;  %v1204_v24 = vmul.f32 %v1140_v21, %v3850_v55  ;;  %v1083_v13 = vadd.f32 1.0, %v3522_v50 }
 0x225   :  { %1681 = vmatmul.mubr.bf16.gmra.mrb[52].mxu1 %v1238_v12  ;;  %1591 = vmatprep.mubr.bf16.mxu0 %v1241_v5  ;;  %v1243_v3 = vpack.c.bf16 %v1207_v10, %v1203_v43  ;;  %v1145_v30 = vmul.f32 0.5, %v1081_v40  ;;  %v1149_v19 = vmul.f32 0.5, %v1085_v41  ;;  %v1087_v6 = vadd.f32 1.0, %v3539_v23  ;;  %v3855_v5 = vld [vmem:[#allocation2_spill] sm:$0xff]  ;;  %v3856_v10 = vld [vmem:[#allocation4_spill] sm:$0xff] }
 0x226   :  { %v1202_v25 = vmul.f32 %v1138_v37, %v3851_v8  ;;  %v1206_v38 = vmul.f32 %v1142_v62, %v3852_v1  ;;  %v1240_v26 = vpack.c.bf16 %v1204_v24, %v1200_v56  ;;  %v1147_v28 = vmul.f32 0.5, %v1083_v13 }
 0x227   :  { %1688 = vmatprep.mubr.bf16.mxu1 %v1243_v3  ;;  %v1209_v35 = vmul.f32 %v1145_v30, %v3430_v42  ;;  %v1080_v48 = vadd.f32 1.0, %v3509_v61  ;;  %v1213_v51 = vmul.f32 %v1149_v19, %v3467_v29  ;;  %v1151_v7 = vmul.f32 0.5, %v1087_v6 }
 0x228   :  { %v1242_v31 = vpack.c.bf16 %v1206_v38, %v1202_v25  ;;  %v1084_v50 = vadd.f32 1.0, %v3526_v36  ;;  %v1082_v22 = vadd.f32 1.0, %v3513_v17  ;;  %v1086_v59 = vadd.f32 1.0, %v3530_v9  ;;  %v3854_v36 = vld [vmem:[#allocation21_spill] sm:$0xff] }
 0x229   :  { %v1144_v11 = vmul.f32 0.5, %v1080_v48  ;;  %v1245_v18 = vpack.c.bf16 %v1213_v51, %v1209_v35  ;;  %v1211_v23 = vmul.f32 %v1147_v28, %v3440_v57  ;;  %v1215_v33 = vmul.f32 %v1151_v7, %v3476_v0  ;;  %v3858_v28 = vld [vmem:[#allocation5_spill] sm:$0xff] }
 0x22a   :  { %v1148_v42 = vmul.f32 0.5, %v1084_v50  ;;  %v1146_v27 = vmul.f32 0.5, %v1082_v22  ;;  %v1150_v44 = vmul.f32 0.5, %v1086_v59 }
 0x22b   :  { %v1247_v61 = vpack.c.bf16 %v1215_v33, %v1211_v23  ;;  %v1208_v29 = vmul.f32 %v1144_v11, %v3853_v15 }
 0x22c   :  { %1592 = vmatmul.mubr.bf16.gmra.mrb[56].mxu0 %v1240_v26  ;;  %v1212_v4 = vmul.f32 %v1148_v42, %v3449_v45  ;;  %v1210_v17 = vmul.f32 %v1146_v27, %v3854_v36  ;;  %v1214_v9 = vmul.f32 %v1150_v44, %v3458_v46  ;;  %v3857_v26 = vld [vmem:[#allocation3_spill] sm:$0xff] }
 0x22d   :  { %1689 = vmatmul.mubr.bf16.gmra.mrb[56].mxu1 %v1242_v31  ;;  %1599 = vmatprep.mubr.bf16.mxu0 %v1245_v18  ;;  %v3859_v36 = vld [vmem:[#allocation7_spill] sm:$0xff] }
 0x22e   :  { %1696 = vmatprep.mubr.bf16.mxu1 %v1247_v61  ;;  %v1244_v58 = vpack.c.bf16 %v1212_v4, %v1208_v29  ;;  %v1246_v57 = vpack.c.bf16 %v1214_v9, %v1210_v17  ;;  %v3860_v9 = vld [vmem:[#allocation6_spill] sm:$0xff] }
 0x234   :  { %1600 = vmatmul.mubr.bf16.gmra.mrb[60].mxu0 %v1244_v58 }
 0x235   :  { %1697 = vmatmul.mubr.bf16.gmra.mrb[60].mxu1 %v1246_v57 }
 0x2a6   :  { %v2005_v0 = vpop.f32.mrb[32].mxu0 }
 0x2a7   :  { %v2006_v53 = vpop.f32.mrb[33].mxu0 }
 0x2a8   :  { %v2007_v39 = vadd.f32 %v2006_v53, %v2005_v0  ;;  %v2008_v45 = vpop.f32.mrb[34].mxu0 }
 0x2a9   :  { %v2009_v63 = vpop.f32.mrb[35].mxu0 }
 0x2aa   :  { %v2069_v12 = vpop.f32.mrb[32].mxu1  ;;  %v1546_v20 = vadd.f32 %v2007_v39, %v3595_v2  ;;  %v2010_v16 = vadd.f32 %v2009_v63, %v2008_v45 }
 0x2ab   :  { %v2070_v46 = vpop.f32.mrb[33].mxu1 }
 0x2ac   :  { %v2071_v52 = vadd.f32 %v2070_v46, %v2069_v12  ;;  %v2072_v43 = vpop.f32.mrb[34].mxu1  ;;  %v1549_v14 = vadd.f32 %v2010_v16, %v3595_v2 }
 0x2ad   :  { %v2073_v47 = vpop.f32.mrb[35].mxu1 }
 0x2ae   :  { %v1643_v54 = vadd.f32 %v2071_v52, %v1546_v20  ;;  %v2074_v34 = vadd.f32 %v2073_v47, %v2072_v43 }
 0x2b0   :  { %v1646_v32 = vadd.f32 %v2074_v34, %v1549_v14  ;;  %v1705_v60 = vadd.f32 %v3855_v5, %v1643_v54 }
 0x2b2   :  { %v1706_v21 = vadd.f32 %v3856_v10, %v1646_v32 }
 0x2b4   :  { %v1938_v40 = vpack.c.bf16 %v1706_v21, %v1705_v60  ;;  %v3861_v21 = vld [vmem:[#allocation9_spill] sm:$0xff] }
 0x2b6   :  { %1939 = vst [vmem:[%s3659_s6] sm:$0xff] %v1938_v40  }
 0x2bc   :  { %v2011_v49 = vpop.f32.mrb[36].mxu0 }
 0x2bd   :  { %v2012_v56 = vpop.f32.mrb[37].mxu0 }
 0x2be   :  { %v2075_v37 = vpop.f32.mrb[36].mxu1  ;;  %v2013_v62 = vadd.f32 %v2012_v56, %v2011_v49  ;;  %v2014_v41 = vpop.f32.mrb[38].mxu0  ;;  %v3862_v49 = vld [vmem:[#allocation8_spill] sm:$0xff] }
 0x2bf   :  { %v2076_v3 = vpop.f32.mrb[37].mxu1  ;;  %v2015_v55 = vpop.f32.mrb[39].mxu0 }
 0x2c0   :  { %v1554_v24 = vadd.f32 %v2013_v62, %v3595_v2  ;;  %v2077_v30 = vadd.f32 %v2076_v3, %v2075_v37  ;;  %v2078_v13 = vpop.f32.mrb[38].mxu1  ;;  %v2016_v8 = vadd.f32 %v2015_v55, %v2014_v41 }
 0x2c1   :  { %v2079_v25 = vpop.f32.mrb[39].mxu1 }
 0x2c2   :  { %v1651_v1 = vadd.f32 %v2077_v30, %v1554_v24  ;;  %v1557_v38 = vadd.f32 %v2016_v8, %v3595_v2  ;;  %v2080_v19 = vadd.f32 %v2079_v25, %v2078_v13 }
 0x2c4   :  { %v1654_v6 = vadd.f32 %v2080_v19, %v1557_v38  ;;  %v1707_v35 = vadd.f32 %v3857_v26, %v1651_v1 }
 0x2c6   :  { %v1708_v48 = vadd.f32 %v3858_v28, %v1654_v6 }
 0x2c8   :  { %v1943_v31 = vpack.c.bf16 %v1708_v48, %v1707_v35  ;;  %v3863_v48 = vld [vmem:[#allocation11_spill] sm:$0xff] }
 0x2ca   :  { %1982 = vst [vmem:[%s3659_s6 + $0x8] sm:$0xff] %v1943_v31  }
 0x2d2   :  { %v2017_v51 = vpop.f32.mrb[40].mxu0 }
 0x2d3   :  { %v2081_v7 = vpop.f32.mrb[40].mxu1  ;;  %v2018_v50 = vpop.f32.mrb[41].mxu0 }
 0x2d4   :  { %v2019_v11 = vadd.f32 %v2018_v50, %v2017_v51  ;;  %v2082_v22 = vpop.f32.mrb[41].mxu1  ;;  %v2020_v59 = vpop.f32.mrb[42].mxu0  ;;  %v3864_v51 = vld [vmem:[#allocation10_spill] sm:$0xff] }
 0x2d5   :  { %v2083_v18 = vadd.f32 %v2082_v22, %v2081_v7  ;;  %v2084_v23 = vpop.f32.mrb[42].mxu1  ;;  %v2021_v33 = vpop.f32.mrb[43].mxu0 }
 0x2d6   :  { %v1562_v42 = vadd.f32 %v2019_v11, %v3595_v2  ;;  %v2022_v27 = vadd.f32 %v2021_v33, %v2020_v59  ;;  %v2085_v44 = vpop.f32.mrb[43].mxu1 }
 0x2d7   :  { %v2086_v61 = vadd.f32 %v2085_v44, %v2084_v23 }
 0x2d8   :  { %v1659_v15 = vadd.f32 %v2083_v18, %v1562_v42  ;;  %v1565_v29 = vadd.f32 %v2022_v27, %v3595_v2 }
 0x2da   :  { %v1662_v4 = vadd.f32 %v2086_v61, %v1565_v29  ;;  %v1709_v17 = vadd.f32 %v3859_v36, %v1659_v15 }
 0x2dc   :  { %v1710_v58 = vadd.f32 %v3860_v9, %v1662_v4 }
 0x2de   :  { %v1948_v57 = vpack.c.bf16 %v1710_v58, %v1709_v17  ;;  %v3865_v58 = vld [vmem:[#allocation13_spill] sm:$0xff] }
 0x2e0   :  { %1983 = vst [vmem:[%s3659_s6 + $0x10] sm:$0xff] %v1948_v57  }
 0x2e7   :  { %v2023_v0 = vpop.f32.mrb[44].mxu0 }
 0x2e8   :  { %v2087_v53 = vpop.f32.mrb[44].mxu1  ;;  %v2024_v39 = vpop.f32.mrb[45].mxu0 }
 0x2e9   :  { %v2025_v45 = vadd.f32 %v2024_v39, %v2023_v0  ;;  %v2088_v63 = vpop.f32.mrb[45].mxu1  ;;  %v2026_v12 = vpop.f32.mrb[46].mxu0  ;;  %v3866_v0 = vld [vmem:[#allocation12_spill] sm:$0xff] }
 0x2ea   :  { %v2089_v20 = vadd.f32 %v2088_v63, %v2087_v53  ;;  %v2090_v16 = vpop.f32.mrb[46].mxu1  ;;  %v2027_v46 = vpop.f32.mrb[47].mxu0 }
 0x2eb   :  { %v1570_v52 = vadd.f32 %v2025_v45, %v3595_v2  ;;  %v2028_v43 = vadd.f32 %v2027_v46, %v2026_v12  ;;  %v2091_v14 = vpop.f32.mrb[47].mxu1 }
 0x2ec   :  { %v2092_v47 = vadd.f32 %v2091_v14, %v2090_v16 }
 0x2ed   :  { %v1667_v54 = vadd.f32 %v2089_v20, %v1570_v52  ;;  %v1573_v34 = vadd.f32 %v2028_v43, %v3595_v2 }
 0x2ef   :  { %v1670_v32 = vadd.f32 %v2092_v47, %v1573_v34  ;;  %v2029_v5 = vpop.f32.mrb[48].mxu0  ;;  %v1711_v40 = vadd.f32 %v3861_v21, %v1667_v54  ;;  %v3867_v21 = vld [vmem:[#allocation15_spill] sm:$0xff] }
 0x2f0   :  { %v2093_v60 = vpop.f32.mrb[48].mxu1  ;;  %v2030_v10 = vpop.f32.mrb[49].mxu0 }
 0x2f1   :  { %v1712_v56 = vadd.f32 %v3862_v49, %v1670_v32  ;;  %v2031_v37 = vadd.f32 %v2030_v10, %v2029_v5  ;;  %v2094_v62 = vpop.f32.mrb[49].mxu1  ;;  %v2032_v41 = vpop.f32.mrb[50].mxu0  ;;  %v3868_v49 = vld [vmem:[#allocation14_spill] sm:$0xff] }
 0x2f2   :  { %v2095_v3 = vadd.f32 %v2094_v62, %v2093_v60  ;;  %v2096_v55 = vpop.f32.mrb[50].mxu1  ;;  %v2033_v24 = vpop.f32.mrb[51].mxu0 }
 0x2f3   :  { %v1953_v30 = vpack.c.bf16 %v1712_v56, %v1711_v40  ;;  %v1578_v13 = vadd.f32 %v2031_v37, %v3595_v2  ;;  %v2034_v8 = vadd.f32 %v2033_v24, %v2032_v41  ;;  %v2097_v25 = vpop.f32.mrb[51].mxu1 }
 0x2f4   :  { %v2098_v1 = vadd.f32 %v2097_v25, %v2096_v55 }
 0x2f5   :  { %1984 = vst [vmem:[%s3659_s6 + $0x18] sm:$0xff] %v1953_v30   ;;  %v1675_v38 = vadd.f32 %v2095_v3, %v1578_v13  ;;  %v1581_v19 = vadd.f32 %v2034_v8, %v3595_v2 }
 0x2f7   :  { %v1678_v6 = vadd.f32 %v2098_v1, %v1581_v19  ;;  %v2035_v26 = vpop.f32.mrb[52].mxu0  ;;  %v1713_v31 = vadd.f32 %v3863_v48, %v1675_v38 }
 0x2f8   :  { %v2099_v35 = vpop.f32.mrb[52].mxu1  ;;  %v2036_v28 = vpop.f32.mrb[53].mxu0 }
 0x2f9   :  { %v1714_v7 = vadd.f32 %v3864_v51, %v1678_v6  ;;  %v2037_v50 = vadd.f32 %v2036_v28, %v2035_v26  ;;  %v2100_v11 = vpop.f32.mrb[53].mxu1  ;;  %v2038_v22 = vpop.f32.mrb[54].mxu0  ;;  %v3869_v26 = vld [vmem:[#allocation17_spill] sm:$0xff]  ;;  %v3870_v28 = vld [vmem:[#allocation16_spill] sm:$0xff] }
 0x2fa   :  { %v2101_v59 = vadd.f32 %v2100_v11, %v2099_v35  ;;  %v2102_v18 = vpop.f32.mrb[54].mxu1  ;;  %v2039_v23 = vpop.f32.mrb[55].mxu0 }
 0x2fb   :  { %v1958_v33 = vpack.c.bf16 %v1714_v7, %v1713_v31  ;;  %v1586_v42 = vadd.f32 %v2037_v50, %v3595_v2  ;;  %v2040_v27 = vadd.f32 %v2039_v23, %v2038_v22  ;;  %v2103_v44 = vpop.f32.mrb[55].mxu1 }
 0x2fc   :  { %v2104_v61 = vadd.f32 %v2103_v44, %v2102_v18 }
 0x2fd   :  { %1985 = vst [vmem:[%s3659_s6 + $0x20] sm:$0xff] %v1958_v33   ;;  %v1683_v15 = vadd.f32 %v2101_v59, %v1586_v42  ;;  %v1589_v29 = vadd.f32 %v2040_v27, %v3595_v2 }
 0x2ff   :  { %v1686_v4 = vadd.f32 %v2104_v61, %v1589_v29  ;;  %v2041_v36 = vpop.f32.mrb[56].mxu0  ;;  %v1715_v57 = vadd.f32 %v3865_v58, %v1683_v15 }
 0x300   :  { %v2105_v17 = vpop.f32.mrb[56].mxu1  ;;  %v2042_v9 = vpop.f32.mrb[57].mxu0 }
 0x301   :  { %v1716_v53 = vadd.f32 %v3866_v0, %v1686_v4  ;;  %v2043_v39 = vadd.f32 %v2042_v9, %v2041_v36  ;;  %v2106_v45 = vpop.f32.mrb[57].mxu1  ;;  %v2044_v63 = vpop.f32.mrb[58].mxu0 }
 0x302   :  { %v2107_v12 = vadd.f32 %v2106_v45, %v2105_v17  ;;  %v2108_v20 = vpop.f32.mrb[58].mxu1  ;;  %v2045_v16 = vpop.f32.mrb[59].mxu0 }
 0x303   :  { %v1963_v46 = vpack.c.bf16 %v1716_v53, %v1715_v57  ;;  %v1594_v52 = vadd.f32 %v2043_v39, %v3595_v2  ;;  %v2046_v43 = vadd.f32 %v2045_v16, %v2044_v63  ;;  %v2109_v14 = vpop.f32.mrb[59].mxu1 }
 0x304   :  { %v2110_v47 = vadd.f32 %v2109_v14, %v2108_v20 }
 0x305   :  { %1986 = vst [vmem:[%s3659_s6 + $0x28] sm:$0xff] %v1963_v46   ;;  %v1691_v54 = vadd.f32 %v2107_v12, %v1594_v52  ;;  %v1597_v34 = vadd.f32 %v2046_v43, %v3595_v2 }
 0x307   :  { %v1694_v32 = vadd.f32 %v2110_v47, %v1597_v34  ;;  %v2047_v5 = vpop.f32.mrb[60].mxu0  ;;  %v1717_v40 = vadd.f32 %v3867_v21, %v1691_v54 }
 0x308   :  { %v2111_v60 = vpop.f32.mrb[60].mxu1  ;;  %v2048_v10 = vpop.f32.mrb[61].mxu0 }
 0x309   :  { %v1718_v56 = vadd.f32 %v3868_v49, %v1694_v32  ;;  %v2049_v37 = vadd.f32 %v2048_v10, %v2047_v5  ;;  %v2112_v62 = vpop.f32.mrb[61].mxu1  ;;  %v2050_v41 = vpop.f32.mrb[62].mxu0 }
 0x30a   :  { %v2113_v3 = vadd.f32 %v2112_v62, %v2111_v60  ;;  %v2114_v55 = vpop.f32.mrb[62].mxu1  ;;  %v2051_v24 = vpop.f32.mrb[63].mxu0 }
 0x30b   :  { %v1968_v30 = vpack.c.bf16 %v1718_v56, %v1717_v40  ;;  %v1602_v13 = vadd.f32 %v2049_v37, %v3595_v2  ;;  %v2052_v8 = vadd.f32 %v2051_v24, %v2050_v41  ;;  %v2115_v25 = vpop.f32.mrb[63].mxu1 }
 0x30c   :  { %v2116_v1 = vadd.f32 %v2115_v25, %v2114_v55 }
 0x30d   :  { %1987 = vst [vmem:[%s3659_s6 + $0x30] sm:$0xff] %v1968_v30   ;;  %v1699_v38 = vadd.f32 %v2113_v3, %v1602_v13  ;;  %v1605_v19 = vadd.f32 %v2052_v8, %v3595_v2 }
 0x30f   :  { %v1702_v6 = vadd.f32 %v2116_v1, %v1605_v19  ;;  %v1719_v35 = vadd.f32 %v3869_v26, %v1699_v38 }
 0x311   :  { %v1720_v48 = vadd.f32 %v3870_v28, %v1702_v6 }
 0x313   :  { %v1973_v31 = vpack.c.bf16 %v1720_v48, %v1719_v35 }
 0x315   :  { %1988 = vst [vmem:[%s3659_s6 + $0x38] sm:$0xff] %v1973_v31  }

</bundles_post_ra>
